<compile_context>
chip_gen: v6e
topology: v6e:2x2x1
jax: 0.10.0
libtpu: 0.0.40
codegen_flags: <defaults>
</compile_context>

<pallas_src>
import numpy as np
import jax
import jax.numpy as jnp
from jax.experimental import pallas as pl
from jax.experimental.pallas import tpu as pltpu


# ----------------------------------------------------------------------------
# Fully fused Inception_A kernel (one image per grid step).
# ----------------------------------------------------------------------------
def _inception_a_kernel(x_ref, ws_ref, bs_ref,
                        w11_ref, b11_ref, w21_ref, b21_ref,
                        w22_ref, b22_ref, w3_ref, b3_ref,
                        o_ref, pad64_ref, pad96_ref, padc_ref):
    H, W, C = x_ref.shape                    # (H, W, 384)
    x = x_ref[...]

    # ---- fused 1x1 stem: [branch0 | branch1.0 | branch2.0] in one matmul ---
    x2d = x.reshape(H * W, C)
    stem = jnp.dot(x2d, ws_ref[...], preferred_element_type=jnp.float32)
    stem = jnp.maximum(stem + bs_ref[...], 0.0)          # (H*W, 224)
    b0 = stem[:, 0:96].reshape(H, W, 96)                 # branch0 output
    t1 = stem[:, 96:160].reshape(H, W, 64)               # branch1 stem
    t2 = stem[:, 160:224].reshape(H, W, 64)              # branch2 stem

    # ---- 3x3 conv (stride 1, pad 1) + bias + ReLU: 9 shifted matmuls -------
    def conv3x3(t, pad_ref, w_ref, b_ref):
        cin = t.shape[-1]
        cout = w_ref.shape[-1]
        pad_ref[...] = jnp.zeros_like(pad_ref)           # zeroed halo in VMEM
        pad_ref[1:H + 1, 1:W + 1, :] = t
        xp = pad_ref[...]
        wfull = w_ref[...]
        acc = None
        for kh in range(3):
            for kw in range(3):
                patch = xp[kh:kh + H, kw:kw + W, :].reshape(H * W, cin)
                d = jnp.dot(patch, wfull[kh, kw],
                            preferred_element_type=jnp.float32)
                acc = d if acc is None else acc + d
        return jnp.maximum(acc + b_ref[...], 0.0).reshape(H, W, cout)

    b1 = conv3x3(t1, pad64_ref, w11_ref, b11_ref)        # 64 -> 96
    s2 = conv3x3(t2, pad64_ref, w21_ref, b21_ref)        # 64 -> 96
    b2 = conv3x3(s2, pad96_ref, w22_ref, b22_ref)        # 96 -> 96

    # ---- branch3: avgpool3x3 (count_include_pad=False) fused with 1x1 ------
    padc_ref[...] = jnp.zeros_like(padc_ref)
    padc_ref[1:H + 1, 1:W + 1, :] = x
    xp = padc_ref[...]
    pool = None
    for kh in range(3):
        for kw in range(3):
            sl = xp[kh:kh + H, kw:kw + W, :]
            pool = sl if pool is None else pool + sl
    hi = jax.lax.broadcasted_iota(jnp.int32, (H, W, C), 0)
    wi = jax.lax.broadcasted_iota(jnp.int32, (H, W, C), 1)
    cnt_h = jnp.minimum(hi, 1) + 1 + jnp.minimum((H - 1) - hi, 1)
    cnt_w = jnp.minimum(wi, 1) + 1 + jnp.minimum((W - 1) - wi, 1)
    pool = pool / (cnt_h * cnt_w).astype(jnp.float32)
    b3 = jnp.dot(pool.reshape(H * W, C), w3_ref[...],
                 preferred_element_type=jnp.float32)
    b3 = jnp.maximum(b3 + b3_ref[...], 0.0).reshape(H, W, 96)

    # ---- single lane-dense 384-wide store (torch concat order) -------------
    o_ref[...] = jnp.concatenate([b0, b1, b2, b3], axis=-1).astype(o_ref.dtype)


# ----------------------------------------------------------------------------
# Wrapper: BN-scale folding + weight concat at trace time, one pallas_call.
# ----------------------------------------------------------------------------
def inception_a(x_nchw, params):
    x = jnp.transpose(x_nchw, (0, 2, 3, 1))              # NCHW -> NHWC
    N, H, W, C = x.shape

    def fold1x1(p):   # (cin, cout) * scale  ->  conv+BN fused weight
        return p["wk"] * p["scale"][None, :], p["bias"].reshape(1, -1)

    def fold3x3(p):   # (3, 3, cin, cout) * scale
        return p["wk"] * p["scale"][None, None, None, :], p["bias"].reshape(1, -1)

    w0, c0 = fold1x1(params["b0"])
    w10, c10 = fold1x1(params["b1_0"])
    w20, c20 = fold1x1(params["b2_0"])
    ws = jnp.concatenate([w0, w10, w20], axis=1)         # (384, 224)
    bs = jnp.concatenate([c0, c10, c20], axis=1)         # (1, 224)
    w11, c11 = fold3x3(params["b1_1"])
    w21, c21 = fold3x3(params["b2_1"])
    w22, c22 = fold3x3(params["b2_2"])
    w3, c3 = fold1x1(params["b3"])

    cout_total = 384
    out = pl.pallas_call(
        _inception_a_kernel,
        out_shape=jax.ShapeDtypeStruct((N, H, W, cout_total), x.dtype),
        grid=(N,),
        in_specs=[
            pl.BlockSpec((None, H, W, C), lambda n: (n, 0, 0, 0)),
            pl.BlockSpec((C, 224), lambda n: (0, 0)),
            pl.BlockSpec((1, 224), lambda n: (0, 0)),
            pl.BlockSpec((3, 3, 64, 96), lambda n: (0, 0, 0, 0)),
            pl.BlockSpec((1, 96), lambda n: (0, 0)),
            pl.BlockSpec((3, 3, 64, 96), lambda n: (0, 0, 0, 0)),
            pl.BlockSpec((1, 96), lambda n: (0, 0)),
            pl.BlockSpec((3, 3, 96, 96), lambda n: (0, 0, 0, 0)),
            pl.BlockSpec((1, 96), lambda n: (0, 0)),
            pl.BlockSpec((C, 96), lambda n: (0, 0)),
            pl.BlockSpec((1, 96), lambda n: (0, 0)),
        ],
        out_specs=pl.BlockSpec((None, H, W, cout_total), lambda n: (n, 0, 0, 0)),
        scratch_shapes=[
            pltpu.VMEM((H + 2, W + 2, 64), jnp.float32),   # branch1/2 3x3 input
            pltpu.VMEM((H + 2, W + 2, 96), jnp.float32),   # branch2 second 3x3
            pltpu.VMEM((H + 2, W + 2, C), jnp.float32),    # avgpool input
        ],
        compiler_params=pltpu.CompilerParams(
            dimension_semantics=("parallel",)),
    )(x, ws, bs, w11, c11, w21, c21, w22, c22, w3, c3)

    return jnp.transpose(out, (0, 3, 1, 2))              # NHWC -> NCHW


# ----------------------------------------------------------------------------
# Deterministic parameter init (torch shapes, converted to kernel layouts)
# ----------------------------------------------------------------------------
def init_basic_conv(key, cin, cout, k):
    kw, kg, kb, km, kv = jax.random.split(key, 5)
    w = jax.random.normal(kw, (cout, cin, k, k), jnp.float32) * (cin * k * k) ** -0.5
    gamma = 1.0 + 0.1 * jax.random.normal(kg, (cout,), jnp.float32)
    beta = 0.1 * jax.random.normal(kb, (cout,), jnp.float32)
    mean = 0.1 * jax.random.normal(km, (cout,), jnp.float32)
    var = jnp.abs(1.0 + 0.1 * jax.random.normal(kv, (cout,), jnp.float32))
    scale = gamma / jnp.sqrt(var + 1e-3)
    bias = beta - mean * scale
    if k == 1:
        wk = jnp.transpose(w[:, :, 0, 0], (1, 0))        # (cin, cout)
    else:
        wk = jnp.transpose(w, (2, 3, 1, 0))              # (k, k, cin, cout)
    return {"w_oihw": w, "wk": wk, "scale": scale, "bias": bias,
            "pad": 0 if k == 1 else 1}


# ----------------------------------------------------------------------------
# Pure-JAX reference (NCHW, mirrors the PyTorch forward) for verification
# ----------------------------------------------------------------------------
def _ref_basic(x, p):
    pad = p["pad"]
    y = jax.lax.conv_general_dilated(
        x, p["w_oihw"], (1, 1), [(pad, pad), (pad, pad)],
        dimension_numbers=("NCHW", "OIHW", "NCHW"),
        precision=jax.lax.Precision.HIGHEST)
    y = y * p["scale"][None, :, None, None] + p["bias"][None, :, None, None]
    return jnp.maximum(y, 0.0)


def _ref_avgpool(x):
    s = jax.lax.reduce_window(x, 0.0, jax.lax.add, (1, 1, 3, 3), (1, 1, 1, 1),
                              [(0, 0), (0, 0), (1, 1), (1, 1)])
    ones = jnp.ones(x.shape[2:], x.dtype)
    cnt = jax.lax.reduce_window(ones, 0.0, jax.lax.add, (3, 3), (1, 1),
                                [(1, 1), (1, 1)])
    return s / cnt[None, None]


def inception_a_ref(x, params):
    x0 = _ref_basic(x, params["b0"])
    x1 = _ref_basic(_ref_basic(x, params["b1_0"]), params["b1_1"])
    x2 = _ref_basic(_ref_basic(_ref_basic(x, params["b2_0"]), params["b2_1"]),
                    params["b2_2"])
    x3 = _ref_basic(_ref_avgpool(x), params["b3"])
    return jnp.concatenate([x0, x1, x2, x3], axis=1)


if __name__ == "__main__":
    key = jax.random.PRNGKey(0)
    ks = jax.random.split(key, 8)
    params = {
        "b0":   init_basic_conv(ks[0], 384, 96, 1),
        "b1_0": init_basic_conv(ks[1], 384, 64, 1),
        "b1_1": init_basic_conv(ks[2], 64, 96, 3),
        "b2_0": init_basic_conv(ks[3], 384, 64, 1),
        "b2_1": init_basic_conv(ks[4], 64, 96, 3),
        "b2_2": init_basic_conv(ks[5], 96, 96, 3),
        "b3":   init_basic_conv(ks[6], 384, 96, 1),
    }
    # Inception_A requires 384 input channels; keep batch/spatial small.
    x = jax.random.normal(ks[7], (2, 384, 8, 8), jnp.float32)

    out = jax.block_until_ready(jax.jit(inception_a)(x, params))
    assert out.shape == (2, 384, 8, 8)

    ref = inception_a_ref(x, params)
    np.testing.assert_allclose(np.asarray(out), np.asarray(ref),
                               rtol=2e-3, atol=2e-3)
    print("KERNEL_OK")
</pallas_src>

<mosaic_0001>
module attributes {stable_mosaic.version = 11 : i64} {
  func.func @_inception_a_kernel(%arg0: i32, %arg1: memref<1x8x8x384xf32, #tpu.memory_space<vmem>>, %arg2: memref<384x224xf32, #tpu.memory_space<vmem>>, %arg3: memref<1x224xf32, #tpu.memory_space<vmem>>, %arg4: memref<3x3x64x96xf32, #tpu.memory_space<vmem>>, %arg5: memref<1x96xf32, #tpu.memory_space<vmem>>, %arg6: memref<3x3x64x96xf32, #tpu.memory_space<vmem>>, %arg7: memref<1x96xf32, #tpu.memory_space<vmem>>, %arg8: memref<3x3x96x96xf32, #tpu.memory_space<vmem>>, %arg9: memref<1x96xf32, #tpu.memory_space<vmem>>, %arg10: memref<384x96xf32, #tpu.memory_space<vmem>>, %arg11: memref<1x96xf32, #tpu.memory_space<vmem>>, %arg12: memref<1x8x8x384xf32, #tpu.memory_space<vmem>>, %arg13: memref<10x10x64xf32, #tpu.memory_space<vmem>>, %arg14: memref<10x10x96xf32, #tpu.memory_space<vmem>>, %arg15: memref<10x10x384xf32, #tpu.memory_space<vmem>>) attributes {dimension_semantics = [#tpu.dimension_semantics<parallel>], iteration_bounds = array<i64: 2>, scalar_prefetch = 0 : i64, scratch_operands = 3 : i64, tpu.core_type = #tpu.core_type<tc>, window_params = [{transform_indices = @transform_0, window_bounds = array<i64: 1, 8, 8, 384>}, {pipeline_mode = #tpu.pipeline_mode<synchronous>, transform_indices = @transform_1, window_bounds = array<i64: 384, 224>}, {pipeline_mode = #tpu.pipeline_mode<synchronous>, transform_indices = @transform_2, window_bounds = array<i64: 1, 224>}, {pipeline_mode = #tpu.pipeline_mode<synchronous>, transform_indices = @transform_3, window_bounds = array<i64: 3, 3, 64, 96>}, {pipeline_mode = #tpu.pipeline_mode<synchronous>, transform_indices = @transform_4, window_bounds = array<i64: 1, 96>}, {pipeline_mode = #tpu.pipeline_mode<synchronous>, transform_indices = @transform_5, window_bounds = array<i64: 3, 3, 64, 96>}, {pipeline_mode = #tpu.pipeline_mode<synchronous>, transform_indices = @transform_6, window_bounds = array<i64: 1, 96>}, {pipeline_mode = #tpu.pipeline_mode<synchronous>, transform_indices = @transform_7, window_bounds = array<i64: 3, 3, 96, 96>}, {pipeline_mode = #tpu.pipeline_mode<synchronous>, transform_indices = @transform_8, window_bounds = array<i64: 1, 96>}, {pipeline_mode = #tpu.pipeline_mode<synchronous>, transform_indices = @transform_9, window_bounds = array<i64: 384, 96>}, {pipeline_mode = #tpu.pipeline_mode<synchronous>, transform_indices = @transform_10, window_bounds = array<i64: 1, 96>}, {transform_indices = @transform_11, window_bounds = array<i64: 1, 8, 8, 384>}]} {
    %c0 = arith.constant 0 : index
    %c0_0 = arith.constant 0 : index
    %c0_1 = arith.constant 0 : index
    %c0_2 = arith.constant 0 : index
    %0 = vector.load %arg1[%c0, %c0_0, %c0_1, %c0_2] : memref<1x8x8x384xf32, #tpu.memory_space<vmem>>, vector<1x8x8x384xf32>
    %1 = vector.shape_cast %0 : vector<1x8x8x384xf32> to vector<8x8x384xf32>
    %2 = vector.shape_cast %1 : vector<8x8x384xf32> to vector<64x384xf32>
    %c0_3 = arith.constant 0 : index
    %c0_4 = arith.constant 0 : index
    %3 = vector.load %arg2[%c0_3, %c0_4] : memref<384x224xf32, #tpu.memory_space<vmem>>, vector<384x224xf32>
    %cst = arith.constant dense<0.000000e+00> : vector<64x224xf32>
    %4 = tpu.matmul %2, %3, %cst {dimension_numbers = #tpu.dot_dimension_numbers<[1], [0], [0], [1], [0, 0, 1, 1], [], []>} : vector<64x384xf32>, vector<384x224xf32>, vector<64x224xf32> -> vector<64x224xf32>
    %c0_5 = arith.constant 0 : index
    %c0_6 = arith.constant 0 : index
    %5 = vector.load %arg3[%c0_5, %c0_6] : memref<1x224xf32, #tpu.memory_space<vmem>>, vector<1x224xf32>
    %6 = vector.broadcast %5 : vector<1x224xf32> to vector<64x224xf32>
    %7 = arith.addf %4, %6 : vector<64x224xf32>
    %cst_7 = arith.constant 0.000000e+00 : f32
    %8 = vector.broadcast %cst_7 : f32 to vector<64x224xf32>
    %9 = arith.maximumf %7, %8 : vector<64x224xf32>
    %10 = vector.extract_strided_slice %9 {offsets = [0, 0], sizes = [64, 96], strides = [1, 1]} : vector<64x224xf32> to vector<64x96xf32>
    %11 = vector.shape_cast %10 : vector<64x96xf32> to vector<8x8x96xf32>
    %12 = vector.extract_strided_slice %9 {offsets = [0, 96], sizes = [64, 64], strides = [1, 1]} : vector<64x224xf32> to vector<64x64xf32>
    %13 = vector.shape_cast %12 : vector<64x64xf32> to vector<8x8x64xf32>
    %14 = vector.extract_strided_slice %9 {offsets = [0, 160], sizes = [64, 64], strides = [1, 1]} : vector<64x224xf32> to vector<64x64xf32>
    %15 = vector.shape_cast %14 : vector<64x64xf32> to vector<8x8x64xf32>
    %cst_8 = arith.constant 0.000000e+00 : f32
    %16 = vector.broadcast %cst_8 : f32 to vector<10x10x64xf32>
    %c0_9 = arith.constant 0 : index
    %c0_10 = arith.constant 0 : index
    %c0_11 = arith.constant 0 : index
    %17 = vector.load %arg13[%c0_9, %c0_10, %c0_11] : memref<10x10x64xf32, #tpu.memory_space<vmem>>, vector<10x10x64xf32>
    tpu.vector_store %arg13[%c0_9, %c0_10, %c0_11], %16 {strides = array<i32>} : memref<10x10x64xf32, #tpu.memory_space<vmem>>, vector<10x10x64xf32>,
    %c1 = arith.constant 1 : index
    %c1_12 = arith.constant 1 : index
    %c0_13 = arith.constant 0 : index
    %18 = vector.load %arg13[%c1, %c1_12, %c0_13] : memref<10x10x64xf32, #tpu.memory_space<vmem>>, vector<8x8x64xf32>
    tpu.vector_store %arg13[%c1, %c1_12, %c0_13], %13 {strides = array<i32>} : memref<10x10x64xf32, #tpu.memory_space<vmem>>, vector<8x8x64xf32>,
    %c0_14 = arith.constant 0 : index
    %c0_15 = arith.constant 0 : index
    %c0_16 = arith.constant 0 : index
    %19 = vector.load %arg13[%c0_14, %c0_15, %c0_16] : memref<10x10x64xf32, #tpu.memory_space<vmem>>, vector<10x10x64xf32>
    %c0_17 = arith.constant 0 : index
    %c0_18 = arith.constant 0 : index
    %c0_19 = arith.constant 0 : index
    %c0_20 = arith.constant 0 : index
    %20 = vector.load %arg4[%c0_17, %c0_18, %c0_19, %c0_20] : memref<3x3x64x96xf32, #tpu.memory_space<vmem>>, vector<3x3x64x96xf32>
    %21 = vector.extract_strided_slice %19 {offsets = [0, 0, 0], sizes = [8, 8, 64], strides = [1, 1, 1]} : vector<10x10x64xf32> to vector<8x8x64xf32>
    %22 = vector.shape_cast %21 : vector<8x8x64xf32> to vector<64x64xf32>
    %23 = vector.extract_strided_slice %20 {offsets = [0, 0, 0, 0], sizes = [1, 1, 64, 96], strides = [1, 1, 1, 1]} : vector<3x3x64x96xf32> to vector<1x1x64x96xf32>
    %24 = vector.shape_cast %23 : vector<1x1x64x96xf32> to vector<64x96xf32>
    %cst_21 = arith.constant dense<0.000000e+00> : vector<64x96xf32>
    %25 = tpu.matmul %22, %24, %cst_21 {dimension_numbers = #tpu.dot_dimension_numbers<[1], [0], [0], [1], [0, 0, 1, 1], [], []>} : vector<64x64xf32>, vector<64x96xf32>, vector<64x96xf32> -> vector<64x96xf32>
    %26 = vector.extract_strided_slice %19 {offsets = [0, 1, 0], sizes = [8, 8, 64], strides = [1, 1, 1]} : vector<10x10x64xf32> to vector<8x8x64xf32>
    %27 = vector.shape_cast %26 : vector<8x8x64xf32> to vector<64x64xf32>
    %28 = vector.extract_strided_slice %20 {offsets = [0, 1, 0, 0], sizes = [1, 1, 64, 96], strides = [1, 1, 1, 1]} : vector<3x3x64x96xf32> to vector<1x1x64x96xf32>
    %29 = vector.shape_cast %28 : vector<1x1x64x96xf32> to vector<64x96xf32>
    %cst_22 = arith.constant dense<0.000000e+00> : vector<64x96xf32>
    %30 = tpu.matmul %27, %29, %cst_22 {dimension_numbers = #tpu.dot_dimension_numbers<[1], [0], [0], [1], [0, 0, 1, 1], [], []>} : vector<64x64xf32>, vector<64x96xf32>, vector<64x96xf32> -> vector<64x96xf32>
    %31 = arith.addf %25, %30 : vector<64x96xf32>
    %32 = vector.extract_strided_slice %19 {offsets = [0, 2, 0], sizes = [8, 8, 64], strides = [1, 1, 1]} : vector<10x10x64xf32> to vector<8x8x64xf32>
    %33 = vector.shape_cast %32 : vector<8x8x64xf32> to vector<64x64xf32>
    %34 = vector.extract_strided_slice %20 {offsets = [0, 2, 0, 0], sizes = [1, 1, 64, 96], strides = [1, 1, 1, 1]} : vector<3x3x64x96xf32> to vector<1x1x64x96xf32>
    %35 = vector.shape_cast %34 : vector<1x1x64x96xf32> to vector<64x96xf32>
    %cst_23 = arith.constant dense<0.000000e+00> : vector<64x96xf32>
    %36 = tpu.matmul %33, %35, %cst_23 {dimension_numbers = #tpu.dot_dimension_numbers<[1], [0], [0], [1], [0, 0, 1, 1], [], []>} : vector<64x64xf32>, vector<64x96xf32>, vector<64x96xf32> -> vector<64x96xf32>
    %37 = arith.addf %31, %36 : vector<64x96xf32>
    %38 = vector.extract_strided_slice %19 {offsets = [1, 0, 0], sizes = [8, 8, 64], strides = [1, 1, 1]} : vector<10x10x64xf32> to vector<8x8x64xf32>
    %39 = vector.shape_cast %38 : vector<8x8x64xf32> to vector<64x64xf32>
    %40 = vector.extract_strided_slice %20 {offsets = [1, 0, 0, 0], sizes = [1, 1, 64, 96], strides = [1, 1, 1, 1]} : vector<3x3x64x96xf32> to vector<1x1x64x96xf32>
    %41 = vector.shape_cast %40 : vector<1x1x64x96xf32> to vector<64x96xf32>
    %cst_24 = arith.constant dense<0.000000e+00> : vector<64x96xf32>
    %42 = tpu.matmul %39, %41, %cst_24 {dimension_numbers = #tpu.dot_dimension_numbers<[1], [0], [0], [1], [0, 0, 1, 1], [], []>} : vector<64x64xf32>, vector<64x96xf32>, vector<64x96xf32> -> vector<64x96xf32>
    %43 = arith.addf %37, %42 : vector<64x96xf32>
    %44 = vector.extract_strided_slice %19 {offsets = [1, 1, 0], sizes = [8, 8, 64], strides = [1, 1, 1]} : vector<10x10x64xf32> to vector<8x8x64xf32>
    %45 = vector.shape_cast %44 : vector<8x8x64xf32> to vector<64x64xf32>
    %46 = vector.extract_strided_slice %20 {offsets = [1, 1, 0, 0], sizes = [1, 1, 64, 96], strides = [1, 1, 1, 1]} : vector<3x3x64x96xf32> to vector<1x1x64x96xf32>
    %47 = vector.shape_cast %46 : vector<1x1x64x96xf32> to vector<64x96xf32>
    %cst_25 = arith.constant dense<0.000000e+00> : vector<64x96xf32>
    %48 = tpu.matmul %45, %47, %cst_25 {dimension_numbers = #tpu.dot_dimension_numbers<[1], [0], [0], [1], [0, 0, 1, 1], [], []>} : vector<64x64xf32>, vector<64x96xf32>, vector<64x96xf32> -> vector<64x96xf32>
    %49 = arith.addf %43, %48 : vector<64x96xf32>
    %50 = vector.extract_strided_slice %19 {offsets = [1, 2, 0], sizes = [8, 8, 64], strides = [1, 1, 1]} : vector<10x10x64xf32> to vector<8x8x64xf32>
    %51 = vector.shape_cast %50 : vector<8x8x64xf32> to vector<64x64xf32>
    %52 = vector.extract_strided_slice %20 {offsets = [1, 2, 0, 0], sizes = [1, 1, 64, 96], strides = [1, 1, 1, 1]} : vector<3x3x64x96xf32> to vector<1x1x64x96xf32>
    %53 = vector.shape_cast %52 : vector<1x1x64x96xf32> to vector<64x96xf32>
    %cst_26 = arith.constant dense<0.000000e+00> : vector<64x96xf32>
    %54 = tpu.matmul %51, %53, %cst_26 {dimension_numbers = #tpu.dot_dimension_numbers<[1], [0], [0], [1], [0, 0, 1, 1], [], []>} : vector<64x64xf32>, vector<64x96xf32>, vector<64x96xf32> -> vector<64x96xf32>
    %55 = arith.addf %49, %54 : vector<64x96xf32>
    %56 = vector.extract_strided_slice %19 {offsets = [2, 0, 0], sizes = [8, 8, 64], strides = [1, 1, 1]} : vector<10x10x64xf32> to vector<8x8x64xf32>
    %57 = vector.shape_cast %56 : vector<8x8x64xf32> to vector<64x64xf32>
    %58 = vector.extract_strided_slice %20 {offsets = [2, 0, 0, 0], sizes = [1, 1, 64, 96], strides = [1, 1, 1, 1]} : vector<3x3x64x96xf32> to vector<1x1x64x96xf32>
    %59 = vector.shape_cast %58 : vector<1x1x64x96xf32> to vector<64x96xf32>
    %cst_27 = arith.constant dense<0.000000e+00> : vector<64x96xf32>
    %60 = tpu.matmul %57, %59, %cst_27 {dimension_numbers = #tpu.dot_dimension_numbers<[1], [0], [0], [1], [0, 0, 1, 1], [], []>} : vector<64x64xf32>, vector<64x96xf32>, vector<64x96xf32> -> vector<64x96xf32>
    %61 = arith.addf %55, %60 : vector<64x96xf32>
    %62 = vector.extract_strided_slice %19 {offsets = [2, 1, 0], sizes = [8, 8, 64], strides = [1, 1, 1]} : vector<10x10x64xf32> to vector<8x8x64xf32>
    %63 = vector.shape_cast %62 : vector<8x8x64xf32> to vector<64x64xf32>
    %64 = vector.extract_strided_slice %20 {offsets = [2, 1, 0, 0], sizes = [1, 1, 64, 96], strides = [1, 1, 1, 1]} : vector<3x3x64x96xf32> to vector<1x1x64x96xf32>
    %65 = vector.shape_cast %64 : vector<1x1x64x96xf32> to vector<64x96xf32>
    %cst_28 = arith.constant dense<0.000000e+00> : vector<64x96xf32>
    %66 = tpu.matmul %63, %65, %cst_28 {dimension_numbers = #tpu.dot_dimension_numbers<[1], [0], [0], [1], [0, 0, 1, 1], [], []>} : vector<64x64xf32>, vector<64x96xf32>, vector<64x96xf32> -> vector<64x96xf32>
    %67 = arith.addf %61, %66 : vector<64x96xf32>
    %68 = vector.extract_strided_slice %19 {offsets = [2, 2, 0], sizes = [8, 8, 64], strides = [1, 1, 1]} : vector<10x10x64xf32> to vector<8x8x64xf32>
    %69 = vector.shape_cast %68 : vector<8x8x64xf32> to vector<64x64xf32>
    %70 = vector.extract_strided_slice %20 {offsets = [2, 2, 0, 0], sizes = [1, 1, 64, 96], strides = [1, 1, 1, 1]} : vector<3x3x64x96xf32> to vector<1x1x64x96xf32>
    %71 = vector.shape_cast %70 : vector<1x1x64x96xf32> to vector<64x96xf32>
    %cst_29 = arith.constant dense<0.000000e+00> : vector<64x96xf32>
    %72 = tpu.matmul %69, %71, %cst_29 {dimension_numbers = #tpu.dot_dimension_numbers<[1], [0], [0], [1], [0, 0, 1, 1], [], []>} : vector<64x64xf32>, vector<64x96xf32>, vector<64x96xf32> -> vector<64x96xf32>
    %73 = arith.addf %67, %72 : vector<64x96xf32>
    %c0_30 = arith.constant 0 : index
    %c0_31 = arith.constant 0 : index
    %74 = vector.load %arg5[%c0_30, %c0_31] : memref<1x96xf32, #tpu.memory_space<vmem>>, vector<1x96xf32>
    %75 = vector.broadcast %74 : vector<1x96xf32> to vector<64x96xf32>
    %76 = arith.addf %73, %75 : vector<64x96xf32>
    %cst_32 = arith.constant 0.000000e+00 : f32
    %77 = vector.broadcast %cst_32 : f32 to vector<64x96xf32>
    %78 = arith.maximumf %76, %77 : vector<64x96xf32>
    %79 = vector.shape_cast %78 : vector<64x96xf32> to vector<8x8x96xf32>
    %cst_33 = arith.constant 0.000000e+00 : f32
    %80 = vector.broadcast %cst_33 : f32 to vector<10x10x64xf32>
    %c0_34 = arith.constant 0 : index
    %c0_35 = arith.constant 0 : index
    %c0_36 = arith.constant 0 : index
    %81 = vector.load %arg13[%c0_34, %c0_35, %c0_36] : memref<10x10x64xf32, #tpu.memory_space<vmem>>, vector<10x10x64xf32>
    tpu.vector_store %arg13[%c0_34, %c0_35, %c0_36], %80 {strides = array<i32>} : memref<10x10x64xf32, #tpu.memory_space<vmem>>, vector<10x10x64xf32>,
    %c1_37 = arith.constant 1 : index
    %c1_38 = arith.constant 1 : index
    %c0_39 = arith.constant 0 : index
    %82 = vector.load %arg13[%c1_37, %c1_38, %c0_39] : memref<10x10x64xf32, #tpu.memory_space<vmem>>, vector<8x8x64xf32>
    tpu.vector_store %arg13[%c1_37, %c1_38, %c0_39], %15 {strides = array<i32>} : memref<10x10x64xf32, #tpu.memory_space<vmem>>, vector<8x8x64xf32>,
    %c0_40 = arith.constant 0 : index
    %c0_41 = arith.constant 0 : index
    %c0_42 = arith.constant 0 : index
    %83 = vector.load %arg13[%c0_40, %c0_41, %c0_42] : memref<10x10x64xf32, #tpu.memory_space<vmem>>, vector<10x10x64xf32>
    %c0_43 = arith.constant 0 : index
    %c0_44 = arith.constant 0 : index
    %c0_45 = arith.constant 0 : index
    %c0_46 = arith.constant 0 : index
    %84 = vector.load %arg6[%c0_43, %c0_44, %c0_45, %c0_46] : memref<3x3x64x96xf32, #tpu.memory_space<vmem>>, vector<3x3x64x96xf32>
    %85 = vector.extract_strided_slice %83 {offsets = [0, 0, 0], sizes = [8, 8, 64], strides = [1, 1, 1]} : vector<10x10x64xf32> to vector<8x8x64xf32>
    %86 = vector.shape_cast %85 : vector<8x8x64xf32> to vector<64x64xf32>
    %87 = vector.extract_strided_slice %84 {offsets = [0, 0, 0, 0], sizes = [1, 1, 64, 96], strides = [1, 1, 1, 1]} : vector<3x3x64x96xf32> to vector<1x1x64x96xf32>
    %88 = vector.shape_cast %87 : vector<1x1x64x96xf32> to vector<64x96xf32>
    %cst_47 = arith.constant dense<0.000000e+00> : vector<64x96xf32>
    %89 = tpu.matmul %86, %88, %cst_47 {dimension_numbers = #tpu.dot_dimension_numbers<[1], [0], [0], [1], [0, 0, 1, 1], [], []>} : vector<64x64xf32>, vector<64x96xf32>, vector<64x96xf32> -> vector<64x96xf32>
    %90 = vector.extract_strided_slice %83 {offsets = [0, 1, 0], sizes = [8, 8, 64], strides = [1, 1, 1]} : vector<10x10x64xf32> to vector<8x8x64xf32>
    %91 = vector.shape_cast %90 : vector<8x8x64xf32> to vector<64x64xf32>
    %92 = vector.extract_strided_slice %84 {offsets = [0, 1, 0, 0], sizes = [1, 1, 64, 96], strides = [1, 1, 1, 1]} : vector<3x3x64x96xf32> to vector<1x1x64x96xf32>
    %93 = vector.shape_cast %92 : vector<1x1x64x96xf32> to vector<64x96xf32>
    %cst_48 = arith.constant dense<0.000000e+00> : vector<64x96xf32>
    %94 = tpu.matmul %91, %93, %cst_48 {dimension_numbers = #tpu.dot_dimension_numbers<[1], [0], [0], [1], [0, 0, 1, 1], [], []>} : vector<64x64xf32>, vector<64x96xf32>, vector<64x96xf32> -> vector<64x96xf32>
    %95 = arith.addf %89, %94 : vector<64x96xf32>
    %96 = vector.extract_strided_slice %83 {offsets = [0, 2, 0], sizes = [8, 8, 64], strides = [1, 1, 1]} : vector<10x10x64xf32> to vector<8x8x64xf32>
    %97 = vector.shape_cast %96 : vector<8x8x64xf32> to vector<64x64xf32>
    %98 = vector.extract_strided_slice %84 {offsets = [0, 2, 0, 0], sizes = [1, 1, 64, 96], strides = [1, 1, 1, 1]} : vector<3x3x64x96xf32> to vector<1x1x64x96xf32>
    %99 = vector.shape_cast %98 : vector<1x1x64x96xf32> to vector<64x96xf32>
    %cst_49 = arith.constant dense<0.000000e+00> : vector<64x96xf32>
    %100 = tpu.matmul %97, %99, %cst_49 {dimension_numbers = #tpu.dot_dimension_numbers<[1], [0], [0], [1], [0, 0, 1, 1], [], []>} : vector<64x64xf32>, vector<64x96xf32>, vector<64x96xf32> -> vector<64x96xf32>
    %101 = arith.addf %95, %100 : vector<64x96xf32>
    %102 = vector.extract_strided_slice %83 {offsets = [1, 0, 0], sizes = [8, 8, 64], strides = [1, 1, 1]} : vector<10x10x64xf32> to vector<8x8x64xf32>
    %103 = vector.shape_cast %102 : vector<8x8x64xf32> to vector<64x64xf32>
    %104 = vector.extract_strided_slice %84 {offsets = [1, 0, 0, 0], sizes = [1, 1, 64, 96], strides = [1, 1, 1, 1]} : vector<3x3x64x96xf32> to vector<1x1x64x96xf32>
    %105 = vector.shape_cast %104 : vector<1x1x64x96xf32> to vector<64x96xf32>
    %cst_50 = arith.constant dense<0.000000e+00> : vector<64x96xf32>
    %106 = tpu.matmul %103, %105, %cst_50 {dimension_numbers = #tpu.dot_dimension_numbers<[1], [0], [0], [1], [0, 0, 1, 1], [], []>} : vector<64x64xf32>, vector<64x96xf32>, vector<64x96xf32> -> vector<64x96xf32>
    %107 = arith.addf %101, %106 : vector<64x96xf32>
    %108 = vector.extract_strided_slice %83 {offsets = [1, 1, 0], sizes = [8, 8, 64], strides = [1, 1, 1]} : vector<10x10x64xf32> to vector<8x8x64xf32>
    %109 = vector.shape_cast %108 : vector<8x8x64xf32> to vector<64x64xf32>
    %110 = vector.extract_strided_slice %84 {offsets = [1, 1, 0, 0], sizes = [1, 1, 64, 96], strides = [1, 1, 1, 1]} : vector<3x3x64x96xf32> to vector<1x1x64x96xf32>
    %111 = vector.shape_cast %110 : vector<1x1x64x96xf32> to vector<64x96xf32>
    %cst_51 = arith.constant dense<0.000000e+00> : vector<64x96xf32>
    %112 = tpu.matmul %109, %111, %cst_51 {dimension_numbers = #tpu.dot_dimension_numbers<[1], [0], [0], [1], [0, 0, 1, 1], [], []>} : vector<64x64xf32>, vector<64x96xf32>, vector<64x96xf32> -> vector<64x96xf32>
    %113 = arith.addf %107, %112 : vector<64x96xf32>
    %114 = vector.extract_strided_slice %83 {offsets = [1, 2, 0], sizes = [8, 8, 64], strides = [1, 1, 1]} : vector<10x10x64xf32> to vector<8x8x64xf32>
    %115 = vector.shape_cast %114 : vector<8x8x64xf32> to vector<64x64xf32>
    %116 = vector.extract_strided_slice %84 {offsets = [1, 2, 0, 0], sizes = [1, 1, 64, 96], strides = [1, 1, 1, 1]} : vector<3x3x64x96xf32> to vector<1x1x64x96xf32>
    %117 = vector.shape_cast %116 : vector<1x1x64x96xf32> to vector<64x96xf32>
    %cst_52 = arith.constant dense<0.000000e+00> : vector<64x96xf32>
    %118 = tpu.matmul %115, %117, %cst_52 {dimension_numbers = #tpu.dot_dimension_numbers<[1], [0], [0], [1], [0, 0, 1, 1], [], []>} : vector<64x64xf32>, vector<64x96xf32>, vector<64x96xf32> -> vector<64x96xf32>
    %119 = arith.addf %113, %118 : vector<64x96xf32>
    %120 = vector.extract_strided_slice %83 {offsets = [2, 0, 0], sizes = [8, 8, 64], strides = [1, 1, 1]} : vector<10x10x64xf32> to vector<8x8x64xf32>
    %121 = vector.shape_cast %120 : vector<8x8x64xf32> to vector<64x64xf32>
    %122 = vector.extract_strided_slice %84 {offsets = [2, 0, 0, 0], sizes = [1, 1, 64, 96], strides = [1, 1, 1, 1]} : vector<3x3x64x96xf32> to vector<1x1x64x96xf32>
    %123 = vector.shape_cast %122 : vector<1x1x64x96xf32> to vector<64x96xf32>
    %cst_53 = arith.constant dense<0.000000e+00> : vector<64x96xf32>
    %124 = tpu.matmul %121, %123, %cst_53 {dimension_numbers = #tpu.dot_dimension_numbers<[1], [0], [0], [1], [0, 0, 1, 1], [], []>} : vector<64x64xf32>, vector<64x96xf32>, vector<64x96xf32> -> vector<64x96xf32>
    %125 = arith.addf %119, %124 : vector<64x96xf32>
    %126 = vector.extract_strided_slice %83 {offsets = [2, 1, 0], sizes = [8, 8, 64], strides = [1, 1, 1]} : vector<10x10x64xf32> to vector<8x8x64xf32>
    %127 = vector.shape_cast %126 : vector<8x8x64xf32> to vector<64x64xf32>
    %128 = vector.extract_strided_slice %84 {offsets = [2, 1, 0, 0], sizes = [1, 1, 64, 96], strides = [1, 1, 1, 1]} : vector<3x3x64x96xf32> to vector<1x1x64x96xf32>
    %129 = vector.shape_cast %128 : vector<1x1x64x96xf32> to vector<64x96xf32>
    %cst_54 = arith.constant dense<0.000000e+00> : vector<64x96xf32>
    %130 = tpu.matmul %127, %129, %cst_54 {dimension_numbers = #tpu.dot_dimension_numbers<[1], [0], [0], [1], [0, 0, 1, 1], [], []>} : vector<64x64xf32>, vector<64x96xf32>, vector<64x96xf32> -> vector<64x96xf32>
    %131 = arith.addf %125, %130 : vector<64x96xf32>
    %132 = vector.extract_strided_slice %83 {offsets = [2, 2, 0], sizes = [8, 8, 64], strides = [1, 1, 1]} : vector<10x10x64xf32> to vector<8x8x64xf32>
    %133 = vector.shape_cast %132 : vector<8x8x64xf32> to vector<64x64xf32>
    %134 = vector.extract_strided_slice %84 {offsets = [2, 2, 0, 0], sizes = [1, 1, 64, 96], strides = [1, 1, 1, 1]} : vector<3x3x64x96xf32> to vector<1x1x64x96xf32>
    %135 = vector.shape_cast %134 : vector<1x1x64x96xf32> to vector<64x96xf32>
    %cst_55 = arith.constant dense<0.000000e+00> : vector<64x96xf32>
    %136 = tpu.matmul %133, %135, %cst_55 {dimension_numbers = #tpu.dot_dimension_numbers<[1], [0], [0], [1], [0, 0, 1, 1], [], []>} : vector<64x64xf32>, vector<64x96xf32>, vector<64x96xf32> -> vector<64x96xf32>
    %137 = arith.addf %131, %136 : vector<64x96xf32>
    %c0_56 = arith.constant 0 : index
    %c0_57 = arith.constant 0 : index
    %138 = vector.load %arg7[%c0_56, %c0_57] : memref<1x96xf32, #tpu.memory_space<vmem>>, vector<1x96xf32>
    %139 = vector.broadcast %138 : vector<1x96xf32> to vector<64x96xf32>
    %140 = arith.addf %137, %139 : vector<64x96xf32>
    %cst_58 = arith.constant 0.000000e+00 : f32
    %141 = vector.broadcast %cst_58 : f32 to vector<64x96xf32>
    %142 = arith.maximumf %140, %141 : vector<64x96xf32>
    %143 = vector.shape_cast %142 : vector<64x96xf32> to vector<8x8x96xf32>
    %cst_59 = arith.constant 0.000000e+00 : f32
    %144 = vector.broadcast %cst_59 : f32 to vector<10x10x96xf32>
    %c0_60 = arith.constant 0 : index
    %c0_61 = arith.constant 0 : index
    %c0_62 = arith.constant 0 : index
    %145 = vector.load %arg14[%c0_60, %c0_61, %c0_62] : memref<10x10x96xf32, #tpu.memory_space<vmem>>, vector<10x10x96xf32>
    tpu.vector_store %arg14[%c0_60, %c0_61, %c0_62], %144 {strides = array<i32>} : memref<10x10x96xf32, #tpu.memory_space<vmem>>, vector<10x10x96xf32>,
    %c1_63 = arith.constant 1 : index
    %c1_64 = arith.constant 1 : index
    %c0_65 = arith.constant 0 : index
    %146 = vector.load %arg14[%c1_63, %c1_64, %c0_65] : memref<10x10x96xf32, #tpu.memory_space<vmem>>, vector<8x8x96xf32>
    tpu.vector_store %arg14[%c1_63, %c1_64, %c0_65], %143 {strides = array<i32>} : memref<10x10x96xf32, #tpu.memory_space<vmem>>, vector<8x8x96xf32>,
    %c0_66 = arith.constant 0 : index
    %c0_67 = arith.constant 0 : index
    %c0_68 = arith.constant 0 : index
    %147 = vector.load %arg14[%c0_66, %c0_67, %c0_68] : memref<10x10x96xf32, #tpu.memory_space<vmem>>, vector<10x10x96xf32>
    %c0_69 = arith.constant 0 : index
    %c0_70 = arith.constant 0 : index
    %c0_71 = arith.constant 0 : index
    %c0_72 = arith.constant 0 : index
    %148 = vector.load %arg8[%c0_69, %c0_70, %c0_71, %c0_72] : memref<3x3x96x96xf32, #tpu.memory_space<vmem>>, vector<3x3x96x96xf32>
    %149 = vector.extract_strided_slice %147 {offsets = [0, 0, 0], sizes = [8, 8, 96], strides = [1, 1, 1]} : vector<10x10x96xf32> to vector<8x8x96xf32>
    %150 = vector.shape_cast %149 : vector<8x8x96xf32> to vector<64x96xf32>
    %151 = vector.extract_strided_slice %148 {offsets = [0, 0, 0, 0], sizes = [1, 1, 96, 96], strides = [1, 1, 1, 1]} : vector<3x3x96x96xf32> to vector<1x1x96x96xf32>
    %152 = vector.shape_cast %151 : vector<1x1x96x96xf32> to vector<96x96xf32>
    %cst_73 = arith.constant dense<0.000000e+00> : vector<64x96xf32>
    %153 = tpu.matmul %150, %152, %cst_73 {dimension_numbers = #tpu.dot_dimension_numbers<[1], [0], [0], [1], [0, 0, 1, 1], [], []>} : vector<64x96xf32>, vector<96x96xf32>, vector<64x96xf32> -> vector<64x96xf32>
    %154 = vector.extract_strided_slice %147 {offsets = [0, 1, 0], sizes = [8, 8, 96], strides = [1, 1, 1]} : vector<10x10x96xf32> to vector<8x8x96xf32>
    %155 = vector.shape_cast %154 : vector<8x8x96xf32> to vector<64x96xf32>
    %156 = vector.extract_strided_slice %148 {offsets = [0, 1, 0, 0], sizes = [1, 1, 96, 96], strides = [1, 1, 1, 1]} : vector<3x3x96x96xf32> to vector<1x1x96x96xf32>
    %157 = vector.shape_cast %156 : vector<1x1x96x96xf32> to vector<96x96xf32>
    %cst_74 = arith.constant dense<0.000000e+00> : vector<64x96xf32>
    %158 = tpu.matmul %155, %157, %cst_74 {dimension_numbers = #tpu.dot_dimension_numbers<[1], [0], [0], [1], [0, 0, 1, 1], [], []>} : vector<64x96xf32>, vector<96x96xf32>, vector<64x96xf32> -> vector<64x96xf32>
    %159 = arith.addf %153, %158 : vector<64x96xf32>
    %160 = vector.extract_strided_slice %147 {offsets = [0, 2, 0], sizes = [8, 8, 96], strides = [1, 1, 1]} : vector<10x10x96xf32> to vector<8x8x96xf32>
    %161 = vector.shape_cast %160 : vector<8x8x96xf32> to vector<64x96xf32>
    %162 = vector.extract_strided_slice %148 {offsets = [0, 2, 0, 0], sizes = [1, 1, 96, 96], strides = [1, 1, 1, 1]} : vector<3x3x96x96xf32> to vector<1x1x96x96xf32>
    %163 = vector.shape_cast %162 : vector<1x1x96x96xf32> to vector<96x96xf32>
    %cst_75 = arith.constant dense<0.000000e+00> : vector<64x96xf32>
    %164 = tpu.matmul %161, %163, %cst_75 {dimension_numbers = #tpu.dot_dimension_numbers<[1], [0], [0], [1], [0, 0, 1, 1], [], []>} : vector<64x96xf32>, vector<96x96xf32>, vector<64x96xf32> -> vector<64x96xf32>
    %165 = arith.addf %159, %164 : vector<64x96xf32>
    %166 = vector.extract_strided_slice %147 {offsets = [1, 0, 0], sizes = [8, 8, 96], strides = [1, 1, 1]} : vector<10x10x96xf32> to vector<8x8x96xf32>
    %167 = vector.shape_cast %166 : vector<8x8x96xf32> to vector<64x96xf32>
    %168 = vector.extract_strided_slice %148 {offsets = [1, 0, 0, 0], sizes = [1, 1, 96, 96], strides = [1, 1, 1, 1]} : vector<3x3x96x96xf32> to vector<1x1x96x96xf32>
    %169 = vector.shape_cast %168 : vector<1x1x96x96xf32> to vector<96x96xf32>
    %cst_76 = arith.constant dense<0.000000e+00> : vector<64x96xf32>
    %170 = tpu.matmul %167, %169, %cst_76 {dimension_numbers = #tpu.dot_dimension_numbers<[1], [0], [0], [1], [0, 0, 1, 1], [], []>} : vector<64x96xf32>, vector<96x96xf32>, vector<64x96xf32> -> vector<64x96xf32>
    %171 = arith.addf %165, %170 : vector<64x96xf32>
    %172 = vector.extract_strided_slice %147 {offsets = [1, 1, 0], sizes = [8, 8, 96], strides = [1, 1, 1]} : vector<10x10x96xf32> to vector<8x8x96xf32>
    %173 = vector.shape_cast %172 : vector<8x8x96xf32> to vector<64x96xf32>
    %174 = vector.extract_strided_slice %148 {offsets = [1, 1, 0, 0], sizes = [1, 1, 96, 96], strides = [1, 1, 1, 1]} : vector<3x3x96x96xf32> to vector<1x1x96x96xf32>
    %175 = vector.shape_cast %174 : vector<1x1x96x96xf32> to vector<96x96xf32>
    %cst_77 = arith.constant dense<0.000000e+00> : vector<64x96xf32>
    %176 = tpu.matmul %173, %175, %cst_77 {dimension_numbers = #tpu.dot_dimension_numbers<[1], [0], [0], [1], [0, 0, 1, 1], [], []>} : vector<64x96xf32>, vector<96x96xf32>, vector<64x96xf32> -> vector<64x96xf32>
    %177 = arith.addf %171, %176 : vector<64x96xf32>
    %178 = vector.extract_strided_slice %147 {offsets = [1, 2, 0], sizes = [8, 8, 96], strides = [1, 1, 1]} : vector<10x10x96xf32> to vector<8x8x96xf32>
    %179 = vector.shape_cast %178 : vector<8x8x96xf32> to vector<64x96xf32>
    %180 = vector.extract_strided_slice %148 {offsets = [1, 2, 0, 0], sizes = [1, 1, 96, 96], strides = [1, 1, 1, 1]} : vector<3x3x96x96xf32> to vector<1x1x96x96xf32>
    %181 = vector.shape_cast %180 : vector<1x1x96x96xf32> to vector<96x96xf32>
    %cst_78 = arith.constant dense<0.000000e+00> : vector<64x96xf32>
    %182 = tpu.matmul %179, %181, %cst_78 {dimension_numbers = #tpu.dot_dimension_numbers<[1], [0], [0], [1], [0, 0, 1, 1], [], []>} : vector<64x96xf32>, vector<96x96xf32>, vector<64x96xf32> -> vector<64x96xf32>
    %183 = arith.addf %177, %182 : vector<64x96xf32>
    %184 = vector.extract_strided_slice %147 {offsets = [2, 0, 0], sizes = [8, 8, 96], strides = [1, 1, 1]} : vector<10x10x96xf32> to vector<8x8x96xf32>
    %185 = vector.shape_cast %184 : vector<8x8x96xf32> to vector<64x96xf32>
    %186 = vector.extract_strided_slice %148 {offsets = [2, 0, 0, 0], sizes = [1, 1, 96, 96], strides = [1, 1, 1, 1]} : vector<3x3x96x96xf32> to vector<1x1x96x96xf32>
    %187 = vector.shape_cast %186 : vector<1x1x96x96xf32> to vector<96x96xf32>
    %cst_79 = arith.constant dense<0.000000e+00> : vector<64x96xf32>
    %188 = tpu.matmul %185, %187, %cst_79 {dimension_numbers = #tpu.dot_dimension_numbers<[1], [0], [0], [1], [0, 0, 1, 1], [], []>} : vector<64x96xf32>, vector<96x96xf32>, vector<64x96xf32> -> vector<64x96xf32>
    %189 = arith.addf %183, %188 : vector<64x96xf32>
    %190 = vector.extract_strided_slice %147 {offsets = [2, 1, 0], sizes = [8, 8, 96], strides = [1, 1, 1]} : vector<10x10x96xf32> to vector<8x8x96xf32>
    %191 = vector.shape_cast %190 : vector<8x8x96xf32> to vector<64x96xf32>
    %192 = vector.extract_strided_slice %148 {offsets = [2, 1, 0, 0], sizes = [1, 1, 96, 96], strides = [1, 1, 1, 1]} : vector<3x3x96x96xf32> to vector<1x1x96x96xf32>
    %193 = vector.shape_cast %192 : vector<1x1x96x96xf32> to vector<96x96xf32>
    %cst_80 = arith.constant dense<0.000000e+00> : vector<64x96xf32>
    %194 = tpu.matmul %191, %193, %cst_80 {dimension_numbers = #tpu.dot_dimension_numbers<[1], [0], [0], [1], [0, 0, 1, 1], [], []>} : vector<64x96xf32>, vector<96x96xf32>, vector<64x96xf32> -> vector<64x96xf32>
    %195 = arith.addf %189, %194 : vector<64x96xf32>
    %196 = vector.extract_strided_slice %147 {offsets = [2, 2, 0], sizes = [8, 8, 96], strides = [1, 1, 1]} : vector<10x10x96xf32> to vector<8x8x96xf32>
    %197 = vector.shape_cast %196 : vector<8x8x96xf32> to vector<64x96xf32>
    %198 = vector.extract_strided_slice %148 {offsets = [2, 2, 0, 0], sizes = [1, 1, 96, 96], strides = [1, 1, 1, 1]} : vector<3x3x96x96xf32> to vector<1x1x96x96xf32>
    %199 = vector.shape_cast %198 : vector<1x1x96x96xf32> to vector<96x96xf32>
    %cst_81 = arith.constant dense<0.000000e+00> : vector<64x96xf32>
    %200 = tpu.matmul %197, %199, %cst_81 {dimension_numbers = #tpu.dot_dimension_numbers<[1], [0], [0], [1], [0, 0, 1, 1], [], []>} : vector<64x96xf32>, vector<96x96xf32>, vector<64x96xf32> -> vector<64x96xf32>
    %201 = arith.addf %195, %200 : vector<64x96xf32>
    %c0_82 = arith.constant 0 : index
    %c0_83 = arith.constant 0 : index
    %202 = vector.load %arg9[%c0_82, %c0_83] : memref<1x96xf32, #tpu.memory_space<vmem>>, vector<1x96xf32>
    %203 = vector.broadcast %202 : vector<1x96xf32> to vector<64x96xf32>
    %204 = arith.addf %201, %203 : vector<64x96xf32>
    %cst_84 = arith.constant 0.000000e+00 : f32
    %205 = vector.broadcast %cst_84 : f32 to vector<64x96xf32>
    %206 = arith.maximumf %204, %205 : vector<64x96xf32>
    %207 = vector.shape_cast %206 : vector<64x96xf32> to vector<8x8x96xf32>
    %cst_85 = arith.constant 0.000000e+00 : f32
    %208 = vector.broadcast %cst_85 : f32 to vector<10x10x384xf32>
    %c0_86 = arith.constant 0 : index
    %c0_87 = arith.constant 0 : index
    %c0_88 = arith.constant 0 : index
    %209 = vector.load %arg15[%c0_86, %c0_87, %c0_88] : memref<10x10x384xf32, #tpu.memory_space<vmem>>, vector<10x10x384xf32>
    tpu.vector_store %arg15[%c0_86, %c0_87, %c0_88], %208 {strides = array<i32>} : memref<10x10x384xf32, #tpu.memory_space<vmem>>, vector<10x10x384xf32>,
    %c1_89 = arith.constant 1 : index
    %c1_90 = arith.constant 1 : index
    %c0_91 = arith.constant 0 : index
    %210 = vector.load %arg15[%c1_89, %c1_90, %c0_91] : memref<10x10x384xf32, #tpu.memory_space<vmem>>, vector<8x8x384xf32>
    tpu.vector_store %arg15[%c1_89, %c1_90, %c0_91], %1 {strides = array<i32>} : memref<10x10x384xf32, #tpu.memory_space<vmem>>, vector<8x8x384xf32>,
    %c0_92 = arith.constant 0 : index
    %c0_93 = arith.constant 0 : index
    %c0_94 = arith.constant 0 : index
    %211 = vector.load %arg15[%c0_92, %c0_93, %c0_94] : memref<10x10x384xf32, #tpu.memory_space<vmem>>, vector<10x10x384xf32>
    %212 = vector.extract_strided_slice %211 {offsets = [0, 0, 0], sizes = [8, 8, 384], strides = [1, 1, 1]} : vector<10x10x384xf32> to vector<8x8x384xf32>
    %213 = vector.extract_strided_slice %211 {offsets = [0, 1, 0], sizes = [8, 8, 384], strides = [1, 1, 1]} : vector<10x10x384xf32> to vector<8x8x384xf32>
    %214 = arith.addf %212, %213 : vector<8x8x384xf32>
    %215 = vector.extract_strided_slice %211 {offsets = [0, 2, 0], sizes = [8, 8, 384], strides = [1, 1, 1]} : vector<10x10x384xf32> to vector<8x8x384xf32>
    %216 = arith.addf %214, %215 : vector<8x8x384xf32>
    %217 = vector.extract_strided_slice %211 {offsets = [1, 0, 0], sizes = [8, 8, 384], strides = [1, 1, 1]} : vector<10x10x384xf32> to vector<8x8x384xf32>
    %218 = arith.addf %216, %217 : vector<8x8x384xf32>
    %219 = vector.extract_strided_slice %211 {offsets = [1, 1, 0], sizes = [8, 8, 384], strides = [1, 1, 1]} : vector<10x10x384xf32> to vector<8x8x384xf32>
    %220 = arith.addf %218, %219 : vector<8x8x384xf32>
    %221 = vector.extract_strided_slice %211 {offsets = [1, 2, 0], sizes = [8, 8, 384], strides = [1, 1, 1]} : vector<10x10x384xf32> to vector<8x8x384xf32>
    %222 = arith.addf %220, %221 : vector<8x8x384xf32>
    %223 = vector.extract_strided_slice %211 {offsets = [2, 0, 0], sizes = [8, 8, 384], strides = [1, 1, 1]} : vector<10x10x384xf32> to vector<8x8x384xf32>
    %224 = arith.addf %222, %223 : vector<8x8x384xf32>
    %225 = vector.extract_strided_slice %211 {offsets = [2, 1, 0], sizes = [8, 8, 384], strides = [1, 1, 1]} : vector<10x10x384xf32> to vector<8x8x384xf32>
    %226 = arith.addf %224, %225 : vector<8x8x384xf32>
    %227 = vector.extract_strided_slice %211 {offsets = [2, 2, 0], sizes = [8, 8, 384], strides = [1, 1, 1]} : vector<10x10x384xf32> to vector<8x8x384xf32>
    %228 = arith.addf %226, %227 : vector<8x8x384xf32>
    %229 = tpu.iota {dimensions = array<i32: 0>} : vector<8x8x384xi32>
    %230 = tpu.iota {dimensions = array<i32: 1>} : vector<8x8x384xi32>
    %c1_i32 = arith.constant 1 : i32
    %231 = vector.broadcast %c1_i32 : i32 to vector<8x8x384xi32>
    %232 = arith.minsi %229, %231 : vector<8x8x384xi32>
    %c1_i32_95 = arith.constant 1 : i32
    %233 = vector.broadcast %c1_i32_95 : i32 to vector<8x8x384xi32>
    %234 = arith.addi %232, %233 : vector<8x8x384xi32>
    %c7_i32 = arith.constant 7 : i32
    %235 = vector.broadcast %c7_i32 : i32 to vector<8x8x384xi32>
    %236 = arith.subi %235, %229 : vector<8x8x384xi32>
    %c1_i32_96 = arith.constant 1 : i32
    %237 = vector.broadcast %c1_i32_96 : i32 to vector<8x8x384xi32>
    %238 = arith.minsi %236, %237 : vector<8x8x384xi32>
    %239 = arith.addi %234, %238 : vector<8x8x384xi32>
    %c1_i32_97 = arith.constant 1 : i32
    %240 = vector.broadcast %c1_i32_97 : i32 to vector<8x8x384xi32>
    %241 = arith.minsi %230, %240 : vector<8x8x384xi32>
    %c1_i32_98 = arith.constant 1 : i32
    %242 = vector.broadcast %c1_i32_98 : i32 to vector<8x8x384xi32>
    %243 = arith.addi %241, %242 : vector<8x8x384xi32>
    %c7_i32_99 = arith.constant 7 : i32
    %244 = vector.broadcast %c7_i32_99 : i32 to vector<8x8x384xi32>
    %245 = arith.subi %244, %230 : vector<8x8x384xi32>
    %c1_i32_100 = arith.constant 1 : i32
    %246 = vector.broadcast %c1_i32_100 : i32 to vector<8x8x384xi32>
    %247 = arith.minsi %245, %246 : vector<8x8x384xi32>
    %248 = arith.addi %243, %247 : vector<8x8x384xi32>
    %249 = arith.muli %239, %248 : vector<8x8x384xi32>
    %250 = arith.sitofp %249 : vector<8x8x384xi32> to vector<8x8x384xf32>
    %251 = arith.divf %228, %250 : vector<8x8x384xf32>
    %252 = vector.shape_cast %251 : vector<8x8x384xf32> to vector<64x384xf32>
    %c0_101 = arith.constant 0 : index
    %c0_102 = arith.constant 0 : index
    %253 = vector.load %arg10[%c0_101, %c0_102] : memref<384x96xf32, #tpu.memory_space<vmem>>, vector<384x96xf32>
    %cst_103 = arith.constant dense<0.000000e+00> : vector<64x96xf32>
    %254 = tpu.matmul %252, %253, %cst_103 {dimension_numbers = #tpu.dot_dimension_numbers<[1], [0], [0], [1], [0, 0, 1, 1], [], []>} : vector<64x384xf32>, vector<384x96xf32>, vector<64x96xf32> -> vector<64x96xf32>
    %c0_104 = arith.constant 0 : index
    %c0_105 = arith.constant 0 : index
    %255 = vector.load %arg11[%c0_104, %c0_105] : memref<1x96xf32, #tpu.memory_space<vmem>>, vector<1x96xf32>
    %256 = vector.broadcast %255 : vector<1x96xf32> to vector<64x96xf32>
    %257 = arith.addf %254, %256 : vector<64x96xf32>
    %cst_106 = arith.constant 0.000000e+00 : f32
    %258 = vector.broadcast %cst_106 : f32 to vector<64x96xf32>
    %259 = arith.maximumf %257, %258 : vector<64x96xf32>
    %260 = vector.shape_cast %259 : vector<64x96xf32> to vector<8x8x96xf32>
    %261 = tpu.concatenate %11, %79, %207, %260 in 2 : vector<8x8x96xf32>, vector<8x8x96xf32>, vector<8x8x96xf32>, vector<8x8x96xf32> -> vector<8x8x384xf32>
    %c0_107 = arith.constant 0 : index
    %c0_108 = arith.constant 0 : index
    %c0_109 = arith.constant 0 : index
    %c0_110 = arith.constant 0 : index
    %262 = vector.load %arg12[%c0_107, %c0_108, %c0_109, %c0_110] : memref<1x8x8x384xf32, #tpu.memory_space<vmem>>, vector<1x8x8x384xf32>
    %263 = vector.shape_cast %262 : vector<1x8x8x384xf32> to vector<8x8x384xf32>
    %264 = vector.shape_cast %261 : vector<8x8x384xf32> to vector<1x8x8x384xf32>
    tpu.vector_store %arg12[%c0_107, %c0_108, %c0_109, %c0_110], %264 {strides = array<i32>} : memref<1x8x8x384xf32, #tpu.memory_space<vmem>>, vector<1x8x8x384xf32>,
    return
  }
  func.func @transform_0(%arg0: i32) -> (i32, i32, i32, i32) {
    %c0_i32 = arith.constant 0 : i32
    %c0_i32_0 = arith.constant 0 : i32
    %c0_i32_1 = arith.constant 0 : i32
    %c0_i32_2 = arith.constant 0 : i32
    return %arg0, %c0_i32, %c0_i32_0, %c0_i32_1 : i32, i32, i32, i32
  }
  func.func @transform_1(%arg0: i32) -> (i32, i32) {
    %c0_i32 = arith.constant 0 : i32
    %c0_i32_0 = arith.constant 0 : i32
    %c0_i32_1 = arith.constant 0 : i32
    return %c0_i32, %c0_i32_0 : i32, i32
  }
  func.func @transform_2(%arg0: i32) -> (i32, i32) {
    %c0_i32 = arith.constant 0 : i32
    %c0_i32_0 = arith.constant 0 : i32
    %c0_i32_1 = arith.constant 0 : i32
    return %c0_i32, %c0_i32_0 : i32, i32
  }
  func.func @transform_3(%arg0: i32) -> (i32, i32, i32, i32) {
    %c0_i32 = arith.constant 0 : i32
    %c0_i32_0 = arith.constant 0 : i32
    %c0_i32_1 = arith.constant 0 : i32
    %c0_i32_2 = arith.constant 0 : i32
    %c0_i32_3 = arith.constant 0 : i32
    return %c0_i32, %c0_i32_0, %c0_i32_1, %c0_i32_2 : i32, i32, i32, i32
  }
  func.func @transform_4(%arg0: i32) -> (i32, i32) {
    %c0_i32 = arith.constant 0 : i32
    %c0_i32_0 = arith.constant 0 : i32
    %c0_i32_1 = arith.constant 0 : i32
    return %c0_i32, %c0_i32_0 : i32, i32
  }
  func.func @transform_5(%arg0: i32) -> (i32, i32, i32, i32) {
    %c0_i32 = arith.constant 0 : i32
    %c0_i32_0 = arith.constant 0 : i32
    %c0_i32_1 = arith.constant 0 : i32
    %c0_i32_2 = arith.constant 0 : i32
    %c0_i32_3 = arith.constant 0 : i32
    return %c0_i32, %c0_i32_0, %c0_i32_1, %c0_i32_2 : i32, i32, i32, i32
  }
  func.func @transform_6(%arg0: i32) -> (i32, i32) {
    %c0_i32 = arith.constant 0 : i32
    %c0_i32_0 = arith.constant 0 : i32
    %c0_i32_1 = arith.constant 0 : i32
    return %c0_i32, %c0_i32_0 : i32, i32
  }
  func.func @transform_7(%arg0: i32) -> (i32, i32, i32, i32) {
    %c0_i32 = arith.constant 0 : i32
    %c0_i32_0 = arith.constant 0 : i32
    %c0_i32_1 = arith.constant 0 : i32
    %c0_i32_2 = arith.constant 0 : i32
    %c0_i32_3 = arith.constant 0 : i32
    return %c0_i32, %c0_i32_0, %c0_i32_1, %c0_i32_2 : i32, i32, i32, i32
  }
  func.func @transform_8(%arg0: i32) -> (i32, i32) {
    %c0_i32 = arith.constant 0 : i32
    %c0_i32_0 = arith.constant 0 : i32
    %c0_i32_1 = arith.constant 0 : i32
    return %c0_i32, %c0_i32_0 : i32, i32
  }
  func.func @transform_9(%arg0: i32) -> (i32, i32) {
    %c0_i32 = arith.constant 0 : i32
    %c0_i32_0 = arith.constant 0 : i32
    %c0_i32_1 = arith.constant 0 : i32
    return %c0_i32, %c0_i32_0 : i32, i32
  }
  func.func @transform_10(%arg0: i32) -> (i32, i32) {
    %c0_i32 = arith.constant 0 : i32
    %c0_i32_0 = arith.constant 0 : i32
    %c0_i32_1 = arith.constant 0 : i32
    return %c0_i32, %c0_i32_0 : i32, i32
  }
  func.func @transform_11(%arg0: i32) -> (i32, i32, i32, i32) {
    %c0_i32 = arith.constant 0 : i32
    %c0_i32_0 = arith.constant 0 : i32
    %c0_i32_1 = arith.constant 0 : i32
    %c0_i32_2 = arith.constant 0 : i32
    return %arg0, %c0_i32, %c0_i32_0, %c0_i32_1 : i32, i32, i32, i32
  }
}

</mosaic_0001>

<bundles_post_ra>
// kernel: inception_a.1
= control target key start
LH: loop header
LB: loop body
LE: loop exit
PB: predicated region body
PF: predicated region fallthrough
CT: control target
= control target key end

     0   :  { %16 = vsyncpa [#allocation6], 0  ;;  %s11579_s0 = inlined_call_operand.vmem [shape: f32[2,8,8,384], index: 0, kind: input, shape index: {}]   ;;  %s11580_s1 = inlined_call_operand.vmem [shape: f32[384,224], index: 1, kind: input, shape index: {}]   ;;  %s11581_s2 = inlined_call_operand.vmem [shape: f32[1,224], index: 2, kind: input, shape index: {}]   ;;  %s11582_s3 = inlined_call_operand.vmem [shape: f32[3,3,64,96], index: 3, kind: input, shape index: {}]   ;;  %s11583_s4 = inlined_call_operand.vmem [shape: f32[1,96], index: 4, kind: input, shape index: {}]   ;;  %s11584_s5 = inlined_call_operand.vmem [shape: f32[3,3,64,96], index: 5, kind: input, shape index: {}]   ;;  %s11585_s6 = inlined_call_operand.vmem [shape: f32[1,96], index: 6, kind: input, shape index: {}]   ;;  %s11586_s7 = inlined_call_operand.vmem [shape: f32[3,3,96,96], index: 7, kind: input, shape index: {}]   ;;  %s11587_s8 = inlined_call_operand.vmem [shape: f32[1,96], index: 8, kind: input, shape index: {}]   ;;  %s11588_s9 = inlined_call_operand.vmem [shape: f32[384,96], index: 9, kind: input, shape index: {}]   ;;  %s11589_s10 = inlined_call_operand.vmem [shape: f32[1,96], index: 10, kind: input, shape index: {}]   ;;  %s11590_s11 = inlined_call_operand.hbm [shape: f32[2,8,8,384], index: 11, kind: output, shape index: {}]  }
   0x1   :  { %18 = vsyncpa [#allocation6 + $0x1], 0  ;;  %s7879_s17 = smov 0   ;;  %s7881_s18 = smov 0  }
   0x2   :  { %s7883_s19 = smov 0   ;;  %s7885_s20 = smov 0  }
   0x3 LB: > { %11622 = sst [smem:[#allocation8_spill]] %s7806_s19  ;;  %s7900_s21 = sadd.s32 4294967295, %s7810_s20   ;;  %s7810_s20 = sphi %s7885_s20, %s11696_s20   ;;  %s7806_s19 = sphi %s7883_s19, %s11693_s19   ;;  %s7802_s18 = sphi %s7881_s18, %s11695_s18   ;;  %s7798_s17 = sphi %s7879_s17, %s11694_s17  }
   0x4   : > { %s6009_s22 = sadd.s32 4294967294, %s7810_s20   ;;  %s7904_s23 = sadd.s32 1, %s7810_s20  }
   0x5   : > { %s267_s24 = sadd.s32 1, %s7806_s19  ;;  %s264_s25 = ssub.s32 %s7810_s20, %s7904_s23 }
   0x6   : > { %p277_p0 = scmp.ne.s32.totalorder %s7806_s19, %s7802_s18  ;;  %p265_p1 = scmp.eq.s32.totalorder %s264_s25, 0 }
   0x7   : > { %p278_p2 = scmp.eq.s32.totalorder %s7900_s21, 1  ;;  %p283_p3 = scmp.ne.s32.totalorder %s7802_s18, %s7798_s17 }
   0x8   : > { %p284_p4 = scmp.eq.s32.totalorder %s6009_s22, 1  ;;  %p6012_p7 = scmp.ge.s32.totalorder %s7810_s20, 1 }
   0x9   : > { %s7915_s26 = scalar_select %p265_p1, %s7806_s19, %s267_s24  }
   0xa   : > { %p7917_p5 = por %p278_p2, %p277_p0  ;;  %p7921_p6 = por %p284_p4, %p283_p3 }
   0xb   : > { %11623 = sst [smem:[#allocation9_spill]] %s7915_s26  ;;  %p340_p8 = scmp.lt.s32.totalorder %s7810_s20, 3 }
   0xd   : > { %p341_p9 = pnand %p6012_p7, %p340_p8 }
   0xf   : > { %344 = sbr.rel (%p341_p9) target bundleno = 1349 (0x545), region = 64 }
  0x14   : > { %v440_v0 = vld [vmem:[%s11580_s1 + $0xf8] sm:$0xff]  ;;  %v439_v1 = vld [vmem:[%s11580_s1 + $0xf0] sm:$0xff]  ;;  %v438_v2 = vld [vmem:[%s11580_s1 + $0xe8] sm:$0xff]  ;;  %v7812_v4 = vmov 0.0   ;;  %p380_p10 = scmp.lt.s32.totalorder %s7900_s21, 1  ;;  %vm759_vm0 = vcmask 523264  }
  0x15   : > { %517 = vmatprep.subr.mxu0 %v440_v0  ;;  %v437_v3 = vld [vmem:[%s11580_s1 + $0xe0] sm:$0xff]  ;;  %4751 = vst [vmem:[#allocation4 + $0x48] sm:$0xff] %v7812_v4  ;;  %4754 = vst [vmem:[#allocation4 + $0x118] sm:$0x3] %v7812_v4  ;;  %694 = vmatprep.mubr.f32.mxu1 %v7812_v4  ;;  %v436_v5 = vld [vmem:[%s11580_s1 + $0xd8] sm:$0xff]  ;;  %vm761_vm1 = vcmask 517120  }
  0x16   : > { %4744 = vst [vmem:[#allocation4 + $0xb0] sm:$0xff] %v7812_v4  ;;  %4747 = vst [vmem:[#allocation4 + $0x18] sm:$0x3] %v7812_v4  ;;  %518 = vmatpush1.msra.mxu0 %v439_v1  ;;  %v435_v6 = vld [vmem:[%s11580_s1 + $0xd0] sm:$0xff]  ;;  %v434_v7 = vld [vmem:[%s11580_s1 + $0xc8] sm:$0xff]  ;;  %s8092_s29 = scalar_select %p380_p10, %s7900_s21, 1 }
  0x17   : > { %4748 = vst [vmem:[#allocation4 + $0x50] sm:$0x3] %v7812_v4  ;;  %4749 = vst [vmem:[#allocation4 + $0x168] sm:$0x3] %v7812_v4  ;;  %519 = vmatprep.subr.mxu0 %v438_v2  ;;  %v433_v8 = vld [vmem:[%s11580_s1 + $0xc0] sm:$0xff]  ;;  %v432_v9 = vld [vmem:[%s11580_s1 + $0xb8] sm:$0xff] }
  0x18   : > { %4750 = vst [vmem:[#allocation4 + $0x130] sm:$0xff] %v7812_v4  ;;  %4752 = vst [vmem:[#allocation4 + $0x180] sm:$0xff] %v7812_v4  ;;  %520 = vmatpush1.msra.mxu0 %v437_v3  ;;  %v431_v10 = vld [vmem:[%s11580_s1 + $0xb0] sm:$0xff]  ;;  %v430_v11 = vld [vmem:[%s11580_s1 + $0xa8] sm:$0xff]  ;;  %s7690_s22 = smul.u32 192, %s8092_s29  ;;  %s7813_s25 = smov 32  }
  0x19   : > { %4753 = vst [vmem:[#allocation4 + $0x110] sm:$0x3] %v7812_v4  ;;  %4755 = vst [vmem:[#allocation4 + $0x98] sm:$0x3] %v7812_v4  ;;  %521 = vmatprep.subr.mxu0 %v436_v5  ;;  %v429_v12 = vld [vmem:[%s11580_s1 + $0xa0] sm:$0xff]  ;;  %v428_v13 = vld [vmem:[%s11580_s1 + $0x98] sm:$0xff] }
  0x1a   : > { %4756 = vst [vmem:[#allocation4 + $0x120] sm:$0xff] %v7812_v4  ;;  %4757 = vst [vmem:[#allocation4 + $0x150] sm:$0xff] %v7812_v4  ;;  %522 = vmatpush1.msra.mxu0 %v435_v6  ;;  %v427_v14 = vld [vmem:[%s11580_s1 + $0x90] sm:$0xff]  ;;  %v504_v15 = vld [vmem:[%s11580_s1 + $0x2f8] sm:$0xff]  ;;  %s8149_s19 = scalar_lea.vmem %s11579_s0, %s7690_s22  ;;  %vm963_vm2 = vcmask 1046528   ;;  %vm1230_vm3 = vcmask 1045504  }
  0x1b   : > { %4758 = vst [vmem:[#allocation4 + $0x108] sm:$0xff] %v7812_v4  ;;  %4759 = vst [vmem:[#allocation4 + $0x60] sm:$0x3] %v7812_v4  ;;  %523 = vmatprep.subr.mxu0 %v434_v7  ;;  %v503_v16 = vld [vmem:[%s11580_s1 + $0x2f0] sm:$0xff]  ;;  %v426_v17 = vld [vmem:[%s11580_s1 + $0x88] sm:$0xff]  ;;  %630 = vmatprep.subr.mxu1 %v504_v15  ;;  %s7814_s16 = smov 96  }
  0x1c   : > { %4760 = vst [vmem:[#allocation4 + $0xe0] sm:$0x3] %v7812_v4  ;;  %4761 = vst [vmem:[#allocation4 + $0x188] sm:$0x3] %v7812_v4  ;;  %524 = vmatpush1.msra.mxu0 %v433_v8  ;;  %v502_v18 = vld [vmem:[%s11580_s1 + $0x2e8] sm:$0xff]  ;;  %v425_v19 = vld [vmem:[%s11580_s1 + $0x80] sm:$0xff]  ;;  %631 = vmatpush1.msra.mxu1 %v503_v16 }
  0x1d   : > { %4762 = vst [vmem:[#allocation4 + $0x138] sm:$0xff] %v7812_v4  ;;  %4763 = vst [vmem:[#allocation4 + $0x140] sm:$0xff] %v7812_v4  ;;  %525 = vmatprep.subr.mxu0 %v432_v9  ;;  %v501_v20 = vld [vmem:[%s11580_s1 + $0x2e0] sm:$0xff]  ;;  %v500_v21 = vld [vmem:[%s11580_s1 + $0x2d8] sm:$0xff]  ;;  %632 = vmatprep.subr.mxu1 %v502_v18  ;;  %vm829_vm4 = vcmask 261120   ;;  %vm3421_vm5 = vcmask 785408  }
  0x1e   : > { %4764 = vst [vmem:[#allocation4 + $0x80] sm:$0xff] %v7812_v4  ;;  %4765 = vst [vmem:[#allocation4 + $0x1a8] sm:$0x3] %v7812_v4  ;;  %526 = vmatpush1.msra.mxu0 %v431_v10  ;;  %v424_v22 = vld [vmem:[%s11580_s1 + $0x78] sm:$0xff]  ;;  %v499_v23 = vld [vmem:[%s11580_s1 + $0x2d0] sm:$0xff]  ;;  %633 = vmatpush1.msra.mxu1 %v501_v20  ;;  %vm3423_vm6 = vcmask 779264  }
  0x1f   : > { %4766 = vst [vmem:[#allocation4 + $0x1b8] sm:$0x3] %v7812_v4  ;;  %4767 = vst [vmem:[#allocation4 + $0x28] sm:$0x3] %v7812_v4  ;;  %527 = vmatprep.subr.mxu0 %v430_v11  ;;  %v423_v24 = vld [vmem:[%s11580_s1 + $0x70] sm:$0xff]  ;;  %v498_v25 = vld [vmem:[%s11580_s1 + $0x2c8] sm:$0xff]  ;;  %634 = vmatprep.subr.mxu1 %v500_v21 }
  0x20   : > { %4768 = vst [vmem:[#allocation4 + $0xf0] sm:$0xff] %v7812_v4  ;;  %4769 = vst [vmem:[#allocation4 + $0x158] sm:$0xff] %v7812_v4  ;;  %528 = vmatpush1.msra.mxu0 %v429_v12  ;;  %v422_v26 = vld [vmem:[%s11580_s1 + $0x68] sm:$0xff]  ;;  %v497_v27 = vld [vmem:[%s11580_s1 + $0x2c0] sm:$0xff]  ;;  %635 = vmatpush1.msra.mxu1 %v499_v23  ;;  %s377_s15 = sand.u32 1, %s7802_s18   ;;  %s7816_s29 = smov [#allocation5]  }
  0x21   : > { %4770 = vst [vmem:[#allocation4 + $0x128] sm:$0xff] %v7812_v4  ;;  %4771 = vst [vmem:[#allocation4 + $0x1d8] sm:$0x3] %v7812_v4  ;;  %529 = vmatprep.subr.mxu0 %v428_v13  ;;  %v421_v28 = vld [vmem:[%s11580_s1 + $0x60] sm:$0xff]  ;;  %v496_v29 = vld [vmem:[%s11580_s1 + $0x2b8] sm:$0xff]  ;;  %636 = vmatprep.subr.mxu1 %v498_v25  ;;  %s10017_s22 = smul.u32 192, %s377_s15 }
  0x22   : > { %4772 = vst [vmem:[#allocation4 + $0x8] sm:$0x3] %v7812_v4  ;;  %4773 = vst [vmem:[#allocation4 + $0x170] sm:$0x3] %v7812_v4  ;;  %530 = vmatpush1.msra.mxu0 %v427_v14  ;;  %v420_v30 = vld [vmem:[%s11580_s1 + $0x58] sm:$0xff]  ;;  %v495_v31 = vld [vmem:[%s11580_s1 + $0x2b0] sm:$0xff]  ;;  %637 = vmatpush1.msra.mxu1 %v497_v27 }
  0x23   : > { %4774 = vst [vmem:[#allocation4 + $0xc0] sm:$0xff] %v7812_v4  ;;  %4775 = vst [vmem:[#allocation4 + $0xa0] sm:$0xff] %v7812_v4  ;;  %531 = vmatprep.subr.mxu0 %v426_v17  ;;  %v419_v32 = vld [vmem:[%s11580_s1 + $0x50] sm:$0xff]  ;;  %v494_v33 = vld [vmem:[%s11580_s1 + $0x2a8] sm:$0xff]  ;;  %638 = vmatprep.subr.mxu1 %v496_v29  ;;  %s10072_s13 = scalar_lea.vmem [#allocation5], %s10017_s22 }
  0x24   : > { %4776 = vst [vmem:[#allocation4 + $0x148] sm:$0xff] %v7812_v4  ;;  %4777 = vst [vmem:[#allocation4 + $0x1d0] sm:$0x3] %v7812_v4  ;;  %532 = vmatpush1.msra.mxu0 %v425_v19  ;;  %v418_v34 = vld [vmem:[%s11580_s1 + $0x48] sm:$0xff]  ;;  %v493_v35 = vld [vmem:[%s11580_s1 + $0x2a0] sm:$0xff]  ;;  %639 = vmatpush1.msra.mxu1 %v495_v31  ;;  %s5947_s26 = sshll.u32 %s10072_s13, 4  ;;  %s11532_s26 = int_to_ptr.vmem [resolvable:$true] %s5947_s26 }
  0x25   : > { %4778 = vst [vmem:[#allocation4 + $0x100] sm:$0x3] %v7812_v4  ;;  %4779 = vst [vmem:[#allocation4 + $0xf8] sm:$0x3] %v7812_v4  ;;  %533 = vmatprep.subr.mxu0 %v424_v22  ;;  %v417_v36 = vld [vmem:[%s11580_s1 + $0x40] sm:$0xff]  ;;  %v492_v37 = vld [vmem:[%s11580_s1 + $0x298] sm:$0xff]  ;;  %640 = vmatprep.subr.mxu1 %v494_v33 }
  0x26   : > { %4780 = vst [vmem:[#allocation4 + $0x40] sm:$0xff] %v7812_v4  ;;  %4781 = vst [vmem:[#allocation4 + $0xa8] sm:$0xff] %v7812_v4  ;;  %534 = vmatpush1.msra.mxu0 %v423_v24  ;;  %v416_v38 = vld [vmem:[%s11580_s1 + $0x38] sm:$0xff]  ;;  %v491_v39 = vld [vmem:[%s11580_s1 + $0x290] sm:$0xff]  ;;  %641 = vmatpush1.msra.mxu1 %v493_v35  ;;  %s7750_s22 = scalar_lea.vmem %s11532_s26, 3072 }
  0x27   : > { %4782 = vst [vmem:[#allocation4 + $0x190] sm:$0xff] %v7812_v4  ;;  %4783 = vst [vmem:[#allocation4 + $0x1a0] sm:$0x3] %v7812_v4  ;;  %535 = vmatprep.subr.mxu0 %v422_v26  ;;  %v415_v40 = vld [vmem:[%s11580_s1 + $0x30] sm:$0xff]  ;;  %v490_v41 = vld [vmem:[%s11580_s1 + $0x288] sm:$0xff]  ;;  %642 = vmatprep.subr.mxu1 %v492_v37  ;;  %p7751_p11 = scmp.ne.s32.totalorder %s11532_s26, %s7750_s22 }
  0x28   : > { %4784 = vst [vmem:[#allocation4 + $0xb8] sm:$0x3] %v7812_v4  ;;  %4785 = vst [vmem:[#allocation4] sm:$0x3] %v7812_v4  ;;  %536 = vmatpush1.msra.mxu0 %v421_v28  ;;  %v414_v42 = vld [vmem:[%s11580_s1 + $0x28] sm:$0xff]  ;;  %v489_v43 = vld [vmem:[%s11580_s1 + $0x280] sm:$0xff]  ;;  %643 = vmatpush1.msra.mxu1 %v491_v39 }
  0x29   : > { %4786 = vst [vmem:[#allocation4 + $0x38] sm:$0xff] %v7812_v4  ;;  %4787 = vst [vmem:[#allocation4 + $0x20] sm:$0xff] %v7812_v4  ;;  %537 = vmatprep.subr.mxu0 %v420_v30  ;;  %v413_v44 = vld [vmem:[%s11580_s1 + $0x20] sm:$0xff]  ;;  %v488_v45 = vld [vmem:[%s11580_s1 + $0x278] sm:$0xff]  ;;  %644 = vmatprep.subr.mxu1 %v490_v41  ;;  %p7752_p12 = pnand %p7751_p11, %p7917_p5 }
  0x2a   : > { %4788 = vst [vmem:[#allocation4 + $0x10] sm:$0xff] %v7812_v4  ;;  %4789 = vst [vmem:[#allocation4 + $0x58] sm:$0x3] %v7812_v4  ;;  %538 = vmatpush1.msra.mxu0 %v419_v32  ;;  %v412_v46 = vld [vmem:[%s11580_s1 + $0x18] sm:$0xff]  ;;  %v487_v47 = vld [vmem:[%s11580_s1 + $0x270] sm:$0xff]  ;;  %645 = vmatpush1.msra.mxu1 %v489_v43 }
  0x2b   : > { %4790 = vst [vmem:[#allocation4 + $0x88] sm:$0x3] %v7812_v4  ;;  %4791 = vst [vmem:[#allocation4 + $0xd0] sm:$0x3] %v7812_v4  ;;  %539 = vmatprep.subr.mxu0 %v418_v34  ;;  %v411_v48 = vld [vmem:[%s11580_s1 + $0x10] sm:$0xff]  ;;  %v486_v49 = vld [vmem:[%s11580_s1 + $0x268] sm:$0xff]  ;;  %646 = vmatprep.subr.mxu1 %v488_v45  ;;  %p7753_p13 = pneg %p7752_p12 }
  0x2c   : > { %4792 = vst [vmem:[#allocation4 + $0x68] sm:$0xff] %v7812_v4  ;;  %4793 = vst [vmem:[#allocation4 + $0xc8] sm:$0xff] %v7812_v4  ;;  %540 = vmatpush1.msra.mxu0 %v417_v36  ;;  %v410_v50 = vld [vmem:[%s11580_s1 + $0x8] sm:$0xff]  ;;  %v409_v51 = vld [vmem:[%s11580_s1] sm:$0xff]  ;;  %647 = vmatpush1.msra.mxu1 %v487_v47 }
  0x2d   : > { %4794 = vst [vmem:[#allocation4 + $0x198] sm:$0xff] %v7812_v4  ;;  %4795 = vst [vmem:[#allocation4 + $0xe8] sm:$0x3] %v7812_v4  ;;  %541 = vmatprep.subr.mxu0 %v416_v38  ;;  %v485_v52 = vld [vmem:[%s11580_s1 + $0x260] sm:$0xff]  ;;  %v472_v53 = vld [vmem:[%s11580_s1 + $0x1f8] sm:$0xff]  ;;  %648 = vmatprep.subr.mxu1 %v486_v49 }
  0x2e   : > { %4796 = vst [vmem:[#allocation4 + $0x178] sm:$0x3] %v7812_v4  ;;  %4797 = vst [vmem:[#allocation4 + $0x70] sm:$0x3] %v7812_v4  ;;  %542 = vmatpush1.msra.mxu0 %v415_v40  ;;  %v471_v54 = vld [vmem:[%s11580_s1 + $0x1f0] sm:$0xff]  ;;  %v484_v55 = vld [vmem:[%s11580_s1 + $0x258] sm:$0xff]  ;;  %649 = vmatpush1.msra.mxu1 %v485_v52 }
  0x2f   : > { %4801 = vst [vmem:[#allocation4 + $0x30] sm:$0x3] %v7812_v4  ;;  %4802 = vst [vmem:[#allocation4 + $0x78] sm:$0x3] %v7812_v4  ;;  %543 = vmatprep.subr.mxu0 %v414_v42  ;;  %v470_v56 = vld [vmem:[%s11580_s1 + $0x1e8] sm:$0xff]  ;;  %v483_v57 = vld [vmem:[%s11580_s1 + $0x250] sm:$0xff]  ;;  %650 = vmatprep.subr.mxu1 %v484_v55 }
  0x30   : > { %4803 = vst [vmem:[#allocation4 + $0x1c0] sm:$0x3] %v7812_v4  ;;  %544 = vmatpush1.msra.mxu0 %v413_v44  ;;  %v482_v58 = vld [vmem:[%s11580_s1 + $0x248] sm:$0xff]  ;;  %v469_v59 = vld [vmem:[%s11580_s1 + $0x1e0] sm:$0xff]  ;;  %v480_v61 = vld [vmem:[%s11580_s1 + $0x238] sm:$0xff]  ;;  %651 = vmatpush1.msra.mxu1 %v483_v57 }
  0x31   : > { %545 = vmatprep.subr.mxu0 %v412_v46  ;;  %v481_v60 = vld [vmem:[%s11580_s1 + $0x240] sm:$0xff]  ;;  %v8179_v62 = vld [vmem:[%s8149_s19 + $0x8] sm:$0xff]  ;;  %v468_v63 = vld [vmem:[%s11580_s1 + $0x1d8] sm:$0xff]  ;;  %652 = vmatprep.subr.mxu1 %v482_v58  ;;  %763 = vst.msk [vmem:[#allocation2 + $0x10] sm:$0xff] %vm759_vm0, %v7812_v4 }
  0x32   : > { %546 = vmatpush1.msra.mxu0 %v411_v48  ;;  %v479_v0 = vld [vmem:[%s11580_s1 + $0x230] sm:$0xff]  ;;  %v4829_v1 = vrot.slane %v8179_v62, 7  ;;  %v8189_v2 = vld [vmem:[%s8149_s19] sm:$0xff]  ;;  %v8202_v6 = vld [vmem:[%s11580_s1 + $0x228] sm:$0xff]  ;;  %653 = vmatpush1.msra.mxu1 %v481_v60  ;;  %764 = vst.msk [vmem:[#allocation2 + $0x18] sm:$0x3] %vm761_vm1, %v7812_v4 }
  0x33   : > { %547 = vmatprep.subr.mxu0 %v410_v50  ;;  %v8192_v3 = vld [vmem:[%s8149_s19 + $0x10] sm:$0xff]  ;;  %v4828_v7 = vrot.slane %v8189_v2, 7  ;;  %v8207_v9 = vld [vmem:[%s8149_s19 + $0x20] sm:$0xff]  ;;  %v8210_v10 = vld [vmem:[%s8149_s19 + $0x18] sm:$0xff]  ;;  %654 = vmatprep.subr.mxu1 %v480_v61  ;;  %760 = vst.msk [vmem:[#allocation2] sm:$0xff] %vm759_vm0, %v7812_v4 }
  0x34   : > { %548 = vmatpush1.msra.mxu0 %v409_v51  ;;  %v8197_v5 = vld [vmem:[%s11580_s1 + $0x1d0] sm:$0xff]  ;;  %v4830_v8 = vrot.slane %v8192_v3, 7  ;;  %v8213_v11 = vld [vmem:[%s8149_s19 + $0x28] sm:$0xff]  ;;  %v8223_v13 = vld [vmem:[%s11580_s1 + $0x220] sm:$0xff]  ;;  %4878 = vst [vmem:[#allocation4 + $0x48] sm:$0xfe] %v4829_v1  ;;  %655 = vmatpush1.msra.mxu1 %v479_v0 }
  0x35   : > { %549 = vmatprep.subr.mxu0 %v472_v53  ;;  %v8218_v12 = vld [vmem:[%s11580_s1 + $0x1c8] sm:$0xff]  ;;  %4881 = vst [vmem:[#allocation4 + $0x118] sm:$0x1] %v4829_v1  ;;  %v4832_v14 = vrot.slane %v8207_v9, 7  ;;  %v4831_v15 = vrot.slane %v8210_v10, 7  ;;  %v4833_v16 = vrot.slane %v8213_v11, 7  ;;  %656 = vmatprep.subr.mxu1 %v8202_v6 }
  0x36   : > { %550 = vmatpush2.msra.mxu0 %v471_v54  ;;  %v8229_v17 = vld [vmem:[%s8149_s19 + $0x38] sm:$0xff]  ;;  %v8232_v18 = vld [vmem:[%s8149_s19 + $0x30] sm:$0xff]  ;;  %v8235_v19 = vld [vmem:[%s8149_s19 + $0x40] sm:$0xff]  ;;  %4877 = vst [vmem:[#allocation4 + $0x130] sm:$0xfe] %v4828_v7  ;;  %657 = vmatpush1.msra.mxu1 %v8223_v13 }
  0x37   : > { %551 = vmatprep.subr.mxu0 %v470_v56  ;;  %v8240_v20 = vld [vmem:[%s11580_s1 + $0x1c0] sm:$0xff]  ;;  %v8245_v21 = vld [vmem:[%s11580_s1 + $0x218] sm:$0xff]  ;;  %4880 = vst [vmem:[#allocation4 + $0x110] sm:$0x1] %v4828_v7  ;;  %4879 = vst [vmem:[#allocation4 + $0x180] sm:$0xfe] %v4830_v8  ;;  %581 = vmatprep.mubr.f32.mxu0 %v8179_v62 }
  0x38   : > { %4882 = vst [vmem:[#allocation4 + $0x98] sm:$0x1] %v4830_v8  ;;  %v4835_v22 = vrot.slane %v8229_v17, 7  ;;  %v4834_v23 = vrot.slane %v8232_v18, 7  ;;  %v4836_v24 = vrot.slane %v8235_v19, 7  ;;  %v8251_v25 = vld [vmem:[%s8149_s19 + $0x50] sm:$0xff]  ;;  %552 = vmatpush2.msra.mxu0 %v469_v59  ;;  %658 = vmatprep.subr.mxu1 %v8245_v21 }
  0x39   : > { %v8254_v26 = vld [vmem:[%s8149_s19 + $0x48] sm:$0xff]  ;;  %v8257_v27 = vld [vmem:[%s8149_s19 + $0x58] sm:$0xff]  ;;  %v8267_v29 = vld [vmem:[%s11580_s1 + $0x210] sm:$0xff]  ;;  %4884 = vst [vmem:[#allocation4 + $0x150] sm:$0xfe] %v4832_v14  ;;  %v4838_v30 = vrot.slane %v8251_v25, 7  ;;  %553 = vmatprep.subr.mxu0 %v468_v63 }
  0x3a   : > { %v8262_v28 = vld [vmem:[%s11580_s1 + $0x1b8] sm:$0xff]  ;;  %4887 = vst [vmem:[#allocation4 + $0xe0] sm:$0x1] %v4832_v14  ;;  %4883 = vst [vmem:[#allocation4 + $0x120] sm:$0xfe] %v4831_v15  ;;  %v4837_v31 = vrot.slane %v8254_v26, 7  ;;  %554 = vmatpush2.msra.mxu0 %v8197_v5  ;;  %659 = vmatpush1.msra.mxu1 %v8267_v29 }
  0x3b   : > { %4886 = vst [vmem:[#allocation4 + $0x60] sm:$0x1] %v4831_v15  ;;  %4885 = vst [vmem:[#allocation4 + $0x108] sm:$0xfe] %v4833_v16  ;;  %v4839_v32 = vrot.slane %v8257_v27, 7  ;;  %v8273_v33 = vld [vmem:[%s8149_s19 + $0x68] sm:$0xff]  ;;  %555 = vmatprep.subr.mxu0 %v8218_v12 }
  0x3c   : > { %4888 = vst [vmem:[#allocation4 + $0x188] sm:$0x1] %v4833_v16  ;;  %v8276_v34 = vld [vmem:[%s8149_s19 + $0x60] sm:$0xff]  ;;  %v8279_v35 = vld [vmem:[%s8149_s19 + $0x70] sm:$0xff]  ;;  %v8289_v37 = vld [vmem:[%s11580_s1 + $0x208] sm:$0xff]  ;;  %v4841_v38 = vrot.slane %v8273_v33, 7  ;;  %556 = vmatpush2.msra.mxu0 %v8240_v20 }
  0x3d   : > { %v8284_v36 = vld [vmem:[%s11580_s1 + $0x1b0] sm:$0xff]  ;;  %4890 = vst [vmem:[#allocation4 + $0x140] sm:$0xfe] %v4835_v22  ;;  %4893 = vst [vmem:[#allocation4 + $0x1b8] sm:$0x1] %v4835_v22  ;;  %v4840_v39 = vrot.slane %v8276_v34, 7  ;;  %557 = vmatprep.subr.mxu0 %v8262_v28  ;;  %660 = vmatprep.subr.mxu1 %v8289_v37 }
  0x3e   : > { %4889 = vst [vmem:[#allocation4 + $0x138] sm:$0xfe] %v4834_v23  ;;  %4892 = vst [vmem:[#allocation4 + $0x1a8] sm:$0x1] %v4834_v23  ;;  %v4842_v40 = vrot.slane %v8279_v35, 7  ;;  %v8295_v41 = vld [vmem:[%s8149_s19 + $0x80] sm:$0xff]  ;;  %558 = vmatpush2.msra.mxu0 %v8284_v36 }
  0x3f   : > { %4891 = vst [vmem:[#allocation4 + $0x80] sm:$0xfe] %v4836_v24  ;;  %4894 = vst [vmem:[#allocation4 + $0x28] sm:$0x1] %v4836_v24  ;;  %v8298_v42 = vld [vmem:[%s8149_s19 + $0x78] sm:$0xff]  ;;  %v8301_v43 = vld [vmem:[%s8149_s19 + $0x88] sm:$0xff]  ;;  %v507_v24 = vlaneseq }
  0x40   : > { %4896 = vst [vmem:[#allocation4 + $0x158] sm:$0xfe] %v4838_v30  ;;  %4899 = vst [vmem:[#allocation4 + $0x8] sm:$0x1] %v4838_v30  ;;  %v4844_v44 = vrot.slane %v8295_v41, 7  ;;  %v4843_v45 = vrot.slane %v8298_v42, 7 }
  0x41   : > { %4895 = vst [vmem:[#allocation4 + $0xf0] sm:$0xfe] %v4837_v31  ;;  %4898 = vst [vmem:[#allocation4 + $0x1d8] sm:$0x1] %v4837_v31  ;;  %v4845_v46 = vrot.slane %v8301_v43, 7  ;;  %v8309_v47 = vld [vmem:[%s8149_s19 + $0x98] sm:$0xff] }
  0x42   : > { %4897 = vst [vmem:[#allocation4 + $0x128] sm:$0xfe] %v4839_v32  ;;  %4900 = vst [vmem:[#allocation4 + $0x170] sm:$0x1] %v4839_v32  ;;  %v8312_v48 = vld [vmem:[%s8149_s19 + $0x90] sm:$0xff]  ;;  %v8315_v49 = vld [vmem:[%s8149_s19 + $0xa0] sm:$0xff] }
  0x43   : > { %4902 = vst [vmem:[#allocation4 + $0xa0] sm:$0xfe] %v4841_v38  ;;  %4905 = vst [vmem:[#allocation4 + $0x100] sm:$0x1] %v4841_v38  ;;  %v4847_v50 = vrot.slane %v8309_v47, 7  ;;  %v4846_v51 = vrot.slane %v8312_v48, 7 }
  0x44   : > { %4901 = vst [vmem:[#allocation4 + $0xc0] sm:$0xfe] %v4840_v39  ;;  %4904 = vst [vmem:[#allocation4 + $0x1d0] sm:$0x1] %v4840_v39  ;;  %v4848_v52 = vrot.slane %v8315_v49, 7  ;;  %v8323_v53 = vld [vmem:[%s8149_s19 + $0xb0] sm:$0xff] }
  0x45   : > { %4903 = vst [vmem:[#allocation4 + $0x148] sm:$0xfe] %v4842_v40  ;;  %4906 = vst [vmem:[#allocation4 + $0xf8] sm:$0x1] %v4842_v40  ;;  %v8326_v54 = vld [vmem:[%s8149_s19 + $0xa8] sm:$0xff]  ;;  %v8329_v55 = vld [vmem:[%s8149_s19 + $0xb8] sm:$0xff] }
  0x46   : > { %v462_v56 = vld [vmem:[%s11580_s1 + $0x1a8] sm:$0xff]  ;;  %4908 = vst [vmem:[#allocation4 + $0xa8] sm:$0xfe] %v4844_v44  ;;  %4911 = vst [vmem:[#allocation4 + $0xb8] sm:$0x1] %v4844_v44  ;;  %v4850_v57 = vrot.slane %v8323_v53, 7 }
  0x47   : > { %4907 = vst [vmem:[#allocation4 + $0x40] sm:$0xfe] %v4843_v45  ;;  %4910 = vst [vmem:[#allocation4 + $0x1a0] sm:$0x1] %v4843_v45  ;;  %v4849_v58 = vrot.slane %v8326_v54, 7  ;;  %v4851_v59 = vrot.slane %v8329_v55, 7  ;;  %559 = vmatprep.subr.mxu0 %v462_v56 }
  0x48   : > { %4909 = vst [vmem:[#allocation4 + $0x190] sm:$0xfe] %v4845_v46  ;;  %4912 = vst [vmem:[#allocation4] sm:$0x1] %v4845_v46  ;;  %v461_v60 = vld [vmem:[%s11580_s1 + $0x1a0] sm:$0xff]  ;;  %v460_v63 = vld [vmem:[%s11580_s1 + $0x198] sm:$0xff] }
  0x49   : > { %v473_v61 = vld [vmem:[%s11580_s1 + $0x200] sm:$0xff]  ;;  %4914 = vst [vmem:[#allocation4 + $0x20] sm:$0xfe] %v4847_v50  ;;  %4917 = vst [vmem:[#allocation4 + $0x88] sm:$0x1] %v4847_v50  ;;  %v459_v0 = vld [vmem:[%s11580_s1 + $0x190] sm:$0xff]  ;;  %560 = vmatpush2.msra.mxu0 %v461_v60 }
  0x4a   : > { %4913 = vst [vmem:[#allocation4 + $0x38] sm:$0xfe] %v4846_v51  ;;  %4916 = vst [vmem:[#allocation4 + $0x58] sm:$0x1] %v4846_v51  ;;  %v458_v1 = vld [vmem:[%s11580_s1 + $0x188] sm:$0xff]  ;;  %661 = vmatpush1.msra.mxu1 %v473_v61  ;;  %561 = vmatprep.subr.mxu0 %v460_v63  ;;  %v457_v5 = vld [vmem:[%s11580_s1 + $0x180] sm:$0xff] }
  0x4b   : > { %4915 = vst [vmem:[#allocation4 + $0x10] sm:$0xfe] %v4848_v52  ;;  %4918 = vst [vmem:[#allocation4 + $0xd0] sm:$0x1] %v4848_v52  ;;  %695 = vmatmul.mubr.f32.vlgmr.msra.gmra.mxu1 %v8192_v3  ;;  %562 = vmatpush2.msra.mxu0 %v459_v0  ;;  %v456_v6 = vld [vmem:[%s11580_s1 + $0x178] sm:$0xff]  ;;  %v455_v62 = vld [vmem:[%s11580_s1 + $0x170] sm:$0xff] }
  0x4c   : > { %4920 = vst [vmem:[#allocation4 + $0xc8] sm:$0xfe] %v4850_v57  ;;  %4923 = vst [vmem:[#allocation4 + $0x178] sm:$0x1] %v4850_v57  ;;  %700 = vmatprep.mubr.f32.mxu1 %v7812_v4  ;;  %563 = vmatprep.subr.mxu0 %v458_v1  ;;  %v454_v7 = vld [vmem:[%s11580_s1 + $0x168] sm:$0xff]  ;;  %v453_v3 = vld [vmem:[%s11580_s1 + $0x160] sm:$0xff] }
  0x4d   : > { %4919 = vst [vmem:[#allocation4 + $0x68] sm:$0xfe] %v4849_v58  ;;  %4922 = vst [vmem:[#allocation4 + $0xe8] sm:$0x1] %v4849_v58  ;;  %564 = vmatpush2.msra.mxu0 %v457_v5  ;;  %v452_v8 = vld [vmem:[%s11580_s1 + $0x158] sm:$0xff]  ;;  %v451_v12 = vld [vmem:[%s11580_s1 + $0x150] sm:$0xff] }
  0x4e   : > { %4921 = vst [vmem:[#allocation4 + $0x198] sm:$0xfe] %v4851_v59  ;;  %4924 = vst [vmem:[#allocation4 + $0x70] sm:$0x1] %v4851_v59  ;;  %565 = vmatprep.subr.mxu0 %v456_v6  ;;  %v450_v13 = vld [vmem:[%s11580_s1 + $0x148] sm:$0xff]  ;;  %v448_v14 = vld [vmem:[%s11580_s1 + $0x138] sm:$0xff] }
  0x4f   : > { %701 = vmatmul.mubr.f32.gmra.mxu1 %v8213_v11  ;;  %566 = vmatpush2.msra.mxu0 %v455_v62  ;;  %v449_v11 = vld [vmem:[%s11580_s1 + $0x140] sm:$0xff]  ;;  %v447_v15 = vld [vmem:[%s11580_s1 + $0x130] sm:$0xff]  ;;  %v446_v16 = vld [vmem:[%s11580_s1 + $0x128] sm:$0xff]  ;;  %762 = vst.msk [vmem:[#allocation2 + $0x8] sm:$0x3] %vm761_vm1, %v7812_v4  ;;  %s7815_s19 = smov 64  }
  0x50   : > { %706 = vmatprep.mubr.f32.mxu1 %v7812_v4  ;;  %567 = vmatprep.subr.mxu0 %v454_v7  ;;  %v444_v20 = vld [vmem:[%s11580_s1 + $0x118] sm:$0xff]  ;;  %v443_v21 = vld [vmem:[%s11580_s1 + $0x110] sm:$0xff]  ;;  %v442_v22 = vld [vmem:[%s11580_s1 + $0x108] sm:$0xff]  ;;  %765 = vst.msk [vmem:[#allocation2 + $0x20] sm:$0xff] %vm759_vm0, %v7812_v4 }
  0x51   : > { %568 = vmatpush2.msra.mxu0 %v453_v3  ;;  %v441_v23 = vld [vmem:[%s11580_s1 + $0x100] sm:$0xff]  ;;  %v898_v30 = vld [vmem:[%s11582_s3 + $0xb8] sm:$0xff]  ;;  %v897_v31 = vld [vmem:[%s11582_s3 + $0xb0] sm:$0xff]  ;;  %766 = vst.msk [vmem:[#allocation2 + $0x28] sm:$0x3] %vm761_vm1, %v7812_v4 }
  0x52   : > { %569 = vmatprep.subr.mxu0 %v452_v8  ;;  %v888_v32 = vld [vmem:[%s11582_s3 + $0x68] sm:$0xff]  ;;  %767 = vst.msk [vmem:[#allocation2 + $0x30] sm:$0xff] %vm759_vm0, %v7812_v4  ;;  %769 = vst.msk [vmem:[#allocation2 + $0x40] sm:$0xff] %vm759_vm0, %v7812_v4  ;;  %v887_v39 = vld [vmem:[%s11582_s3 + $0x60] sm:$0xff] }
  0x53   : > { %707 = vmatmul.mubr.f32.gmra.mxu1 %v8235_v19  ;;  %570 = vmatpush2.msra.mxu0 %v451_v12  ;;  %v445_v19 = vld [vmem:[%s11580_s1 + $0x120] sm:$0xff]  ;;  %v896_v37 = vld [vmem:[%s11582_s3 + $0xa8] sm:$0xff]  ;;  %768 = vst.msk [vmem:[#allocation2 + $0x38] sm:$0x3] %vm761_vm1, %v7812_v4  ;;  %770 = vst.msk [vmem:[#allocation2 + $0x48] sm:$0x3] %vm761_vm1, %v7812_v4 }
  0x54   : > { %712 = vmatprep.mubr.f32.mxu1 %v7812_v4  ;;  %571 = vmatprep.subr.mxu0 %v450_v13  ;;  %771 = vst.msk [vmem:[#allocation2 + $0x50] sm:$0xff] %vm759_vm0, %v7812_v4  ;;  %773 = vst.msk [vmem:[#allocation2 + $0x60] sm:$0xff] %vm759_vm0, %v7812_v4  ;;  %v895_v40 = vld [vmem:[%s11582_s3 + $0xa0] sm:$0xff]  ;;  %v886_v44 = vld [vmem:[%s11582_s3 + $0x58] sm:$0xff] }
  0x55   : > { %572 = vmatpush2.msra.mxu0 %v449_v11  ;;  %772 = vst.msk [vmem:[#allocation2 + $0x58] sm:$0x3] %vm761_vm1, %v7812_v4  ;;  %774 = vst.msk [vmem:[#allocation2 + $0x68] sm:$0x3] %vm761_vm1, %v7812_v4  ;;  %v894_v45 = vld [vmem:[%s11582_s3 + $0x98] sm:$0xff]  ;;  %v893_v50 = vld [vmem:[%s11582_s3 + $0x90] sm:$0xff] }
  0x56   : > { %573 = vmatprep.subr.mxu0 %v448_v14  ;;  %775 = vst.msk [vmem:[#allocation2 + $0x70] sm:$0xff] %vm759_vm0, %v7812_v4  ;;  %777 = vst.msk [vmem:[#allocation2 + $0x80] sm:$0xff] %vm759_vm0, %v7812_v4  ;;  %v884_v56 = vld [vmem:[%s11582_s3 + $0x48] sm:$0xff]  ;;  %v8558_v58 = vld [vmem:[#allocation2] sm:$0xff] }
  0x57   : > { %713 = vmatmul.mubr.f32.gmra.mxu1 %v8257_v27  ;;  %574 = vmatpush2.msra.mxu0 %v447_v15  ;;  %v8454_v27 = vshrl.u32 %v507_v24, 7  ;;  %776 = vst.msk [vmem:[#allocation2 + $0x78] sm:$0x3] %vm761_vm1, %v7812_v4  ;;  %778 = vst.msk [vmem:[#allocation2 + $0x88] sm:$0x3] %vm761_vm1, %v7812_v4  ;;  %v892_v57 = vld [vmem:[%s11582_s3 + $0x88] sm:$0xff] }
  0x58   : > { %718 = vmatprep.mubr.f32.mxu1 %v7812_v4  ;;  %575 = vmatprep.subr.mxu0 %v446_v16  ;;  %779 = vst.msk [vmem:[#allocation2 + $0x90] sm:$0xff] %vm759_vm0, %v7812_v4  ;;  %v856_v60 = vld [vmem:[#allocation2 + $0x8] sm:$0x3]  ;;  %v964_v61 = vrot.slane %v8558_v58, 1  ;;  %2113 = vst.msk [vmem:[#allocation2] sm:$0xff] %vm759_vm0, %v7812_v4  ;;  %v1231_v63 = vrot.slane %v8558_v58, 2 }
  0x59   : > { %576 = vmatpush2.msra.mxu0 %v445_v19  ;;  %11626 = vst [vmem:[#allocation10_spill] sm:$0xff] %v8454_v27  ;;  %v509_v29 = vsub.s32 0, %v8454_v27  ;;  %780 = vst.msk [vmem:[#allocation2 + $0x98] sm:$0x3] %vm761_vm1, %v7812_v4  ;;  %v883_v5 = vld [vmem:[%s11582_s3 + $0x40] sm:$0xff]  ;;  %v965_v3 = vrot.slane %v856_v60, 1 }
  0x5a   : > { %577 = vmatprep.subr.mxu0 %v444_v20  ;;  %v891_v6 = vld [vmem:[%s11582_s3 + $0x80] sm:$0xff]  ;;  %2114 = vst.msk [vmem:[#allocation2 + $0x8] sm:$0x3] %vm761_vm1, %v7812_v4  ;;  %v1232_v8 = vrot.slane %v856_v60, 2 }
  0x5b   : > { %719 = vmatmul.mubr.f32.gmra.mxu1 %v8279_v35  ;;  %578 = vmatpush2.msra.mxu0 %v443_v21 }
  0x5c   : > { %724 = vmatprep.mubr.f32.mxu1 %v7812_v4  ;;  %579 = vmatprep.subr.mxu0 %v442_v22  ;;  %v1233_v16 = vsel %vm1230_vm3, %v1231_v63, %v1232_v8 }
  0x5d   : > { %580 = vmatpush2.msra.mxu0 %v441_v23 }
  0x5e   : > { %582 = vmatmul.mubr.f32.vlgmr.msra.gmra.mxu0 %v8189_v2  ;;  %v890_v2 = vld [vmem:[%s11582_s3 + $0x78] sm:$0xff]  ;;  %6841 = vmatprep.subr.mxu0 %v898_v30 }
  0x5f   : > { %725 = vmatmul.mubr.f32.gmra.mxu1 %v8301_v43  ;;  %587 = vmatprep.mubr.f32.mxu0 %v8207_v9  ;;  %v889_v9 = vld [vmem:[%s11582_s3 + $0x70] sm:$0xff] }
  0x60   : > { %730 = vmatprep.mubr.f32.mxu1 %v7812_v4  ;;  %6785 = vmatprep.subr.mxu1 %v890_v2 }
  0x61   : > { %6786 = vmatpush3.msra.mxu1 %v890_v2  ;;  %6842 = vmatpush3.msra.mxu0 %v898_v30 }
  0x62   : > { %588 = vmatmul.mubr.f32.gmra.mxu0 %v8210_v10  ;;  %6787 = vmatprep.subr.mxu1 %v889_v9 }
  0x63   : > { %731 = vmatmul.mubr.f32.gmra.mxu1 %v8315_v49  ;;  %593 = vmatprep.mubr.f32.mxu0 %v8229_v17  ;;  %v885_v49 = vld [vmem:[%s11582_s3 + $0x50] sm:$0xff] }
  0x64   : > { %736 = vmatprep.mubr.f32.mxu1 %v7812_v4  ;;  %6788 = vmatpush3.msra.mxu1 %v889_v9  ;;  %v966_v4 = vsel %vm963_vm2, %v964_v61, %v965_v3 }
  0x65   : > { %6789 = vmatprep.subr.mxu1 %v888_v32  ;;  %6843 = vmatprep.subr.mxu0 %v897_v31 }
  0x66   : > { %594 = vmatmul.mubr.f32.gmra.mxu0 %v8232_v18  ;;  %6790 = vmatpush3.msra.mxu1 %v888_v32 }
  0x67   : > { %737 = vmatmul.mubr.f32.gmra.mxu1 %v8329_v55  ;;  %599 = vmatprep.mubr.f32.mxu0 %v8251_v25 }
  0x68   : > { %6844 = vmatpush3.msra.mxu0 %v897_v31  ;;  %6791 = vmatprep.subr.mxu1 %v887_v39 }
  0x69   : > { %6845 = vmatprep.subr.mxu0 %v896_v37  ;;  %6792 = vmatpush3.msra.mxu1 %v887_v39 }
  0x6a   : > { %600 = vmatmul.mubr.f32.gmra.mxu0 %v8254_v26  ;;  %6793 = vmatprep.subr.mxu1 %v886_v44 }
  0x6b   : > { %605 = vmatprep.mubr.f32.mxu0 %v8273_v33  ;;  %v505_v33 = vld [vmem:[%s11581_s2] sm:$0x3]  ;;  %6846 = vmatpush3.msra.mxu0 %v896_v37 }
  0x6c   : > { %v8474_v36 = vrot.slane %v505_v33, %v509_v29  ;;  %6847 = vmatprep.subr.mxu0 %v895_v40  ;;  %6794 = vmatpush3.msra.mxu1 %v886_v44  ;;  %v8638_v44 = vld [vmem:[%s11582_s3 + $0x138] sm:$0xff] }
  0x6d   : > { %6848 = vmatpush3.msra.mxu0 %v895_v40  ;;  %6795 = vmatprep.subr.mxu1 %v885_v49 }
  0x6e   : > { %606 = vmatmul.mubr.f32.gmra.mxu0 %v8276_v34  ;;  %v513_v34 = vsub.s32 1, %v8454_v27  ;;  %6849 = vmatprep.subr.mxu0 %v894_v45 }
  0x6f   : > { %611 = vmatprep.mubr.f32.mxu0 %v8295_v41  ;;  %6850 = vmatpush3.msra.mxu0 %v894_v45 }
  0x70   : > { %v8519_v38 = vrot.slane %v505_v33, %v513_v34  ;;  %6851 = vmatprep.subr.mxu0 %v893_v50  ;;  %6796 = vmatpush3.msra.mxu1 %v885_v49 }
  0x71   : > { %6852 = vmatpush3.msra.mxu0 %v893_v50  ;;  %6797 = vmatprep.subr.mxu1 %v884_v56 }
  0x72   : > { %612 = vmatmul.mubr.f32.gmra.mxu0 %v8298_v42  ;;  %6853 = vmatprep.subr.mxu0 %v892_v57 }
  0x73   : > { %617 = vmatprep.mubr.f32.mxu0 %v8309_v47  ;;  %6798 = vmatpush3.msra.mxu1 %v884_v56 }
  0x74   : > { %6854 = vmatpush3.msra.mxu0 %v892_v57  ;;  %6799 = vmatprep.subr.mxu1 %v883_v5 }
  0x75   : > { %6855 = vmatprep.subr.mxu0 %v891_v6  ;;  %6800 = vmatpush3.msra.mxu1 %v883_v5 }
  0x76   : > { %618 = vmatmul.mubr.f32.gmra.mxu0 %v8312_v48  ;;  %6801 = vmatprep.mubr.msk.f32.mxu1 %vm759_vm0, %v966_v4 }
  0x77   : > { %623 = vmatprep.mubr.f32.mxu0 %v8323_v53  ;;  %6856 = vmatpush3.msra.mxu0 %v891_v6 }
  0x78   : > { %6897 = vmatprep.subr.mxu0 %v8638_v44 }
  0x7a   : > { %624 = vmatmul.mubr.f32.gmra.mxu0 %v8326_v54 }
  0x7b   : > { %6857 = vmatprep.mubr.msk.f32.mxu0 %vm759_vm0, %v1233_v16 }
 0x10b   : > { %v696_v10 = vpop.f32.mrf.mxu1 }
 0x10d   : > { %v8446_v17 = vpop.f32.mrf.mxu1 }
 0x10f   : > { %v8448_v18 = vpop.f32.mrf.mxu1 }
 0x111   : > { %v8450_v25 = vpop.f32.mrf.mxu1 }
 0x113   : > { %v8452_v26 = vpop.f32.mrf.mxu1 }
 0x115   : > { %v8456_v28 = vpop.f32.mrf.mxu1 }
 0x117   : > { %v8472_v35 = vpop.f32.mrf.mxu1 }
 0x119   : > { %v8527_v42 = vpop.f32.mrf.mxu1 }
 0x11b   : > { %v8545_v52 = vpop.f32.mrf.mxu1 }
 0x11d   : > { %v722_v7 = vpop.f32.mrf.mxu1 }
 0x11e   : > { %v583_v41 = vpop.f32.mrf.mxu0 }
 0x11f   : > { %v584_v43 = vadd.f32 %v583_v41, %v8474_v36  ;;  %v726_v22 = vpop.f32.mrf.mxu1 }
 0x120   : > { %v585_v46 = vpop.f32.mrf.mxu0 }
 0x121   : > { %v8536_v47 = vadd.f32 %v696_v10, %v584_v43  ;;  %v586_v48 = vadd.f32 %v585_v46, %v8519_v38 }
 0x122   : > { %v589_v51 = vpop.f32.mrf.mxu0 }
 0x123   : > { %11627 = vst [vmem:[#allocation11_spill] sm:$0xff] %v8536_v47  ;;  %v11598_v53 = vmax.f32 %v8536_v47, 0.0  ;;  %v8549_v54 = vadd.f32 %v8446_v17, %v586_v48  ;;  %v590_v55 = vadd.f32 %v589_v51, %v8474_v36 }
 0x124   : > { %v591_v59 = vpop.f32.mrf.mxu0 }
 0x125   : > { %v8565_v0 = vadd.f32 %v8448_v18, %v590_v55  ;;  %v592_v1 = vadd.f32 %v591_v59, %v8519_v38  ;;  %797 = vrot.lane.b32.xlu0 %v11598_v53, %s7813_s25  ;;  %v744_v12 = vmax.f32 %v8549_v54, 0.0  ;;  %v8690_v54 = vld [vmem:[#allocation2 + $0x98] sm:$0x3] }
 0x126   : > { %v595_v62 = vpop.f32.mrf.mxu0 }
 0x127   : > { %11628 = vst [vmem:[#allocation12_spill] sm:$0xff] %v8565_v0  ;;  %v11599_v13 = vmax.f32 %v8565_v0, 0.0  ;;  %v8582_v11 = vadd.f32 %v8450_v25, %v592_v1  ;;  %v596_v14 = vadd.f32 %v595_v62, %v8474_v36 }
 0x128   : > { %v597_v15 = vpop.f32.mrf.mxu0 }
 0x129   : > { %v598_v19 = vadd.f32 %v597_v15, %v8519_v38  ;;  %v8589_v20 = vadd.f32 %v8452_v26, %v596_v14  ;;  %801 = vrot.lane.b32.xlu1 %v11599_v13, %s7813_s25  ;;  %799 = vrot.lane.b32.xlu0 %v744_v12, %s7813_s25  ;;  %v746_v23 = vmax.f32 %v8582_v11, 0.0  ;;  %v728_v26 = vpop.f32.mrf.mxu1  ;;  %v3492_v13 = vld [vmem:[%s11586_s7 + $0xa0] sm:$0xff] }
 0x12a   : > { %v601_v21 = vpop.f32.mrf.mxu0 }
 0x12b   : > { %11629 = vst [vmem:[#allocation13_spill] sm:$0xff] %v8589_v20  ;;  %v11596_v2 = vmax.f32 %v8589_v20, 0.0  ;;  %v602_v9 = vadd.f32 %v601_v21, %v8474_v36  ;;  %v8603_v10 = vadd.f32 %v8456_v28, %v598_v19  ;;  %v732_v39 = vpop.f32.mrf.mxu1 }
 0x12c   : > { %v603_v17 = vpop.f32.mrf.mxu0 }
 0x12d   : > { %v604_v18 = vadd.f32 %v603_v17, %v8519_v38  ;;  %v8607_v24 = vadd.f32 %v8472_v35, %v602_v9  ;;  %803 = vrot.lane.b32.xlu1 %v746_v23, %s7813_s25  ;;  %805 = vrot.lane.b32.xlu0 %v11596_v2, %s7813_s25  ;;  %v748_v29 = vmax.f32 %v8603_v10, 0.0  ;;  %v8630_v35 = vld [vmem:[%s11582_s3 + $0x38] sm:$0xff]  ;;  %v734_v50 = vpop.f32.mrf.mxu1  ;;  %v3494_v2 = vld [vmem:[%s11586_s7 + $0xb0] sm:$0xff] }
 0x12e   : > { %v607_v25 = vpop.f32.mrf.mxu0  ;;  %6813 = vmatprep.subr.mxu1 %v8630_v35 }
 0x12f   : > { %11630 = vst [vmem:[#allocation14_spill] sm:$0xff] %v8607_v24  ;;  %v11597_v28 = vmax.f32 %v8607_v24, 0.0  ;;  %v608_v30 = vadd.f32 %v607_v25, %v8474_v36  ;;  %v717_v31 = vadd.f32 %v8527_v42, %v604_v18  ;;  %v738_v63 = vpop.f32.mrf.mxu1 }
 0x130   : > { %v609_v32 = vpop.f32.mrf.mxu0 }
 0x131   : > { %v610_v33 = vadd.f32 %v609_v32, %v8519_v38  ;;  %v8621_v34 = vadd.f32 %v8545_v52, %v608_v30  ;;  %807 = vrot.lane.b32.xlu1 %v748_v29, %s7813_s25  ;;  %809 = vrot.lane.b32.xlu0 %v11597_v28, %s7813_s25  ;;  %v750_v40 = vmax.f32 %v717_v31, 0.0  ;;  %v740_v3 = vpop.f32.mrf.mxu1  ;;  %v3480_v28 = vld [vmem:[%s11586_s7 + $0x40] sm:$0xff] }
 0x132   : > { %v613_v37 = vpop.f32.mrf.mxu0 }
 0x133   : > { %11631 = vst [vmem:[#allocation15_spill] sm:$0xff] %v8621_v34  ;;  %v11594_v41 = vmax.f32 %v8621_v34, 0.0  ;;  %v614_v42 = vadd.f32 %v613_v37, %v8474_v36  ;;  %v723_v43 = vadd.f32 %v722_v7, %v610_v33 }
 0x134   : > { %v615_v45 = vpop.f32.mrf.mxu0 }
 0x135   : > { %v616_v46 = vadd.f32 %v615_v45, %v8519_v38  ;;  %v8642_v48 = vadd.f32 %v726_v22, %v614_v42  ;;  %811 = vrot.lane.b32.xlu1 %v750_v40, %s7813_s25  ;;  %813 = vrot.lane.b32.xlu0 %v11594_v41, %s7813_s25  ;;  %v752_v51 = vmax.f32 %v723_v43, 0.0  ;;  %v881_v43 = vld [vmem:[%s11582_s3 + $0x30] sm:$0xff] }
 0x136   : > { %v619_v49 = vpop.f32.mrf.mxu0  ;;  %v913_v45 = vld [vmem:[%s11582_s3 + $0x130] sm:$0xff] }
 0x137   : > { %11632 = vst [vmem:[#allocation16_spill] sm:$0xff] %v8642_v48  ;;  %v11595_v52 = vmax.f32 %v8642_v48, 0.0  ;;  %v620_v55 = vadd.f32 %v619_v49, %v8474_v36  ;;  %v729_v56 = vadd.f32 %v728_v26, %v616_v46  ;;  %v3476_v48 = vld [vmem:[%s11586_s7 + $0x20] sm:$0xff] }
 0x138   : > { %v621_v57 = vpop.f32.mrf.mxu0 }
 0x139   : > { %v622_v59 = vadd.f32 %v621_v57, %v8519_v38  ;;  %v8651_v60 = vadd.f32 %v732_v39, %v620_v55  ;;  %815 = vrot.lane.b32.xlu1 %v752_v51, %s7813_s25  ;;  %817 = vrot.lane.b32.xlu0 %v11595_v52, %s7813_s25  ;;  %v754_v1 = vmax.f32 %v729_v56, 0.0 }
 0x13a   : > { %v625_v61 = vpop.f32.mrf.mxu0 }
 0x13b   : > { %11633 = vst [vmem:[#allocation17_spill] sm:$0xff] %v8651_v60  ;;  %v11592_v5 = vmax.f32 %v8651_v60, 0.0  ;;  %v626_v6 = vadd.f32 %v625_v61, %v8474_v36  ;;  %v735_v62 = vadd.f32 %v734_v50, %v622_v59  ;;  %v8684_v36 = vld [vmem:[#allocation2 + $0x90] sm:$0xff]  ;;  %v880_v59 = vld [vmem:[%s11582_s3 + $0x28] sm:$0xff] }
 0x13c   : > { %v627_v7 = vpop.f32.mrf.mxu0  ;;  %v912_v61 = vld [vmem:[%s11582_s3 + $0x128] sm:$0xff] }
 0x13d   : > { %v8659_v8 = vadd.f32 %v738_v63, %v626_v6  ;;  %819 = vrot.lane.b32.xlu1 %v754_v1, %s7813_s25  ;;  %821 = vrot.lane.b32.xlu0 %v11592_v5, %s7813_s25  ;;  %v628_v14 = vadd.f32 %v627_v7, %v8519_v38  ;;  %v756_v15 = vmax.f32 %v735_v62, 0.0  ;;  %v8686_v38 = vld [vmem:[#allocation4 + $0xb0] sm:$0xff]  ;;  %v3477_v60 = vld [vmem:[%s11586_s7 + $0x28] sm:$0xff] }
 0x13e   : > { %2131 = vst.msk [vmem:[#allocation2 + $0x90] sm:$0xff] %vm759_vm0, %v8686_v38  ;;  %v3482_v5 = vld [vmem:[%s11586_s7 + $0x50] sm:$0xff] }
 0x13f   : > { %11634 = vst [vmem:[#allocation18_spill] sm:$0xff] %v8659_v8  ;;  %v11593_v4 = vmax.f32 %v8659_v8, 0.0  ;;  %v741_v16 = vadd.f32 %v740_v3, %v628_v14  ;;  %2132 = vst.msk [vmem:[#allocation2 + $0x98] sm:$0x3] %vm761_vm1, %v8686_v38  ;;  %v911_v14 = vld [vmem:[%s11582_s3 + $0x120] sm:$0xff] }
 0x141   : > { %v758_v19 = vmax.f32 %v741_v16, 0.0  ;;  %823 = vrot.lane.b32.xlu1 %v756_v15, %s7813_s25  ;;  %825 = vrot.lane.b32.xlu0 %v11593_v4, %s7813_s25  ;;  %v3495_v4 = vld [vmem:[%s11586_s7 + $0xb8] sm:$0xff] }
 0x145   : > { %827 = vrot.lane.b32.xlu1 %v758_v19, %s7813_s25  ;;  %2133 = vrot.lane.b32.xlu0 %v744_v12, %s7814_s16 }
 0x149   : > { %2135 = vrot.lane.b32.xlu1 %v746_v23, %s7814_s16  ;;  %2137 = vrot.lane.b32.xlu0 %v748_v29, %s7814_s16 }
 0x14d   : > { %2139 = vrot.lane.b32.xlu1 %v750_v40, %s7814_s16  ;;  %2141 = vrot.lane.b32.xlu0 %v752_v51, %s7814_s16 }
 0x151   : > { %2143 = vrot.lane.b32.xlu1 %v754_v1, %s7814_s16  ;;  %2145 = vrot.lane.b32.xlu0 %v756_v15, %s7814_s16 }
 0x155   : > { %2147 = vrot.lane.b32.xlu1 %v758_v19, %s7814_s16 }
 0x197   : > { %v798_v12 = vpop.permute.xlu0 %797 }
 0x19b   : > { %v802_v11 = vpop.permute.xlu1 %801  ;;  %v800_v21 = vpop.permute.xlu0 %799 }
 0x19c   : > { %v830_v22 = vsel %vm829_vm4, %v798_v12, %v800_v21 }
 0x19d   : > { %847 = vst.msk [vmem:[#allocation2 + $0x11] sm:$0xff] %vm759_vm0, %v830_v22 }
 0x19f   : > { %v804_v23 = vpop.permute.xlu1 %803  ;;  %v806_v9 = vpop.permute.xlu0 %805 }
 0x1a0   : > { %v831_v10 = vsel %vm829_vm4, %v802_v11, %v804_v23 }
 0x1a1   : > { %848 = vst.msk [vmem:[#allocation2 + $0x21] sm:$0xff] %vm759_vm0, %v831_v10  ;;  %v910_v10 = vld [vmem:[%s11582_s3 + $0x118] sm:$0xff] }
 0x1a3   : > { %v808_v17 = vpop.permute.xlu1 %807  ;;  %v810_v18 = vpop.permute.xlu0 %809 }
 0x1a4   : > { %v832_v25 = vsel %vm829_vm4, %v806_v9, %v808_v17  ;;  %v8699_v26 = vld [vmem:[#allocation2 + $0x10] sm:$0xff]  ;;  %v858_v29 = vld [vmem:[#allocation2 + $0x18] sm:$0x3] }
 0x1a5   : > { %849 = vst.msk [vmem:[#allocation2 + $0x31] sm:$0xff] %vm759_vm0, %v832_v25  ;;  %v967_v30 = vrot.slane %v8699_v26, 1  ;;  %v968_v31 = vrot.slane %v858_v29, 1  ;;  %2115 = vst.msk [vmem:[#allocation2 + $0x10] sm:$0xff] %vm759_vm0, %v8686_v38  ;;  %v1234_v32 = vrot.slane %v8699_v26, 2  ;;  %v1235_v33 = vrot.slane %v858_v29, 2 }
 0x1a6   : > { %2116 = vst.msk [vmem:[#allocation2 + $0x18] sm:$0x3] %vm761_vm1, %v8686_v38  ;;  %v878_v9 = vld [vmem:[%s11582_s3 + $0x18] sm:$0xff] }
 0x1a7   : > { %v812_v37 = vpop.permute.xlu1 %811  ;;  %v814_v39 = vpop.permute.xlu0 %813  ;;  %v8709_v40 = vsel %vm963_vm2, %v967_v30, %v968_v31  ;;  %v8712_v42 = vsel %vm1230_vm3, %v1234_v32, %v1235_v33  ;;  %v877_v33 = vld [vmem:[%s11582_s3 + $0x10] sm:$0xff] }
 0x1a8   : > { %v833_v46 = vsel %vm829_vm4, %v810_v18, %v812_v37  ;;  %6802 = vmatmul.mubr.msk.f32.vlgmr.msra.gmra.mxu1 %vm759_vm0, %v8709_v40  ;;  %6858 = vmatmul.mubr.msk.f32.vlgmr.msra.gmra.mxu0 %vm759_vm0, %v8712_v42  ;;  %v8725_v49 = vld [vmem:[#allocation2 + $0x20] sm:$0xff]  ;;  %v860_v50 = vld [vmem:[#allocation2 + $0x28] sm:$0x3]  ;;  %v909_v37 = vld [vmem:[%s11582_s3 + $0x110] sm:$0xff] }
 0x1a9   : > { %850 = vst.msk [vmem:[#allocation2 + $0x41] sm:$0xff] %vm759_vm0, %v833_v46  ;;  %v970_v51 = vrot.slane %v8725_v49, 1  ;;  %v971_v55 = vrot.slane %v860_v50, 1  ;;  %2117 = vst.msk [vmem:[#allocation2 + $0x20] sm:$0xff] %vm759_vm0, %v8686_v38  ;;  %v1237_v56 = vrot.slane %v8725_v49, 2  ;;  %v1238_v57 = vrot.slane %v860_v50, 2  ;;  %6814 = vmatpush3.msra.mxu1 %v8630_v35  ;;  %6898 = vmatpush3.msra.mxu0 %v8638_v44 }
 0x1aa   : > { %2118 = vst.msk [vmem:[#allocation2 + $0x28] sm:$0x3] %vm761_vm1, %v8686_v38  ;;  %6815 = vmatprep.subr.mxu1 %v881_v43  ;;  %6899 = vmatprep.subr.mxu0 %v913_v45  ;;  %v879_v35 = vld [vmem:[%s11582_s3 + $0x20] sm:$0xff]  ;;  %v876_v50 = vld [vmem:[%s11582_s3 + $0x8] sm:$0xff] }
 0x1ab   : > { %v816_v63 = vpop.permute.xlu1 %815  ;;  %v818_v1 = vpop.permute.xlu0 %817  ;;  %v8743_v6 = vsel %vm963_vm2, %v970_v51, %v971_v55  ;;  %v8746_v62 = vsel %vm1230_vm3, %v1237_v56, %v1238_v57  ;;  %6816 = vmatpush3.msra.mxu1 %v881_v43  ;;  %6900 = vmatpush3.msra.mxu0 %v913_v45  ;;  %v908_v57 = vld [vmem:[%s11582_s3 + $0x108] sm:$0xff] }
 0x1ac   : > { %v834_v44 = vsel %vm829_vm4, %v814_v39, %v816_v63  ;;  %6804 = vmatprep.mubr.msk.f32.mxu1 %vm759_vm0, %v8743_v6  ;;  %6860 = vmatprep.mubr.msk.f32.mxu0 %vm759_vm0, %v8746_v62  ;;  %v8756_v7 = vld [vmem:[#allocation2 + $0x30] sm:$0xff]  ;;  %v862_v3 = vld [vmem:[#allocation2 + $0x38] sm:$0x3] }
 0x1ad   : > { %851 = vst.msk [vmem:[#allocation2 + $0x51] sm:$0xff] %vm759_vm0, %v834_v44  ;;  %v973_v15 = vrot.slane %v8756_v7, 1  ;;  %v974_v16 = vrot.slane %v862_v3, 1  ;;  %2119 = vst.msk [vmem:[#allocation2 + $0x30] sm:$0xff] %vm759_vm0, %v8686_v38  ;;  %v1240_v19 = vrot.slane %v8756_v7, 2  ;;  %v1241_v12 = vrot.slane %v862_v3, 2  ;;  %6817 = vmatprep.subr.mxu1 %v880_v59  ;;  %6901 = vmatprep.subr.mxu0 %v912_v61 }
 0x1ae   : > { %2120 = vst.msk [vmem:[#allocation2 + $0x38] sm:$0x3] %vm761_vm1, %v8686_v38  ;;  %6818 = vmatpush3.msra.mxu1 %v880_v59  ;;  %6902 = vmatpush3.msra.mxu0 %v912_v61 }
 0x1af   : > { %v820_v11 = vpop.permute.xlu1 %819  ;;  %v822_v21 = vpop.permute.xlu0 %821  ;;  %v8769_v22 = vsel %vm963_vm2, %v973_v15, %v974_v16  ;;  %v8772_v23 = vsel %vm1230_vm3, %v1240_v19, %v1241_v12  ;;  %6819 = vmatprep.subr.mxu1 %v879_v35  ;;  %6903 = vmatprep.subr.mxu0 %v911_v14  ;;  %v875_v15 = vld [vmem:[%s11582_s3] sm:$0xff] }
 0x1b0   : > { %v835_v17 = vsel %vm829_vm4, %v818_v1, %v820_v11  ;;  %6805 = vmatmul.mubr.msk.f32.gmra.mxu1 %vm759_vm0, %v8769_v22  ;;  %6861 = vmatmul.mubr.msk.f32.gmra.mxu0 %vm759_vm0, %v8772_v23  ;;  %v8785_v18 = vld [vmem:[#allocation2 + $0x40] sm:$0xff]  ;;  %v864_v25 = vld [vmem:[#allocation2 + $0x48] sm:$0x3] }
 0x1b1   : > { %852 = vst.msk [vmem:[#allocation2 + $0x61] sm:$0xff] %vm759_vm0, %v835_v17  ;;  %v976_v29 = vrot.slane %v8785_v18, 1  ;;  %v977_v30 = vrot.slane %v864_v25, 1  ;;  %2121 = vst.msk [vmem:[#allocation2 + $0x40] sm:$0xff] %vm759_vm0, %v8686_v38  ;;  %v1243_v31 = vrot.slane %v8785_v18, 2  ;;  %v1244_v32 = vrot.slane %v864_v25, 2  ;;  %6820 = vmatpush3.msra.mxu1 %v879_v35  ;;  %6904 = vmatpush3.msra.mxu0 %v911_v14 }
 0x1b2   : > { %2122 = vst.msk [vmem:[#allocation2 + $0x48] sm:$0x3] %vm761_vm1, %v8686_v38  ;;  %6821 = vmatprep.subr.mxu1 %v878_v9  ;;  %6905 = vmatprep.subr.mxu0 %v910_v10  ;;  %v907_v16 = vld [vmem:[%s11582_s3 + $0x100] sm:$0xff]  ;;  %v906_v25 = vld [vmem:[%s11582_s3 + $0xf8] sm:$0xff] }
 0x1b3   : > { %v824_v39 = vpop.permute.xlu1 %823  ;;  %v826_v43 = vpop.permute.xlu0 %825  ;;  %v8801_v45 = vsel %vm963_vm2, %v976_v29, %v977_v30  ;;  %v8804_v46 = vsel %vm1230_vm3, %v1243_v31, %v1244_v32  ;;  %6822 = vmatpush3.msra.mxu1 %v878_v9  ;;  %6906 = vmatpush3.msra.mxu0 %v910_v10  ;;  %v930_v29 = vld [vmem:[%s11582_s3 + $0x1b8] sm:$0xff] }
 0x1b4   : > { %v836_v51 = vsel %vm829_vm4, %v822_v21, %v824_v39  ;;  %6807 = vmatprep.mubr.msk.f32.mxu1 %vm759_vm0, %v8801_v45  ;;  %6863 = vmatprep.mubr.msk.f32.mxu0 %vm759_vm0, %v8804_v46  ;;  %v8814_v55 = vld [vmem:[#allocation2 + $0x50] sm:$0xff]  ;;  %v866_v56 = vld [vmem:[#allocation2 + $0x58] sm:$0x3] }
 0x1b5   : > { %853 = vst.msk [vmem:[#allocation2 + $0x71] sm:$0xff] %vm759_vm0, %v836_v51  ;;  %v979_v59 = vrot.slane %v8814_v55, 1  ;;  %v980_v61 = vrot.slane %v866_v56, 1  ;;  %2123 = vst.msk [vmem:[#allocation2 + $0x50] sm:$0xff] %vm759_vm0, %v8686_v38  ;;  %v1246_v63 = vrot.slane %v8814_v55, 2  ;;  %v1247_v1 = vrot.slane %v866_v56, 2  ;;  %6823 = vmatprep.subr.mxu1 %v877_v33  ;;  %6907 = vmatprep.subr.mxu0 %v909_v37 }
 0x1b6   : > { %2124 = vst.msk [vmem:[#allocation2 + $0x58] sm:$0x3] %vm761_vm1, %v8686_v38  ;;  %6824 = vmatpush3.msra.mxu1 %v877_v33  ;;  %6908 = vmatpush3.msra.mxu0 %v909_v37 }
 0x1b7   : > { %v828_v35 = vpop.permute.xlu1 %827  ;;  %v2134_v44 = vpop.permute.xlu0 %2133  ;;  %v8827_v3 = vsel %vm963_vm2, %v979_v59, %v980_v61  ;;  %v8830_v14 = vsel %vm1230_vm3, %v1246_v63, %v1247_v1  ;;  %6825 = vmatprep.subr.mxu1 %v876_v50  ;;  %6909 = vmatprep.subr.mxu0 %v908_v57 }
 0x1b8   : > { %v837_v19 = vsel %vm829_vm4, %v826_v43, %v828_v35  ;;  %2157 = vst.msk [vmem:[#allocation2 + $0x11] sm:$0xff] %vm759_vm0, %v2134_v44  ;;  %6808 = vmatmul.mubr.msk.f32.gmra.mxu1 %vm759_vm0, %v8827_v3  ;;  %6864 = vmatmul.mubr.msk.f32.gmra.mxu0 %vm759_vm0, %v8830_v14  ;;  %v8844_v12 = vld [vmem:[#allocation2 + $0x60] sm:$0xff]  ;;  %v868_v11 = vld [vmem:[#allocation2 + $0x68] sm:$0x3] }
 0x1b9   : > { %854 = vst.msk [vmem:[#allocation2 + $0x81] sm:$0xff] %vm759_vm0, %v837_v19  ;;  %v982_v21 = vrot.slane %v8844_v12, 1  ;;  %v983_v9 = vrot.slane %v868_v11, 1  ;;  %2125 = vst.msk [vmem:[#allocation2 + $0x60] sm:$0xff] %vm759_vm0, %v8686_v38  ;;  %v1249_v10 = vrot.slane %v8844_v12, 2  ;;  %v1250_v17 = vrot.slane %v868_v11, 2  ;;  %6826 = vmatpush3.msra.mxu1 %v876_v50  ;;  %6910 = vmatpush3.msra.mxu0 %v908_v57 }
 0x1ba   : > { %2126 = vst.msk [vmem:[#allocation2 + $0x68] sm:$0x3] %vm761_vm1, %v8686_v38  ;;  %6827 = vmatprep.subr.mxu1 %v875_v15  ;;  %6911 = vmatprep.subr.mxu0 %v907_v16  ;;  %v928_v19 = vld [vmem:[%s11582_s3 + $0x1a8] sm:$0xff]  ;;  %v903_v11 = vld [vmem:[%s11582_s3 + $0xe0] sm:$0xff] }
 0x1bb   : > { %v2136_v30 = vpop.permute.xlu1 %2135  ;;  %v2138_v31 = vpop.permute.xlu0 %2137  ;;  %v8860_v32 = vsel %vm963_vm2, %v982_v21, %v983_v9  ;;  %v8863_v33 = vsel %vm1230_vm3, %v1249_v10, %v1250_v17  ;;  %6828 = vmatpush3.msra.mxu1 %v875_v15  ;;  %6912 = vmatpush3.msra.mxu0 %v907_v16  ;;  %v905_v16 = vld [vmem:[%s11582_s3 + $0xf0] sm:$0xff]  ;;  %v927_v21 = vld [vmem:[%s11582_s3 + $0x1a0] sm:$0xff]  ;;  %v902_v9 = vld [vmem:[%s11582_s3 + $0xd8] sm:$0xff] }
 0x1bc   : > { %2158 = vst.msk [vmem:[#allocation2 + $0x21] sm:$0xff] %vm759_vm0, %v2136_v30  ;;  %2159 = vst.msk [vmem:[#allocation2 + $0x31] sm:$0xff] %vm759_vm0, %v2138_v31  ;;  %6810 = vmatprep.mubr.msk.f32.mxu1 %vm759_vm0, %v8860_v32  ;;  %6866 = vmatprep.mubr.msk.f32.mxu0 %vm759_vm0, %v8863_v33  ;;  %v8871_v37 = vld [vmem:[#allocation2 + $0x70] sm:$0xff]  ;;  %v870_v39 = vld [vmem:[#allocation2 + $0x78] sm:$0x3] }
 0x1bd   : > { %v985_v43 = vrot.slane %v8871_v37, 1  ;;  %v986_v50 = vrot.slane %v870_v39, 1  ;;  %2127 = vst.msk [vmem:[#allocation2 + $0x70] sm:$0xff] %vm759_vm0, %v8686_v38  ;;  %v1252_v51 = vrot.slane %v8871_v37, 2  ;;  %v1253_v56 = vrot.slane %v870_v39, 2  ;;  %6869 = vmatprep.subr.mxu1 %v906_v25  ;;  %6953 = vmatprep.subr.mxu0 %v930_v29  ;;  %v926_v10 = vld [vmem:[%s11582_s3 + $0x198] sm:$0xff] }
 0x1be   : > { %2128 = vst.msk [vmem:[#allocation2 + $0x78] sm:$0x3] %vm761_vm1, %v8686_v38  ;;  %v901_v17 = vld [vmem:[%s11582_s3 + $0xd0] sm:$0xff]  ;;  %v900_v31 = vld [vmem:[%s11582_s3 + $0xc8] sm:$0xff] }
 0x1bf   : > { %v2140_v57 = vpop.permute.xlu1 %2139  ;;  %v2142_v59 = vpop.permute.xlu0 %2141  ;;  %v8880_v61 = vsel %vm963_vm2, %v985_v43, %v986_v50  ;;  %v8883_v63 = vsel %vm1230_vm3, %v1252_v51, %v1253_v56  ;;  %v925_v30 = vld [vmem:[%s11582_s3 + $0x190] sm:$0xff]  ;;  %v924_v43 = vld [vmem:[%s11582_s3 + $0x188] sm:$0xff]  ;;  %v899_v50 = vld [vmem:[%s11582_s3 + $0xc0] sm:$0xff] }
 0x1c0   : > { %2160 = vst.msk [vmem:[#allocation2 + $0x41] sm:$0xff] %vm759_vm0, %v2140_v57  ;;  %2161 = vst.msk [vmem:[#allocation2 + $0x51] sm:$0xff] %vm759_vm0, %v2142_v59  ;;  %6811 = vmatmul.mubr.msk.f32.gmra.mxu1 %vm759_vm0, %v8880_v61  ;;  %6867 = vmatmul.mubr.msk.f32.gmra.mxu0 %vm759_vm0, %v8883_v63  ;;  %v8891_v1 = vld [vmem:[#allocation2 + $0x80] sm:$0xff]  ;;  %v8893_v35 = vld [vmem:[#allocation2 + $0x88] sm:$0x3] }
 0x1c1   : > { %6913 = vmatprep.mubr.msk.f32.mxu0 %vm759_vm0, %v8709_v40  ;;  %6829 = vmatprep.mubr.msk.f32.mxu1 %vm759_vm0, %v8558_v58  ;;  %2129 = vst.msk [vmem:[#allocation2 + $0x80] sm:$0xff] %vm759_vm0, %v8686_v38  ;;  %v929_v58 = vld [vmem:[%s11582_s3 + $0x1b0] sm:$0xff]  ;;  %v923_v51 = vld [vmem:[%s11582_s3 + $0x180] sm:$0xff]  ;;  %v922_v56 = vld [vmem:[%s11582_s3 + $0x178] sm:$0xff] }
 0x1c2   : > { %2130 = vst.msk [vmem:[#allocation2 + $0x88] sm:$0x3] %vm761_vm1, %v8686_v38  ;;  %v904_v38 = vld [vmem:[%s11582_s3 + $0xe8] sm:$0xff]  ;;  %v946_v57 = vld [vmem:[%s11582_s3 + $0x238] sm:$0xff]  ;;  %v921_v59 = vld [vmem:[%s11582_s3 + $0x170] sm:$0xff] }
 0x1c3   : > { %v2144_v44 = vpop.permute.xlu1 %2143  ;;  %v2146_v15 = vpop.permute.xlu0 %2145 }
 0x1c4   : > { %2162 = vst.msk [vmem:[#allocation2 + $0x61] sm:$0xff] %vm759_vm0, %v2144_v44  ;;  %2163 = vst.msk [vmem:[#allocation2 + $0x71] sm:$0xff] %vm759_vm0, %v2146_v15  ;;  %6830 = vmatmul.mubr.msk.f32.vlgmr.msra.gmra.mxu1 %vm759_vm0, %v8699_v26  ;;  %6914 = vmatmul.mubr.msk.f32.vlgmr.msra.gmra.mxu0 %vm759_vm0, %v8743_v6  ;;  %v919_v44 = vld [vmem:[%s11582_s3 + $0x160] sm:$0xff] }
 0x1c5   : > { %6870 = vmatpush3.msra.mxu1 %v906_v25  ;;  %6832 = vmatprep.mubr.msk.f32.mxu1 %vm759_vm0, %v8725_v49  ;;  %v1501_v25 = vrot.slane %v8891_v1, 1  ;;  %v943_v15 = vld [vmem:[%s11582_s3 + $0x220] sm:$0xff] }
 0x1c6   : > { %6871 = vmatprep.subr.mxu1 %v905_v16  ;;  %6916 = vmatprep.mubr.msk.f32.mxu0 %vm759_vm0, %v8769_v22 }
 0x1c7   : > { %6954 = vmatpush3.msra.mxu0 %v930_v29  ;;  %6872 = vmatpush3.msra.mxu1 %v905_v16  ;;  %v2148_v40 = vpop.permute.xlu1 %2147  ;;  %v1502_v29 = vrot.slane %v8893_v35, 1  ;;  %v917_v16 = vld [vmem:[%s11582_s3 + $0x150] sm:$0xff] }
 0x1c8   : > { %6955 = vmatprep.subr.mxu0 %v929_v58  ;;  %6873 = vmatprep.subr.mxu1 %v904_v38  ;;  %2164 = vst.msk [vmem:[#allocation2 + $0x81] sm:$0xff] %vm759_vm0, %v2148_v40  ;;  %v939_v40 = vld [vmem:[%s11582_s3 + $0x200] sm:$0xff] }
 0x1c9   : > { %6956 = vmatpush3.msra.mxu0 %v929_v58  ;;  %6833 = vmatmul.mubr.msk.f32.gmra.mxu1 %vm759_vm0, %v8756_v7  ;;  %v8966_v39 = vsel %vm963_vm2, %v1501_v25, %v1502_v29  ;;  %v941_v58 = vld [vmem:[%s11582_s3 + $0x210] sm:$0xff]  ;;  %v1620_v25 = vrot.slane %v8893_v35, 2  ;;  %v1972_v29 = vrot.slane %v8684_v36, 2 }
 0x1ca   : > { %6874 = vmatpush3.msra.mxu1 %v904_v38  ;;  %6917 = vmatmul.mubr.msk.f32.gmra.mxu0 %vm759_vm0, %v8801_v45  ;;  %v915_v38 = vld [vmem:[%s11582_s3 + $0x140] sm:$0xff] }
 0x1cb   : > { %6957 = vmatprep.subr.mxu0 %v928_v19  ;;  %6835 = vmatprep.mubr.msk.f32.mxu1 %vm759_vm0, %v8785_v18 }
 0x1cc   : > { %6875 = vmatprep.subr.mxu1 %v903_v11  ;;  %6919 = vmatprep.mubr.msk.f32.mxu0 %vm759_vm0, %v8827_v3 }
 0x1cd   : > { %6958 = vmatpush3.msra.mxu0 %v928_v19  ;;  %6876 = vmatpush3.msra.mxu1 %v903_v11  ;;  %v938_v19 = vld [vmem:[%s11582_s3 + $0x1f8] sm:$0xff] }
 0x1ce   : > { %6959 = vmatprep.subr.mxu0 %v927_v21  ;;  %6877 = vmatprep.subr.mxu1 %v902_v9  ;;  %v2192_v11 = vld [vmem:[%s11584_s5 + $0x38] sm:$0xff] }
 0x1cf   : > { %6960 = vmatpush3.msra.mxu0 %v927_v21  ;;  %6836 = vmatmul.mubr.msk.f32.gmra.mxu1 %vm759_vm0, %v8814_v55  ;;  %v937_v21 = vld [vmem:[%s11582_s3 + $0x1f0] sm:$0xff] }
 0x1d0   : > { %6878 = vmatpush3.msra.mxu1 %v902_v9  ;;  %6920 = vmatmul.mubr.msk.f32.gmra.mxu0 %vm759_vm0, %v8860_v32  ;;  %v935_v9 = vld [vmem:[%s11582_s3 + $0x1e0] sm:$0xff] }
 0x1d1   : > { %6961 = vmatprep.subr.mxu0 %v926_v10  ;;  %6838 = vmatprep.mubr.msk.f32.mxu1 %vm759_vm0, %v8844_v12 }
 0x1d2   : > { %6879 = vmatprep.subr.mxu1 %v901_v17  ;;  %6922 = vmatprep.mubr.msk.f32.mxu0 %vm759_vm0, %v8880_v61 }
 0x1d3   : > { %6962 = vmatpush3.msra.mxu0 %v926_v10  ;;  %6880 = vmatpush3.msra.mxu1 %v901_v17  ;;  %v2189_v10 = vld [vmem:[%s11584_s5 + $0x20] sm:$0xff]  ;;  %v1619_v17 = vrot.slane %v8891_v1, 2 }
 0x1d4   : > { %6963 = vmatprep.subr.mxu0 %v925_v30  ;;  %6881 = vmatprep.subr.mxu1 %v900_v31 }
 0x1d5   : > { %6964 = vmatpush3.msra.mxu0 %v925_v30  ;;  %6839 = vmatmul.mubr.msk.f32.gmra.mxu1 %vm759_vm0, %v8871_v37  ;;  %v933_v30 = vld [vmem:[%s11582_s3 + $0x1d0] sm:$0xff]  ;;  %v1621_v35 = vsel %vm1230_vm3, %v1619_v17, %v1620_v25  ;;  %v2208_v25 = vld [vmem:[%s11584_s5 + $0xb8] sm:$0xff] }
 0x1d6   : > { %6882 = vmatpush3.msra.mxu1 %v900_v31  ;;  %6923 = vmatmul.mubr.msk.f32.gmra.mxu0 %vm759_vm0, %v8966_v39  ;;  %v932_v31 = vld [vmem:[%s11582_s3 + $0x1c8] sm:$0xff] }
 0x1d7   : > { %6965 = vmatprep.subr.mxu0 %v924_v43  ;;  %6883 = vmatprep.subr.mxu1 %v899_v50 }
 0x1d8   : > { %6885 = vmatprep.mubr.msk.f32.mxu1 %vm759_vm0, %v8699_v26  ;;  %6966 = vmatpush3.msra.mxu0 %v924_v43  ;;  %v945_v26 = vld [vmem:[%s11582_s3 + $0x230] sm:$0xff] }
 0x1d9   : > { %6969 = vmatprep.mubr.msk.f32.mxu0 %vm759_vm0, %v8725_v49  ;;  %6884 = vmatpush3.msra.mxu1 %v899_v50  ;;  %v931_v50 = vld [vmem:[%s11582_s3 + $0x1c0] sm:$0xff] }
 0x1da   : > { %6967 = vmatprep.subr.mxu0 %v923_v51  ;;  %6925 = vmatprep.subr.mxu1 %v922_v56 }
 0x1db   : > { %6968 = vmatpush3.msra.mxu0 %v923_v51  ;;  %6886 = vmatmul.mubr.msk.f32.vlgmr.msra.gmra.mxu1 %vm759_vm0, %v8725_v49  ;;  %v920_v49 = vld [vmem:[%s11582_s3 + $0x168] sm:$0xff]  ;;  %v2185_v51 = vld [vmem:[%s11584_s5] sm:$0xff] }
 0x1dc   : > { %6926 = vmatpush3.msra.mxu1 %v922_v56  ;;  %6970 = vmatmul.mubr.msk.f32.vlgmr.msra.gmra.mxu0 %vm759_vm0, %v8756_v7  ;;  %v2200_v56 = vld [vmem:[%s11584_s5 + $0x78] sm:$0xff] }
 0x1dd   : > { %7009 = vmatprep.subr.mxu0 %v946_v57  ;;  %6888 = vmatprep.mubr.msk.f32.mxu1 %vm759_vm0, %v8756_v7  ;;  %v944_v7 = vld [vmem:[%s11582_s3 + $0x228] sm:$0xff] }
 0x1de   : > { %6927 = vmatprep.subr.mxu1 %v921_v59  ;;  %6972 = vmatprep.mubr.msk.f32.mxu0 %vm759_vm0, %v8785_v18 }
 0x1df   : > { %7010 = vmatpush3.msra.mxu0 %v946_v57  ;;  %6928 = vmatpush3.msra.mxu1 %v921_v59  ;;  %v9149_v57 = vld [vmem:[#allocation2] sm:$0xff]  ;;  %v2216_v59 = vld [vmem:[%s11584_s5 + $0xf8] sm:$0xff] }
 0x1e0   : > { %7011 = vmatprep.subr.mxu0 %v945_v26  ;;  %6929 = vmatprep.subr.mxu1 %v920_v49 }
 0x1e1   : > { %7012 = vmatpush3.msra.mxu0 %v945_v26  ;;  %6889 = vmatmul.mubr.msk.f32.gmra.mxu1 %vm759_vm0, %v8785_v18  ;;  %v918_v18 = vld [vmem:[%s11582_s3 + $0x158] sm:$0xff]  ;;  %v9158_v26 = vld [vmem:[#allocation2 + $0x10] sm:$0xff] }
 0x1e2   : > { %6930 = vmatpush3.msra.mxu1 %v920_v49  ;;  %6973 = vmatmul.mubr.msk.f32.gmra.mxu0 %vm759_vm0, %v8814_v55  ;;  %v9167_v49 = vld [vmem:[#allocation2 + $0x20] sm:$0xff] }
 0x1e3   : > { %7013 = vmatprep.subr.mxu0 %v944_v7  ;;  %6891 = vmatprep.mubr.msk.f32.mxu1 %vm759_vm0, %v8814_v55  ;;  %v942_v55 = vld [vmem:[%s11582_s3 + $0x218] sm:$0xff] }
 0x1e4   : > { %6931 = vmatprep.subr.mxu1 %v919_v44  ;;  %6975 = vmatprep.mubr.msk.f32.mxu0 %vm759_vm0, %v8844_v12 }
 0x1e5   : > { %7014 = vmatpush3.msra.mxu0 %v944_v7  ;;  %6932 = vmatpush3.msra.mxu1 %v919_v44  ;;  %v2198_v7 = vld [vmem:[%s11584_s5 + $0x68] sm:$0xff]  ;;  %v9182_v44 = vld [vmem:[#allocation2 + $0x30] sm:$0xff] }
 0x1e6   : > { %7015 = vmatprep.subr.mxu0 %v943_v15  ;;  %6933 = vmatprep.subr.mxu1 %v918_v18 }
 0x1e7   : > { %7016 = vmatpush3.msra.mxu0 %v943_v15  ;;  %6892 = vmatmul.mubr.msk.f32.gmra.mxu1 %vm759_vm0, %v8844_v12  ;;  %v916_v12 = vld [vmem:[%s11582_s3 + $0x148] sm:$0xff]  ;;  %v2197_v15 = vld [vmem:[%s11584_s5 + $0x60] sm:$0xff] }
 0x1e8   : > { %6934 = vmatpush3.msra.mxu1 %v918_v18  ;;  %6976 = vmatmul.mubr.msk.f32.gmra.mxu0 %vm759_vm0, %v8871_v37  ;;  %v9191_v18 = vld [vmem:[#allocation2 + $0x40] sm:$0xff] }
 0x1e9   : > { %7017 = vmatprep.subr.mxu0 %v942_v55  ;;  %6894 = vmatprep.mubr.msk.f32.mxu1 %vm759_vm0, %v8871_v37  ;;  %v940_v37 = vld [vmem:[%s11582_s3 + $0x208] sm:$0xff] }
 0x1ea   : > { %6935 = vmatprep.subr.mxu1 %v917_v16  ;;  %7018 = vmatpush3.msra.mxu0 %v942_v55  ;;  %v2196_v55 = vld [vmem:[%s11584_s5 + $0x58] sm:$0xff] }
 0x1eb   : > { %6936 = vmatpush3.msra.mxu1 %v917_v16  ;;  %6978 = vmatprep.mubr.msk.f32.mxu0 %vm759_vm0, %v8891_v1  ;;  %v1854_v16 = vrot.slane %v8684_v36, 1 }
 0x1ec   : > { %7019 = vmatprep.subr.mxu0 %v941_v58  ;;  %6937 = vmatprep.subr.mxu1 %v916_v12 }
 0x1ed   : > { %7020 = vmatpush3.msra.mxu0 %v941_v58  ;;  %6895 = vmatmul.mubr.msk.f32.gmra.mxu1 %vm759_vm0, %v8891_v1  ;;  %v1973_v1 = vrot.slane %v8690_v54, 2  ;;  %v1855_v58 = vrot.slane %v8690_v54, 1  ;;  %v9219_v54 = vld [vmem:[#allocation2 + $0x60] sm:$0xff] }
 0x1ee   : > { %6938 = vmatpush3.msra.mxu1 %v916_v12  ;;  %6979 = vmatmul.mubr.msk.f32.gmra.mxu0 %vm759_vm0, %v8684_v36  ;;  %v9208_v12 = vld [vmem:[#allocation2 + $0x50] sm:$0xff]  ;;  %v9215_v36 = vld [vmem:[#allocation2 + $0x8] sm:$0x3] }
 0x1ef   : > { %7021 = vmatprep.subr.mxu0 %v940_v37  ;;  %6939 = vmatprep.subr.mxu1 %v915_v38  ;;  %v1974_v43 = vsel %vm1230_vm3, %v1972_v29, %v1973_v1 }
 0x1f0   : > { %6941 = vmatprep.mubr.msk.f32.mxu1 %vm759_vm0, %v8712_v42  ;;  %7022 = vmatpush3.msra.mxu0 %v940_v37  ;;  %v2191_v42 = vld [vmem:[%s11584_s5 + $0x30] sm:$0xff] }
 0x1f1   : > { %7025 = vmatprep.mubr.msk.f32.mxu0 %vm759_vm0, %v8746_v62  ;;  %6940 = vmatpush3.msra.mxu1 %v915_v38  ;;  %v2195_v37 = vld [vmem:[%s11584_s5 + $0x50] sm:$0xff]  ;;  %v2194_v38 = vld [vmem:[%s11584_s5 + $0x48] sm:$0xff] }
 0x1f2   : > { %7023 = vmatprep.subr.mxu0 %v939_v40  ;;  %6981 = vmatprep.subr.mxu1 %v938_v19 }
 0x1f3   : > { %7024 = vmatpush3.msra.mxu0 %v939_v40  ;;  %6942 = vmatmul.mubr.msk.f32.vlgmr.msra.gmra.mxu1 %vm759_vm0, %v8746_v62  ;;  %v936_v62 = vld [vmem:[%s11582_s3 + $0x1e8] sm:$0xff]  ;;  %v1856_v40 = vsel %vm963_vm2, %v1854_v16, %v1855_v58  ;;  %v2288_v16 = vrot.slane %v9208_v12, 1  ;;  %v2229_v58 = vld [vmem:[%s11584_s5 + $0x160] sm:$0xff] }
 0x1f4   : > { %6982 = vmatpush3.msra.mxu1 %v938_v19  ;;  %7026 = vmatmul.mubr.msk.f32.vlgmr.msra.gmra.mxu0 %vm759_vm0, %v8772_v23  ;;  %v2273_v19 = vrot.slane %v9149_v57, 1 }
 0x1f5   : > { %7065 = vmatprep.subr.mxu0 %v2192_v11  ;;  %6944 = vmatprep.mubr.msk.f32.mxu1 %vm759_vm0, %v8772_v23  ;;  %v2190_v23 = vld [vmem:[%s11584_s5 + $0x28] sm:$0xff] }
 0x1f6   : > { %6983 = vmatprep.subr.mxu1 %v937_v21  ;;  %7028 = vmatprep.mubr.msk.f32.mxu0 %vm759_vm0, %v8804_v46 }
 0x1f7   : > { %7066 = vmatpush3.msra.mxu0 %v2192_v11  ;;  %6984 = vmatpush3.msra.mxu1 %v937_v21  ;;  %v9232_v11 = vld [vmem:[#allocation2 + $0x18] sm:$0x3]  ;;  %v2210_v21 = vld [vmem:[%s11584_s5 + $0xc8] sm:$0xff] }
 0x1f8   : > { %7067 = vmatprep.subr.mxu0 %v2191_v42  ;;  %6985 = vmatprep.subr.mxu1 %v936_v62 }
 0x1f9   : > { %7068 = vmatpush3.msra.mxu0 %v2191_v42  ;;  %6945 = vmatmul.mubr.msk.f32.gmra.mxu1 %vm759_vm0, %v8804_v46  ;;  %v934_v46 = vld [vmem:[%s11582_s3 + $0x1d8] sm:$0xff]  ;;  %v2193_v42 = vld [vmem:[%s11584_s5 + $0x40] sm:$0xff] }
 0x1fa   : > { %6986 = vmatpush3.msra.mxu1 %v936_v62  ;;  %7029 = vmatmul.mubr.msk.f32.gmra.mxu0 %vm759_vm0, %v8830_v14  ;;  %v9241_v62 = vld [vmem:[#allocation2 + $0x70] sm:$0xff] }
 0x1fb   : > { %7069 = vmatprep.subr.mxu0 %v2190_v23  ;;  %6947 = vmatprep.mubr.msk.f32.mxu1 %vm759_vm0, %v8830_v14  ;;  %v2188_v14 = vld [vmem:[%s11584_s5 + $0x18] sm:$0xff] }
 0x1fc   : > { %6987 = vmatprep.subr.mxu1 %v935_v9  ;;  %7031 = vmatprep.mubr.msk.f32.mxu0 %vm759_vm0, %v8863_v33 }
 0x1fd   : > { %7070 = vmatpush3.msra.mxu0 %v2190_v23  ;;  %6988 = vmatpush3.msra.mxu1 %v935_v9  ;;  %v9243_v23 = vld [vmem:[#allocation2 + $0x28] sm:$0x3]  ;;  %v2276_v9 = vrot.slane %v9158_v26, 1 }
 0x1fe   : > { %7071 = vmatprep.subr.mxu0 %v2189_v10  ;;  %6989 = vmatprep.subr.mxu1 %v934_v46  ;;  %v2280_v29 = vrot.slane %v9243_v23, 1 }
 0x1ff   : > { %7072 = vmatpush3.msra.mxu0 %v2189_v10  ;;  %6948 = vmatmul.mubr.msk.f32.gmra.mxu1 %vm759_vm0, %v8863_v33  ;;  %v2187_v33 = vld [vmem:[%s11584_s5 + $0x10] sm:$0xff]  ;;  %v2209_v10 = vld [vmem:[%s11584_s5 + $0xc0] sm:$0xff] }
 0x200   : > { %6990 = vmatpush3.msra.mxu1 %v934_v46  ;;  %7032 = vmatmul.mubr.msk.f32.gmra.mxu0 %vm759_vm0, %v8883_v63  ;;  %v2277_v46 = vrot.slane %v9232_v11, 1 }
 0x201   : > { %7073 = vmatprep.subr.mxu0 %v2188_v14  ;;  %6950 = vmatprep.mubr.msk.f32.mxu1 %vm759_vm0, %v8883_v63  ;;  %v2186_v63 = vld [vmem:[%s11584_s5 + $0x8] sm:$0xff] }
 0x202   : > { %6991 = vmatprep.subr.mxu1 %v933_v30  ;;  %7034 = vmatprep.mubr.msk.f32.mxu0 %vm759_vm0, %v1621_v35  ;;  %v9264_v1 = vsel %vm963_vm2, %v2276_v9, %v2277_v46  ;;  %v2294_v9 = vrot.slane %v9241_v62, 1  ;;  %v2227_v46 = vld [vmem:[%s11584_s5 + $0x150] sm:$0xff] }
 0x203   : > { %7074 = vmatpush3.msra.mxu0 %v2188_v14  ;;  %6992 = vmatpush3.msra.mxu1 %v933_v30  ;;  %v2279_v14 = vrot.slane %v9167_v49, 1  ;;  %v9260_v30 = vld [vmem:[#allocation2 + $0x38] sm:$0x3] }
 0x204   : > { %7075 = vmatprep.subr.mxu0 %v2187_v33  ;;  %6993 = vmatprep.subr.mxu1 %v932_v31 }
 0x205   : > { %7076 = vmatpush3.msra.mxu0 %v2187_v33  ;;  %6951 = vmatmul.mubr.msk.f32.gmra.mxu1 %vm759_vm0, %v1621_v35  ;;  %v2232_v35 = vld [vmem:[%s11584_s5 + $0x178] sm:$0xff]  ;;  %v2207_v33 = vld [vmem:[%s11584_s5 + $0xb0] sm:$0xff] }
 0x206   : > { %6994 = vmatpush3.msra.mxu1 %v932_v31  ;;  %7035 = vmatmul.mubr.msk.f32.gmra.mxu0 %vm759_vm0, %v1974_v43  ;;  %v9274_v31 = vld [vmem:[#allocation2 + $0x48] sm:$0x3]  ;;  %v9279_v43 = vsel %vm963_vm2, %v2279_v14, %v2280_v29  ;;  %v2542_v14 = vrot.slane %v9158_v26, 2  ;;  %v2543_v29 = vrot.slane %v9232_v11, 2  ;;  %v2545_v11 = vrot.slane %v9167_v49, 2 }
 0x207   : > { %7077 = vmatprep.subr.mxu0 %v2186_v63  ;;  %6995 = vmatprep.subr.mxu1 %v931_v50 }
 0x208   : > { %6997 = vmatprep.mubr.msk.f32.mxu1 %vm759_vm0, %v8743_v6  ;;  %7078 = vmatpush3.msra.mxu0 %v2186_v63  ;;  %v2199_v6 = vld [vmem:[%s11584_s5 + $0x70] sm:$0xff]  ;;  %v2282_v63 = vrot.slane %v9182_v44, 1 }
 0x209   : > { %6996 = vmatpush3.msra.mxu1 %v931_v50  ;;  %7079 = vmatprep.subr.mxu0 %v2185_v51  ;;  %v2283_v50 = vrot.slane %v9260_v30, 1 }
 0x20a   : > { %7037 = vmatprep.subr.mxu1 %v2200_v56  ;;  %7080 = vmatpush3.msra.mxu0 %v2185_v51  ;;  %v2231_v51 = vld [vmem:[%s11584_s5 + $0x170] sm:$0xff] }
 0x20b   : > { %7081 = vmatprep.mubr.msk.f32.mxu0 %vm759_vm0, %v9149_v57  ;;  %6998 = vmatmul.mubr.msk.f32.vlgmr.msra.gmra.mxu1 %vm759_vm0, %v8769_v22  ;;  %v2215_v22 = vld [vmem:[%s11584_s5 + $0xf0] sm:$0xff] }
 0x20c   : > { %7038 = vmatpush3.msra.mxu1 %v2200_v56  ;;  %7082 = vmatmul.mubr.msk.f32.vlgmr.msra.gmra.mxu0 %vm759_vm0, %v9158_v26  ;;  %v2206_v56 = vld [vmem:[%s11584_s5 + $0xa8] sm:$0xff] }
 0x20d   : > { %7121 = vmatprep.subr.mxu0 %v2216_v59  ;;  %7000 = vmatprep.mubr.msk.f32.mxu1 %vm759_vm0, %v8801_v45  ;;  %v2214_v45 = vld [vmem:[%s11584_s5 + $0xe8] sm:$0xff] }
 0x20e   : > { %7039 = vmatprep.subr.mxu1 %v2199_v6  ;;  %7084 = vmatprep.mubr.msk.f32.mxu0 %vm759_vm0, %v9167_v49 }
 0x20f   : > { %7122 = vmatpush3.msra.mxu0 %v2216_v59  ;;  %7040 = vmatpush3.msra.mxu1 %v2199_v6  ;;  %v2285_v59 = vrot.slane %v9191_v18, 1  ;;  %v2286_v6 = vrot.slane %v9274_v31, 1 }
 0x210   : > { %7123 = vmatprep.subr.mxu0 %v2215_v22  ;;  %7041 = vmatprep.subr.mxu1 %v2198_v7 }
 0x211   : > { %7124 = vmatpush3.msra.mxu0 %v2215_v22  ;;  %7001 = vmatmul.mubr.msk.f32.gmra.mxu1 %vm759_vm0, %v8827_v3  ;;  %v2213_v3 = vld [vmem:[%s11584_s5 + $0xe0] sm:$0xff]  ;;  %v9295_v22 = vld [vmem:[#allocation2 + $0x58] sm:$0x3] }
 0x212   : > { %7042 = vmatpush3.msra.mxu1 %v2198_v7  ;;  %7085 = vmatmul.mubr.msk.f32.gmra.mxu0 %vm759_vm0, %v9182_v44  ;;  %v9298_v7 = vsel %vm963_vm2, %v2282_v63, %v2283_v50  ;;  %v2226_v63 = vld [vmem:[%s11584_s5 + $0x148] sm:$0xff]  ;;  %v2546_v50 = vrot.slane %v9243_v23, 2  ;;  %v2248_v23 = vld [vmem:[%s11584_s5 + $0x1f8] sm:$0xff] }
 0x213   : > { %7125 = vmatprep.subr.mxu0 %v2214_v45  ;;  %7003 = vmatprep.mubr.msk.f32.mxu1 %vm759_vm0, %v8860_v32  ;;  %v2212_v32 = vld [vmem:[%s11584_s5 + $0xd8] sm:$0xff] }
 0x214   : > { %7043 = vmatprep.subr.mxu1 %v2197_v15  ;;  %7087 = vmatprep.mubr.msk.f32.mxu0 %vm759_vm0, %v9191_v18 }
 0x215   : > { %7126 = vmatpush3.msra.mxu0 %v2214_v45  ;;  %7044 = vmatpush3.msra.mxu1 %v2197_v15  ;;  %v2230_v45 = vld [vmem:[%s11584_s5 + $0x168] sm:$0xff]  ;;  %v2205_v15 = vld [vmem:[%s11584_s5 + $0xa0] sm:$0xff] }
 0x216   : > { %7127 = vmatprep.subr.mxu0 %v2213_v3  ;;  %7045 = vmatprep.subr.mxu1 %v2196_v55 }
 0x217   : > { %7128 = vmatpush3.msra.mxu0 %v2213_v3  ;;  %7004 = vmatmul.mubr.msk.f32.gmra.mxu1 %vm759_vm0, %v8880_v61  ;;  %v2211_v61 = vld [vmem:[%s11584_s5 + $0xd0] sm:$0xff]  ;;  %v9308_v3 = vld [vmem:[#allocation2 + $0x68] sm:$0x3] }
 0x218   : > { %7046 = vmatpush3.msra.mxu1 %v2196_v55  ;;  %7088 = vmatmul.mubr.msk.f32.gmra.mxu0 %vm759_vm0, %v9208_v12  ;;  %v9313_v55 = vsel %vm963_vm2, %v2285_v59, %v2286_v6  ;;  %v2224_v59 = vld [vmem:[%s11584_s5 + $0x138] sm:$0xff]  ;;  %v2548_v6 = vrot.slane %v9182_v44, 2 }
 0x219   : > { %7129 = vmatprep.subr.mxu0 %v2212_v32  ;;  %7006 = vmatprep.mubr.msk.f32.mxu1 %vm759_vm0, %v8966_v39  ;;  %v2274_v39 = vrot.slane %v9215_v36, 1 }
 0x21a   : > { %7047 = vmatprep.subr.mxu1 %v2195_v37  ;;  %7090 = vmatprep.mubr.msk.f32.mxu0 %vm759_vm0, %v9219_v54 }
 0x21b   : > { %7130 = vmatpush3.msra.mxu0 %v2212_v32  ;;  %7048 = vmatpush3.msra.mxu1 %v2195_v37  ;;  %v2275_v17 = vsel %vm963_vm2, %v2273_v19, %v2274_v39  ;;  %v2289_v32 = vrot.slane %v9295_v22, 1  ;;  %v2204_v37 = vld [vmem:[%s11584_s5 + $0x98] sm:$0xff] }
 0x21c   : > { %7131 = vmatprep.subr.mxu0 %v2211_v61  ;;  %7049 = vmatprep.subr.mxu1 %v2194_v38  ;;  %v2228_v39 = vld [vmem:[%s11584_s5 + $0x158] sm:$0xff] }
 0x21d   : > { %7132 = vmatpush3.msra.mxu0 %v2211_v61  ;;  %7007 = vmatmul.mubr.msk.f32.gmra.mxu1 %vm759_vm0, %v1856_v40  ;;  %v2291_v61 = vrot.slane %v9219_v54, 1  ;;  %v9329_v40 = vld [vmem:[#allocation2 + $0x78] sm:$0x3]  ;;  %v9332_v19 = vsel %vm963_vm2, %v2288_v16, %v2289_v32  ;;  %v2223_v16 = vld [vmem:[%s11584_s5 + $0x130] sm:$0xff] }
 0x21e   : > { %7050 = vmatpush3.msra.mxu1 %v2194_v38  ;;  %7091 = vmatmul.mubr.msk.f32.gmra.mxu0 %vm759_vm0, %v9241_v62  ;;  %v2292_v38 = vrot.slane %v9308_v3, 1  ;;  %v2247_v32 = vld [vmem:[%s11584_s5 + $0x1f0] sm:$0xff] }
 0x21f   : > { %7133 = vmatprep.subr.mxu0 %v2210_v21  ;;  %7051 = vmatprep.subr.mxu1 %v2193_v42 }
 0x220   : > { %7134 = vmatpush3.msra.mxu0 %v2210_v21  ;;  %7137 = vmatprep.mubr.msk.f32.mxu0 %vm759_vm0, %v9158_v26  ;;  %v2203_v21 = vld [vmem:[%s11584_s5 + $0x90] sm:$0xff]  ;;  %v9374_v26 = vld [vmem:[#allocation2 + $0x80] sm:$0xff] }
 0x221   : > { %7052 = vmatpush3.msra.mxu1 %v2193_v42  ;;  %7135 = vmatprep.subr.mxu0 %v2209_v10  ;;  %v9345_v42 = vsel %vm963_vm2, %v2291_v61, %v2292_v38  ;;  %v2552_v61 = vrot.slane %v9274_v31, 2  ;;  %v2554_v38 = vrot.slane %v9208_v12, 2 }
 0x222   : > { %7053 = vmatprep.mubr.msk.f32.mxu1 %vm759_vm0, %v2275_v17  ;;  %7093 = vmatprep.subr.mxu1 %v2208_v25  ;;  %v2202_v17 = vld [vmem:[%s11584_s5 + $0x88] sm:$0xff] }
 0x223   : > { %7136 = vmatpush3.msra.mxu0 %v2209_v10  ;;  %7054 = vmatmul.mubr.msk.f32.vlgmr.msra.gmra.mxu1 %vm759_vm0, %v9264_v1  ;;  %v2295_v10 = vrot.slane %v9329_v40, 1 }
 0x224   : > { %7094 = vmatpush3.msra.mxu1 %v2208_v25  ;;  %7138 = vmatmul.mubr.msk.f32.vlgmr.msra.gmra.mxu0 %vm759_vm0, %v9167_v49  ;;  %v2539_v25 = vrot.slane %v9149_v57, 2  ;;  %v2201_v57 = vld [vmem:[%s11584_s5 + $0x80] sm:$0xff] }
 0x225   : > { %7177 = vmatprep.subr.mxu0 %v2232_v35  ;;  %7056 = vmatprep.mubr.msk.f32.mxu1 %vm759_vm0, %v9279_v43 }
 0x226   : > { %7095 = vmatprep.subr.mxu1 %v2207_v33  ;;  %7140 = vmatprep.mubr.msk.f32.mxu0 %vm759_vm0, %v9182_v44 }
 0x227   : > { %7178 = vmatpush3.msra.mxu0 %v2232_v35  ;;  %7096 = vmatpush3.msra.mxu1 %v2207_v33  ;;  %v2540_v35 = vrot.slane %v9215_v36, 2  ;;  %v9364_v33 = vsel %vm963_vm2, %v2294_v9, %v2295_v10  ;;  %v2225_v36 = vld [vmem:[%s11584_s5 + $0x140] sm:$0xff] }
 0x228   : > { %7179 = vmatprep.subr.mxu0 %v2231_v51  ;;  %7097 = vmatprep.subr.mxu1 %v2206_v56  ;;  %v2221_v9 = vld [vmem:[%s11584_s5 + $0x120] sm:$0xff] }
 0x229   : > { %7180 = vmatpush3.msra.mxu0 %v2231_v51  ;;  %7057 = vmatmul.mubr.msk.f32.gmra.mxu1 %vm759_vm0, %v9298_v7  ;;  %v2544_v51 = vsel %vm1230_vm3, %v2542_v14, %v2543_v29  ;;  %v2245_v10 = vld [vmem:[%s11584_s5 + $0x1e0] sm:$0xff]  ;;  %v2560_v14 = vrot.slane %v9241_v62, 2  ;;  %v2561_v29 = vrot.slane %v9329_v40, 2  ;;  %v2927_v40 = vrot.slane %v9374_v26, 2 }
 0x22a   : > { %7098 = vmatpush3.msra.mxu1 %v2206_v56  ;;  %7141 = vmatmul.mubr.msk.f32.gmra.mxu0 %vm759_vm0, %v9191_v18  ;;  %v2541_v56 = vsel %vm1230_vm3, %v2539_v25, %v2540_v35  ;;  %v2558_v25 = vrot.slane %v9308_v3, 2  ;;  %v2244_v35 = vld [vmem:[%s11584_s5 + $0x1d8] sm:$0xff] }
 0x22b   : > { %7181 = vmatprep.subr.mxu0 %v2230_v45  ;;  %7059 = vmatprep.mubr.msk.f32.mxu1 %vm759_vm0, %v9313_v55 }
 0x22c   : > { %7099 = vmatprep.subr.mxu1 %v2205_v15  ;;  %7143 = vmatprep.mubr.msk.f32.mxu0 %vm759_vm0, %v9208_v12 }
 0x22d   : > { %7182 = vmatpush3.msra.mxu0 %v2230_v45  ;;  %7100 = vmatpush3.msra.mxu1 %v2205_v15  ;;  %v2549_v45 = vrot.slane %v9260_v30, 2  ;;  %v9397_v15 = vsel %vm1230_vm3, %v2545_v11, %v2546_v50  ;;  %v2243_v11 = vld [vmem:[%s11584_s5 + $0x1d0] sm:$0xff]  ;;  %v2218_v50 = vld [vmem:[%s11584_s5 + $0x108] sm:$0xff] }
 0x22e   : > { %7183 = vmatprep.subr.mxu0 %v2229_v58  ;;  %7101 = vmatprep.subr.mxu1 %v2204_v37 }
 0x22f   : > { %7184 = vmatpush3.msra.mxu0 %v2229_v58  ;;  %7060 = vmatmul.mubr.msk.f32.gmra.mxu1 %vm759_vm0, %v9332_v19  ;;  %v9407_v30 = vsel %vm1230_vm3, %v2548_v6, %v2549_v45  ;;  %v2222_v58 = vld [vmem:[%s11584_s5 + $0x128] sm:$0xff]  ;;  %v2241_v45 = vld [vmem:[%s11584_s5 + $0x1c0] sm:$0xff] }
 0x230   : > { %7102 = vmatpush3.msra.mxu1 %v2204_v37  ;;  %7144 = vmatmul.mubr.msk.f32.gmra.mxu0 %vm759_vm0, %v9219_v54  ;;  %v2551_v37 = vrot.slane %v9191_v18, 2 }
 0x231   : > { %7185 = vmatprep.subr.mxu0 %v2228_v39  ;;  %7062 = vmatprep.mubr.msk.f32.mxu1 %vm759_vm0, %v9345_v42 }
 0x232   : > { %7103 = vmatprep.subr.mxu1 %v2203_v21  ;;  %7146 = vmatprep.mubr.msk.f32.mxu0 %vm759_vm0, %v9241_v62  ;;  %v9427_v31 = vsel %vm1230_vm3, %v2551_v37, %v2552_v61  ;;  %v2809_v37 = vrot.slane %v9374_v26, 1  ;;  %v2235_v61 = vld [vmem:[%s11584_s5 + $0x190] sm:$0xff] }
 0x233   : > { %7186 = vmatpush3.msra.mxu0 %v2228_v39  ;;  %7104 = vmatpush3.msra.mxu1 %v2203_v21  ;;  %v2555_v39 = vrot.slane %v9295_v22, 2  ;;  %v2246_v21 = vld [vmem:[%s11584_s5 + $0x1e8] sm:$0xff] }
 0x234   : > { %7187 = vmatprep.subr.mxu0 %v2227_v46  ;;  %7105 = vmatprep.subr.mxu1 %v2202_v17 }
 0x235   : > { %7188 = vmatpush3.msra.mxu0 %v2227_v46  ;;  %7063 = vmatmul.mubr.msk.f32.gmra.mxu1 %vm759_vm0, %v9364_v33  ;;  %v9437_v22 = vsel %vm1230_vm3, %v2554_v38, %v2555_v39  ;;  %v2220_v46 = vld [vmem:[%s11584_s5 + $0x118] sm:$0xff] }
 0x236   : > { %7106 = vmatpush3.msra.mxu1 %v2202_v17  ;;  %7147 = vmatmul.mubr.msk.f32.gmra.mxu0 %vm759_vm0, %v9374_v26  ;;  %v2557_v17 = vrot.slane %v9219_v54, 2 }
 0x237   : > { %7189 = vmatprep.subr.mxu0 %v2226_v63  ;;  %7107 = vmatprep.subr.mxu1 %v2201_v57 }
 0x238   : > { %7190 = vmatpush3.msra.mxu0 %v2226_v63  ;;  %7193 = vmatprep.mubr.msk.f32.mxu0 %vm759_vm0, %v2544_v51  ;;  %v9454_v63 = vld [vmem:[#allocation2 + $0x88] sm:$0x3]  ;;  %v9459_v3 = vsel %vm1230_vm3, %v2557_v17, %v2558_v25 }
 0x239   : > { %7108 = vmatpush3.msra.mxu1 %v2201_v57  ;;  %7191 = vmatprep.subr.mxu0 %v2225_v36  ;;  %v2219_v57 = vld [vmem:[%s11584_s5 + $0x110] sm:$0xff] }
 0x23a   : > { %7109 = vmatprep.mubr.msk.f32.mxu1 %vm759_vm0, %v2541_v56  ;;  %7149 = vmatprep.subr.mxu1 %v2224_v59  ;;  %v2242_v56 = vld [vmem:[%s11584_s5 + $0x1c8] sm:$0xff] }
 0x23b   : > { %7192 = vmatpush3.msra.mxu0 %v2225_v36  ;;  %7110 = vmatmul.mubr.msk.f32.vlgmr.msra.gmra.mxu1 %vm759_vm0, %v2544_v51  ;;  %v9470_v36 = vsel %vm1230_vm3, %v2560_v14, %v2561_v29  ;;  %v2928_v51 = vrot.slane %v9454_v63, 2 }
 0x23c   : > { %7150 = vmatpush3.msra.mxu1 %v2224_v59  ;;  %7194 = vmatmul.mubr.msk.f32.vlgmr.msra.gmra.mxu0 %vm759_vm0, %v9397_v15  ;;  %v2217_v59 = vld [vmem:[%s11584_s5 + $0x100] sm:$0xff] }
 0x23d   : > { %7233 = vmatprep.subr.mxu0 %v2248_v23  ;;  %7112 = vmatprep.mubr.msk.f32.mxu1 %vm759_vm0, %v9397_v15  ;;  %v9490_v6 = vsel %vm1230_vm3, %v2927_v40, %v2928_v51 }
 0x23e   : > { %7151 = vmatprep.subr.mxu1 %v2223_v16  ;;  %7196 = vmatprep.mubr.msk.f32.mxu0 %vm759_vm0, %v9407_v30 }
 0x23f   : > { %7234 = vmatpush3.msra.mxu0 %v2248_v23  ;;  %7152 = vmatpush3.msra.mxu1 %v2223_v16  ;;  %v2240_v23 = vld [vmem:[%s11584_s5 + $0x1b8] sm:$0xff]  ;;  %v2239_v16 = vld [vmem:[%s11584_s5 + $0x1b0] sm:$0xff] }
 0x240   : > { %7235 = vmatprep.subr.mxu0 %v2247_v32  ;;  %7153 = vmatprep.subr.mxu1 %v2222_v58 }
 0x241   : > { %7236 = vmatpush3.msra.mxu0 %v2247_v32  ;;  %7113 = vmatmul.mubr.msk.f32.gmra.mxu1 %vm759_vm0, %v9407_v30  ;;  %v9523_v32 = vld [vmem:[#allocation2 + $0x90] sm:$0xff] }
 0x242   : > { %7154 = vmatpush3.msra.mxu1 %v2222_v58  ;;  %7197 = vmatmul.mubr.msk.f32.gmra.mxu0 %vm759_vm0, %v9427_v31  ;;  %v9525_v58 = vld [vmem:[#allocation2 + $0x98] sm:$0x3]  ;;  %v3162_v38 = vrot.slane %v9523_v32, 1 }
 0x243   : > { %7237 = vmatprep.subr.mxu0 %v2246_v21  ;;  %7115 = vmatprep.mubr.msk.f32.mxu1 %vm759_vm0, %v9427_v31  ;;  %v3163_v39 = vrot.slane %v9525_v58, 1 }
 0x244   : > { %7155 = vmatprep.subr.mxu1 %v2221_v9  ;;  %7199 = vmatprep.mubr.msk.f32.mxu0 %vm759_vm0, %v9437_v22 }
 0x245   : > { %7238 = vmatpush3.msra.mxu0 %v2246_v21  ;;  %7156 = vmatpush3.msra.mxu1 %v2221_v9  ;;  %v3164_v9 = vsel %vm963_vm2, %v3162_v38, %v3163_v39 }
 0x246   : > { %7239 = vmatprep.subr.mxu0 %v2245_v10  ;;  %7157 = vmatprep.subr.mxu1 %v2220_v46 }
 0x247   : > { %7240 = vmatpush3.msra.mxu0 %v2245_v10  ;;  %7116 = vmatmul.mubr.msk.f32.gmra.mxu1 %vm759_vm0, %v9437_v22  ;;  %v2255_v10 = vld [vmem:[%s11584_s5 + $0x230] sm:$0xff] }
 0x248   : > { %7158 = vmatpush3.msra.mxu1 %v2220_v46  ;;  %7200 = vmatmul.mubr.msk.f32.gmra.mxu0 %vm759_vm0, %v9459_v3  ;;  %v2253_v46 = vld [vmem:[%s11584_s5 + $0x220] sm:$0xff] }
 0x249   : > { %7241 = vmatprep.subr.mxu0 %v2244_v35  ;;  %7118 = vmatprep.mubr.msk.f32.mxu1 %vm759_vm0, %v9459_v3 }
 0x24a   : > { %7159 = vmatprep.subr.mxu1 %v2219_v57  ;;  %7202 = vmatprep.mubr.msk.f32.mxu0 %vm759_vm0, %v9470_v36 }
 0x24b   : > { %7242 = vmatpush3.msra.mxu0 %v2244_v35  ;;  %7160 = vmatpush3.msra.mxu1 %v2219_v57  ;;  %v3281_v35 = vrot.slane %v9525_v58, 2 }
 0x24c   : > { %7243 = vmatprep.subr.mxu0 %v2243_v11  ;;  %7161 = vmatprep.subr.mxu1 %v2218_v50 }
 0x24d   : > { %7244 = vmatpush3.msra.mxu0 %v2243_v11  ;;  %7119 = vmatmul.mubr.msk.f32.gmra.mxu1 %vm759_vm0, %v9470_v36 }
 0x24e   : > { %7162 = vmatpush3.msra.mxu1 %v2218_v50  ;;  %7203 = vmatmul.mubr.msk.f32.gmra.mxu0 %vm759_vm0, %v9490_v6 }
 0x24f   : > { %7245 = vmatprep.subr.mxu0 %v2242_v56  ;;  %7163 = vmatprep.subr.mxu1 %v2217_v59 }
 0x250   : > { %7165 = vmatprep.mubr.msk.f32.mxu1 %vm759_vm0, %v9264_v1  ;;  %7246 = vmatpush3.msra.mxu0 %v2242_v56  ;;  %v2238_v1 = vld [vmem:[%s11584_s5 + $0x1a8] sm:$0xff] }
 0x251   : > { %7249 = vmatprep.mubr.msk.f32.mxu0 %vm759_vm0, %v9279_v43  ;;  %7164 = vmatpush3.msra.mxu1 %v2217_v59 }
 0x252   : > { %7247 = vmatprep.subr.mxu0 %v2241_v45  ;;  %7205 = vmatprep.subr.mxu1 %v2240_v23 }
 0x253   : > { %7248 = vmatpush3.msra.mxu0 %v2241_v45  ;;  %7166 = vmatmul.mubr.msk.f32.vlgmr.msra.gmra.mxu1 %vm759_vm0, %v9279_v43  ;;  %v2237_v43 = vld [vmem:[%s11584_s5 + $0x1a0] sm:$0xff] }
 0x254   : > { %7206 = vmatpush3.msra.mxu1 %v2240_v23  ;;  %7250 = vmatmul.mubr.msk.f32.vlgmr.msra.gmra.mxu0 %vm759_vm0, %v9298_v7 }
 0x255   : > { %7168 = vmatprep.mubr.msk.f32.mxu1 %vm759_vm0, %v9298_v7  ;;  %7207 = vmatprep.subr.mxu1 %v2239_v16  ;;  %v2236_v7 = vld [vmem:[%s11584_s5 + $0x198] sm:$0xff] }
 0x256   : > { %7252 = vmatprep.mubr.msk.f32.mxu0 %vm759_vm0, %v9313_v55  ;;  %7208 = vmatpush3.msra.mxu1 %v2239_v16 }
 0x257   : > { %7209 = vmatprep.subr.mxu1 %v2238_v1  ;;  %7169 = vmatmul.mubr.msk.f32.gmra.mxu1 %vm759_vm0, %v9313_v55  ;;  %v2810_v55 = vrot.slane %v9454_v63, 1 }
 0x258   : > { %7210 = vmatpush3.msra.mxu1 %v2238_v1  ;;  %7253 = vmatmul.mubr.msk.f32.gmra.mxu0 %vm759_vm0, %v9332_v19 }
 0x259   : > { %7171 = vmatprep.mubr.msk.f32.mxu1 %vm759_vm0, %v9332_v19  ;;  %7211 = vmatprep.subr.mxu1 %v2237_v43  ;;  %v2234_v19 = vld [vmem:[%s11584_s5 + $0x188] sm:$0xff]  ;;  %v2811_v21 = vsel %vm963_vm2, %v2809_v37, %v2810_v55 }
 0x25a   : > { %7255 = vmatprep.mubr.msk.f32.mxu0 %vm759_vm0, %v9345_v42  ;;  %7212 = vmatpush3.msra.mxu1 %v2237_v43 }
 0x25b   : > { %7213 = vmatprep.subr.mxu1 %v2236_v7  ;;  %7172 = vmatmul.mubr.msk.f32.gmra.mxu1 %vm759_vm0, %v9345_v42  ;;  %v2233_v42 = vld [vmem:[%s11584_s5 + $0x180] sm:$0xff] }
 0x25c   : > { %7214 = vmatpush3.msra.mxu1 %v2236_v7  ;;  %7256 = vmatmul.mubr.msk.f32.gmra.mxu0 %vm759_vm0, %v9364_v33 }
 0x25d   : > { %7174 = vmatprep.mubr.msk.f32.mxu1 %vm759_vm0, %v9364_v33  ;;  %7215 = vmatprep.subr.mxu1 %v2235_v61  ;;  %v2256_v33 = vld [vmem:[%s11584_s5 + $0x238] sm:$0xff] }
 0x25e   : > { %7258 = vmatprep.mubr.msk.f32.mxu0 %vm759_vm0, %v2811_v21  ;;  %7216 = vmatpush3.msra.mxu1 %v2235_v61 }
 0x25f   : > { %7217 = vmatprep.subr.mxu1 %v2234_v19  ;;  %7175 = vmatmul.mubr.msk.f32.gmra.mxu1 %vm759_vm0, %v2811_v21 }
 0x260   : > { %7218 = vmatpush3.msra.mxu1 %v2234_v19  ;;  %7221 = vmatprep.mubr.msk.f32.mxu1 %vm759_vm0, %v9167_v49  ;;  %v2254_v49 = vld [vmem:[%s11584_s5 + $0x228] sm:$0xff] }
 0x261   : > { %7219 = vmatprep.subr.mxu1 %v2233_v42  ;;  %7259 = vmatmul.mubr.msk.f32.gmra.mxu0 %vm759_vm0, %v3164_v9 }
 0x262   : > { %7220 = vmatpush3.msra.mxu1 %v2233_v42  ;;  %7289 = vmatprep.subr.mxu0 %v3495_v4 }
 0x263   : > { %7261 = vmatprep.subr.mxu1 %v2256_v33  ;;  %7222 = vmatmul.mubr.msk.f32.vlgmr.msra.gmra.mxu1 %vm759_vm0, %v9182_v44  ;;  %v2252_v44 = vld [vmem:[%s11584_s5 + $0x218] sm:$0xff] }
 0x264   : > { %7262 = vmatpush3.msra.mxu1 %v2256_v33  ;;  %7224 = vmatprep.mubr.msk.f32.mxu1 %vm759_vm0, %v9191_v18  ;;  %v2251_v18 = vld [vmem:[%s11584_s5 + $0x210] sm:$0xff] }
 0x265   : > { %7263 = vmatprep.subr.mxu1 %v2255_v10  ;;  %7290 = vmatpush3.msra.mxu0 %v3495_v4 }
 0x266   : > { %7264 = vmatpush3.msra.mxu1 %v2255_v10  ;;  %7291 = vmatprep.subr.mxu0 %v3494_v2 }
 0x267   : > { %7265 = vmatprep.subr.mxu1 %v2254_v49  ;;  %7225 = vmatmul.mubr.msk.f32.gmra.mxu1 %vm759_vm0, %v9208_v12  ;;  %v2250_v12 = vld [vmem:[%s11584_s5 + $0x208] sm:$0xff] }
 0x268   : > { %7266 = vmatpush3.msra.mxu1 %v2254_v49  ;;  %7227 = vmatprep.mubr.msk.f32.mxu1 %vm759_vm0, %v9219_v54  ;;  %v2249_v54 = vld [vmem:[%s11584_s5 + $0x200] sm:$0xff]  ;;  %v9598_v17 = vpop.f32.mrf.mxu1  ;;  %v9600_v25 = vpop.f32.mrf.mxu0 }
 0x269   : > { %7267 = vmatprep.subr.mxu1 %v2253_v46  ;;  %7292 = vmatpush3.msra.mxu0 %v3494_v2  ;;  %v3479_v2 = vld [vmem:[%s11586_s7 + $0x38] sm:$0xff] }
 0x26a   : > { %7268 = vmatpush3.msra.mxu1 %v2253_v46 }
 0x26b   : > { %7269 = vmatprep.subr.mxu1 %v2252_v44  ;;  %7228 = vmatmul.mubr.msk.f32.gmra.mxu1 %vm759_vm0, %v9241_v62  ;;  %v9606_v62 = vpop.f32.mrf.mxu1 }
 0x26c   : > { %7270 = vmatpush3.msra.mxu1 %v2252_v44  ;;  %7230 = vmatprep.mubr.msk.f32.mxu1 %vm759_vm0, %v9374_v26  ;;  %v9608_v26 = vpop.f32.mrf.mxu0 }
 0x26d   : > { %7271 = vmatprep.subr.mxu1 %v2251_v18 }
 0x26e   : > { %7272 = vmatpush3.msra.mxu1 %v2251_v18 }
 0x26f   : > { %7273 = vmatprep.subr.mxu1 %v2250_v12  ;;  %7231 = vmatmul.mubr.msk.f32.gmra.mxu1 %vm759_vm0, %v9523_v32 }
 0x270   : > { %7274 = vmatpush3.msra.mxu1 %v2250_v12  ;;  %7277 = vmatprep.mubr.msk.f32.mxu1 %vm759_vm0, %v9397_v15  ;;  %v9614_v14 = vpop.f32.mrf.mxu1  ;;  %v9616_v29 = vpop.f32.mrf.mxu0  ;;  %v3280_v15 = vrot.slane %v9523_v32, 2 }
 0x271   : > { %7275 = vmatprep.subr.mxu1 %v2249_v54 }
 0x272   : > { %7276 = vmatpush3.msra.mxu1 %v2249_v54  ;;  %v9624_v63 = vpop.f32.mrf.mxu1 }
 0x273   : > { %7278 = vmatmul.mubr.msk.f32.vlgmr.msra.gmra.mxu1 %vm759_vm0, %v9407_v30  ;;  %v9626_v30 = vpop.f32.mrf.mxu0 }
 0x274   : > { %7280 = vmatprep.mubr.msk.f32.mxu1 %vm759_vm0, %v9427_v31 }
 0x277   : > { %7281 = vmatmul.mubr.msk.f32.gmra.mxu1 %vm759_vm0, %v9437_v22  ;;  %v3282_v22 = vsel %vm1230_vm3, %v3280_v15, %v3281_v35  ;;  %v3483_v15 = vld [vmem:[%s11586_s7 + $0x58] sm:$0xff] }
 0x278   : > { %7283 = vmatprep.mubr.msk.f32.mxu1 %vm759_vm0, %v9459_v3  ;;  %v9628_v57 = vpop.f32.mrf.mxu1  ;;  %v9630_v31 = vpop.f32.mrf.mxu0  ;;  %7325 = vmatprep.subr.mxu1 %v3483_v15 }
 0x279   : > { %7326 = vmatpush3.msra.mxu1 %v3483_v15  ;;  %v3481_v15 = vld [vmem:[%s11586_s7 + $0x48] sm:$0xff] }
 0x27a   : > { %v9637_v40 = vpop.f32.mrf.mxu1  ;;  %v9639_v3 = vpop.f32.mrf.mxu0  ;;  %7327 = vmatprep.subr.mxu1 %v3482_v5 }
 0x27b   : > { %7284 = vmatmul.mubr.msk.f32.gmra.mxu1 %vm759_vm0, %v9470_v36 }
 0x27c   : > { %7286 = vmatprep.mubr.msk.f32.mxu1 %vm759_vm0, %v9490_v6  ;;  %7328 = vmatpush3.msra.mxu1 %v3482_v5  ;;  %v3493_v5 = vld [vmem:[%s11586_s7 + $0xa8] sm:$0xff] }
 0x27d   : > { %7329 = vmatprep.subr.mxu1 %v3481_v15  ;;  %7293 = vmatprep.subr.mxu0 %v3493_v5 }
 0x27e   : > { %7330 = vmatpush3.msra.mxu1 %v3481_v15  ;;  %7294 = vmatpush3.msra.mxu0 %v3493_v5  ;;  %v3491_v5 = vld [vmem:[%s11586_s7 + $0x98] sm:$0xff] }
 0x27f   : > { %7287 = vmatmul.mubr.msk.f32.gmra.mxu1 %vm759_vm0, %v3282_v22  ;;  %7331 = vmatprep.subr.mxu1 %v3480_v28 }
 0x280   : > { %v9642_v11 = vpop.f32.mrf.mxu1  ;;  %v9644_v50 = vpop.f32.mrf.mxu0  ;;  %7332 = vmatpush3.msra.mxu1 %v3480_v28  ;;  %7295 = vmatprep.subr.mxu0 %v3492_v13  ;;  %v3478_v28 = vld [vmem:[%s11586_s7 + $0x30] sm:$0xff] }
 0x281   : > { %7333 = vmatprep.subr.mxu1 %v3479_v2  ;;  %7296 = vmatpush3.msra.mxu0 %v3492_v13  ;;  %v3490_v13 = vld [vmem:[%s11586_s7 + $0x90] sm:$0xff] }
 0x282   : > { %v9646_v51 = vpop.f32.mrf.mxu1  ;;  %v9648_v56 = vpop.f32.mrf.mxu0  ;;  %7334 = vmatpush3.msra.mxu1 %v3479_v2  ;;  %7297 = vmatprep.subr.mxu0 %v3491_v5  ;;  %v7742_v2 = vld [vmem:[#allocation4 + $0xb0] sm:$0xff] }
 0x283   : > { %7335 = vmatprep.subr.mxu1 %v3478_v28  ;;  %3427 = vst.msk [vmem:[#allocation3 + $0x20] sm:$0xff] %vm3421_vm5, %v7742_v2  ;;  %3422 = vst.msk [vmem:[#allocation3] sm:$0xff] %vm3421_vm5, %v7742_v2  ;;  %7298 = vmatpush3.msra.mxu0 %v3491_v5  ;;  %v3489_v5 = vld [vmem:[%s11586_s7 + $0x88] sm:$0xff] }
 0x284   : > { %v9650_v36 = vpop.f32.mrf.mxu1  ;;  %v9652_v59 = vpop.f32.mrf.mxu0  ;;  %7336 = vmatpush3.msra.mxu1 %v3478_v28  ;;  %3428 = vst.msk [vmem:[#allocation3 + $0x28] sm:$0x3] %vm3423_vm6, %v7742_v2  ;;  %3424 = vst.msk [vmem:[#allocation3 + $0x8] sm:$0x3] %vm3423_vm6, %v7742_v2  ;;  %7299 = vmatprep.subr.mxu0 %v3490_v13 }
 0x285   : > { %3425 = vst.msk [vmem:[#allocation3 + $0x10] sm:$0xff] %vm3421_vm5, %v7742_v2  ;;  %3429 = vst.msk [vmem:[#allocation3 + $0x30] sm:$0xff] %vm3421_vm5, %v7742_v2  ;;  %7337 = vmatprep.subr.mxu1 %v3477_v60  ;;  %v1197_v28 = vadd.f32 %v9650_v36, %v9598_v17  ;;  %7300 = vmatpush3.msra.mxu0 %v3490_v13  ;;  %v3488_v36 = vld [vmem:[%s11586_s7 + $0x80] sm:$0xff] }
 0x286   : > { %v9654_v6 = vpop.f32.mrf.mxu1  ;;  %v9656_v45 = vpop.f32.mrf.mxu0  ;;  %3426 = vst.msk [vmem:[#allocation3 + $0x18] sm:$0x3] %vm3423_vm6, %v7742_v2  ;;  %3430 = vst.msk [vmem:[#allocation3 + $0x38] sm:$0x3] %vm3423_vm6, %v7742_v2  ;;  %7338 = vmatpush3.msra.mxu1 %v3477_v60  ;;  %7301 = vmatprep.subr.mxu0 %v3489_v5  ;;  %v3475_v60 = vld [vmem:[%s11586_s7 + $0x18] sm:$0xff] }
 0x287   : > { %3431 = vst.msk [vmem:[#allocation3 + $0x40] sm:$0xff] %vm3421_vm5, %v7742_v2  ;;  %3433 = vst.msk [vmem:[#allocation3 + $0x50] sm:$0xff] %vm3421_vm5, %v7742_v2  ;;  %7339 = vmatprep.subr.mxu1 %v3476_v48  ;;  %7302 = vmatpush3.msra.mxu0 %v3489_v5  ;;  %v1377_v13 = vadd.f32 %v9600_v25, %v1197_v28 }
 0x288   : > { %3432 = vst.msk [vmem:[#allocation3 + $0x48] sm:$0x3] %vm3423_vm6, %v7742_v2  ;;  %3434 = vst.msk [vmem:[#allocation3 + $0x58] sm:$0x3] %vm3423_vm6, %v7742_v2  ;;  %7340 = vmatpush3.msra.mxu1 %v3476_v48  ;;  %7303 = vmatprep.subr.mxu0 %v3488_v36  ;;  %v3487_v48 = vld [vmem:[%s11586_s7 + $0x78] sm:$0xff] }
 0x289   : > { %v9658_v23 = vpop.f32.mrf.mxu1  ;;  %3435 = vst.msk [vmem:[#allocation3 + $0x60] sm:$0xff] %vm3421_vm5, %v7742_v2  ;;  %3437 = vst.msk [vmem:[#allocation3 + $0x70] sm:$0xff] %vm3421_vm5, %v7742_v2  ;;  %7341 = vmatprep.subr.mxu1 %v3475_v60  ;;  %7304 = vmatpush3.msra.mxu0 %v3488_v36 }
 0x28a   : > { %v9660_v16 = vpop.f32.mrf.mxu0  ;;  %3436 = vst.msk [vmem:[#allocation3 + $0x68] sm:$0x3] %vm3423_vm6, %v7742_v2  ;;  %3438 = vst.msk [vmem:[#allocation3 + $0x78] sm:$0x3] %vm3423_vm6, %v7742_v2  ;;  %7342 = vmatpush3.msra.mxu1 %v3475_v60  ;;  %v1207_v5 = vadd.f32 %v9658_v23, %v9614_v14  ;;  %7305 = vmatprep.subr.mxu0 %v3487_v48  ;;  %v3473_v60 = vld [vmem:[%s11586_s7 + $0x8] sm:$0xff]  ;;  %v3486_v14 = vld [vmem:[%s11586_s7 + $0x70] sm:$0xff] }
 0x28b   : > { %v9662_v1 = vpop.f32.mrf.mxu1  ;;  %3439 = vst.msk [vmem:[#allocation3 + $0x80] sm:$0xff] %vm3421_vm5, %v7742_v2  ;;  %3441 = vst.msk [vmem:[#allocation3 + $0x90] sm:$0xff] %vm3421_vm5, %v7742_v2  ;;  %7306 = vmatpush3.msra.mxu0 %v3487_v48 }
 0x28c   : > { %v9664_v43 = vpop.f32.mrf.mxu0  ;;  %3440 = vst.msk [vmem:[#allocation3 + $0x88] sm:$0x3] %vm3423_vm6, %v7742_v2  ;;  %3442 = vst.msk [vmem:[#allocation3 + $0x98] sm:$0x3] %vm3423_vm6, %v7742_v2  ;;  %v1192_v2 = vadd.f32 %v9654_v6, %v9606_v62  ;;  %v3474_v62 = vld [vmem:[%s11586_s7 + $0x10] sm:$0xff]  ;;  %v1202_v36 = vadd.f32 %v9662_v1, %v9624_v63  ;;  %7307 = vmatprep.subr.mxu0 %v3486_v14  ;;  %v3485_v63 = vld [vmem:[%s11586_s7 + $0x68] sm:$0xff]  ;;  %v1379_v1 = vadd.f32 %v9616_v29, %v1207_v5 }
 0x28d   : > { %7343 = vmatprep.subr.mxu1 %v3474_v62  ;;  %7308 = vmatpush3.msra.mxu0 %v3486_v14  ;;  %v3484_v29 = vld [vmem:[%s11586_s7 + $0x60] sm:$0xff] }
 0x28e   : > { %v1376_v25 = vadd.f32 %v9608_v26, %v1192_v2  ;;  %7344 = vmatpush3.msra.mxu1 %v3474_v62  ;;  %7309 = vmatprep.subr.mxu0 %v3485_v63  ;;  %v9848_v62 = vld [vmem:[#allocation3 + $0x8] sm:$0x3] }
 0x28f   : > { %v9666_v32 = vpop.f32.mrf.mxu1  ;;  %7345 = vmatprep.subr.mxu1 %v3473_v60  ;;  %7310 = vmatpush3.msra.mxu0 %v3485_v63 }
 0x290   : > { %v9668_v58 = vpop.f32.mrf.mxu0  ;;  %7346 = vmatpush3.msra.mxu1 %v3473_v60  ;;  %v1217_v48 = vadd.f32 %v9666_v32, %v9628_v57  ;;  %7311 = vmatprep.subr.mxu0 %v3484_v29 }
 0x291   : > { %v9670_v7 = vpop.f32.mrf.mxu1  ;;  %7312 = vmatpush3.msra.mxu0 %v3484_v29 }
 0x292   : > { %v9672_v37 = vpop.f32.mrf.mxu0 }
 0x295   : > { %v9674_v55 = vpop.f32.mrf.mxu1 }
 0x296   : > { %v9676_v61 = vpop.f32.mrf.mxu0 }
 0x297   : > { %v9678_v38 = vpop.f32.mrf.mxu1 }
 0x298   : > { %v9680_v39 = vpop.f32.mrf.mxu0 }
 0x29b   : > { %v9682_v19 = vpop.f32.mrf.mxu1 }
 0x29c   : > { %v9684_v21 = vpop.f32.mrf.mxu0  ;;  %v1493_v24 = vadd.f32 %v9682_v19, %v1377_v13  ;;  %v3472_v19 = vld [vmem:[%s11586_s7] sm:$0xff]  ;;  %v9846_v13 = vld [vmem:[%s11586_s7 + $0x178] sm:$0xff] }
 0x29d   : > { %v9686_v42 = vpop.f32.mrf.mxu1  ;;  %7347 = vmatprep.subr.mxu1 %v3472_v19  ;;  %11635 = vst [vmem:[#allocation19_spill] sm:$0xff] %v9846_v13 }
 0x29e   : > { %v9688_v9 = vpop.f32.mrf.mxu0  ;;  %v1492_v26 = vadd.f32 %v9686_v42, %v1376_v25  ;;  %v1612_v2 = vadd.f32 %v9652_v59, %v1493_v24  ;;  %7348 = vmatpush3.msra.mxu1 %v3472_v19  ;;  %v9841_v42 = vld [vmem:[#allocation3] sm:$0xff]  ;;  %v1378_v25 = vadd.f32 %v9626_v30, %v1202_v36  ;;  %v3597_v59 = vrot.slane %v9848_v62, 1 }
 0x29f   : > { %v3596_v24 = vrot.slane %v9841_v42, 1  ;;  %7349 = vmatprep.mubr.msk.f32.mxu1 %vm3421_vm5, %v9841_v42  ;;  %7397 = vmatprep.subr.mxu1 %v9846_v13  ;;  %v1212_v36 = vadd.f32 %v9670_v7, %v9637_v40  ;;  %v1381_v40 = vadd.f32 %v9630_v31, %v1217_v48 }
 0x2a0   : > { %v1611_v30 = vadd.f32 %v9656_v45, %v1492_v26  ;;  %v1227_v26 = vadd.f32 %v9674_v55, %v9642_v11 }
 0x2a1   : > { %v9690_v33 = vpop.f32.mrf.mxu1  ;;  %v3598_v63 = vsel %vm963_vm2, %v3596_v24, %v3597_v59 }
 0x2a2   : > { %v9692_v10 = vpop.f32.mrf.mxu0  ;;  %v1495_v5 = vadd.f32 %v9690_v33, %v1379_v1  ;;  %v9877_v33 = vld [vmem:[%s11586_s7 + $0x118] sm:$0xff]  ;;  %7313 = vmatprep.mubr.msk.f32.mxu0 %vm3421_vm5, %v3598_v63  ;;  %v1380_v1 = vadd.f32 %v9639_v3, %v1212_v36 }
 0x2a3   : > { %v9694_v49 = vpop.f32.mrf.mxu1  ;;  %11636 = vst [vmem:[#allocation20_spill] sm:$0xff] %v9877_v33  ;;  %7361 = vmatprep.subr.mxu0 %v9877_v33 }
 0x2a4   : > { %v9696_v46 = vpop.f32.mrf.mxu0  ;;  %v1494_v14 = vadd.f32 %v9694_v49, %v1378_v25  ;;  %v1614_v7 = vadd.f32 %v9660_v16, %v1495_v5  ;;  %v1222_v16 = vadd.f32 %v9678_v38, %v9646_v51 }
 0x2a6   : > { %v1382_v5 = vadd.f32 %v9648_v56, %v1222_v16 }
 0x2a7   : > { %v9698_v44 = vpop.f32.mrf.mxu1 }
 0x2a8   : > { %v9700_v18 = vpop.f32.mrf.mxu0  ;;  %v1497_v25 = vadd.f32 %v9698_v44, %v1381_v40 }
 0x2a9   : > { %v9702_v12 = vpop.f32.mrf.mxu1 }
 0x2aa   : > { %v9704_v54 = vpop.f32.mrf.mxu0  ;;  %v1616_v48 = vadd.f32 %v9668_v58, %v1497_v25 }
 0x2ad   : > { %v9709_v35 = vpop.f32.mrf.mxu1 }
 0x2ae   : > { %v9711_v22 = vpop.f32.mrf.mxu0 }
 0x2af   : > { %v9719_v41 = vpop.f32.mrf.mxu1 }
 0x2b0   : > { %v9721_v52 = vpop.f32.mrf.mxu0 }
 0x2b3   : > { %v9735_v4 = vpop.f32.mrf.mxu1 }
 0x2b4   : > { %v9737_v53 = vpop.f32.mrf.mxu0  ;;  %v1730_v57 = vadd.f32 %v9735_v4, %v1612_v2  ;;  %v1613_v2 = vadd.f32 %v9664_v43, %v1494_v14  ;;  %v9903_v43 = vld [vmem:[%s11583_s4] ss:$0 sm:$0xff] }
 0x2b5   : > { %v9742_v15 = vpop.f32.mrf.mxu1 }
 0x2b6   : > { %v9747_v27 = vpop.f32.mrf.mxu0  ;;  %v1729_v45 = vadd.f32 %v9742_v15, %v1611_v30  ;;  %v1846_v49 = vadd.f32 %v9684_v21, %v1730_v57  ;;  %v1496_v21 = vadd.f32 %v9702_v12, %v1380_v1 }
 0x2b8   : > { %v1845_v31 = vadd.f32 %v9688_v9, %v1729_v45  ;;  %v1383_v9 = vadd.f32 %v9644_v50, %v1227_v26  ;;  %v1615_v57 = vadd.f32 %v9672_v37, %v1496_v21 }
 0x2b9   : > { %v9758_v8 = vpop.f32.mrf.mxu1 }
 0x2ba   : > { %v9785_v34 = vpop.f32.mrf.mxu0  ;;  %v1732_v24 = vadd.f32 %v9758_v8, %v1614_v7  ;;  %v1499_v12 = vadd.f32 %v9709_v35, %v1383_v9 }
 0x2bb   : > { %v9790_v20 = vpop.f32.mrf.mxu1 }
 0x2bc   : > { %v9797_v17 = vpop.f32.mrf.mxu0  ;;  %v1731_v11 = vadd.f32 %v9790_v20, %v1613_v2  ;;  %v1848_v38 = vadd.f32 %v9692_v10, %v1732_v24  ;;  %v1498_v10 = vadd.f32 %v9719_v41, %v1382_v5 }
 0x2be   : > { %v1847_v30 = vadd.f32 %v9696_v46, %v1731_v11 }
 0x2bf   : > { %v9809_v6 = vpop.f32.mrf.mxu1 }
 0x2c0   : > { %v9818_v28 = vpop.f32.mrf.mxu0  ;;  %v1734_v36 = vadd.f32 %v9809_v6, %v1616_v48  ;;  %v1618_v6 = vadd.f32 %v9676_v61, %v1499_v12  ;;  %v3862_v48 = vrot.slane %v9841_v42, 2 }
 0x2c1   : > { %v9825_v47 = vpop.f32.mrf.mxu1 }
 0x2c2   : > { %v9831_v23 = vpop.f32.mrf.mxu0  ;;  %v1733_v63 = vadd.f32 %v9825_v47, %v1615_v57  ;;  %v1850_v7 = vadd.f32 %v9700_v18, %v1734_v36  ;;  %v1617_v47 = vadd.f32 %v9680_v39, %v1498_v10 }
 0x2c5   : > { %v9853_v60 = vpop.f32.mrf.mxu1 }
 0x2c6   : > { %v9865_v32 = vpop.f32.mrf.mxu0  ;;  %v1736_v26 = vadd.f32 %v9853_v60, %v1618_v6 }
 0x2c7   : > { %v9871_v19 = vpop.f32.mrf.mxu1 }
 0x2c8   : > { %v9880_v4 = vpop.f32.mrf.mxu0  ;;  %v1735_v18 = vadd.f32 %v9871_v19, %v1617_v47  ;;  %v1852_v60 = vadd.f32 %v9711_v22, %v1736_v26 }
 0x2cb   : > { %v6999_v15 = vpop.f32.mrf.mxu1 }
 0x2cc   : > { %v1965_v29 = vadd.f32 %v6999_v15, %v1846_v49  ;;  %v9893_v59 = vpop.f32.mrf.mxu0 }
 0x2cd   : > { %v1925_v3 = vpop.f32.mrf.mxu1 }
 0x2ce   : > { %v2083_v8 = vadd.f32 %v9737_v53, %v1965_v29  ;;  %v1964_v55 = vadd.f32 %v1925_v3, %v1845_v31  ;;  %v9906_v44 = vpop.f32.mrf.mxu0 }
 0x2d0   : > { %v2082_v51 = vadd.f32 %v9747_v27, %v1964_v55  ;;  %v2098_v20 = vadd.f32 %v9903_v43, %v2083_v8 }
 0x2d1   : > { %v7002_v53 = vpop.f32.mrf.mxu1 }
 0x2d2   : > { %v1967_v50 = vadd.f32 %v7002_v53, %v1848_v38  ;;  %v9918_v14 = vpop.f32.mrf.mxu0  ;;  %v2106_v58 = vmax.f32 %v2098_v20, 0.0  ;;  %v2097_v27 = vadd.f32 %v9903_v43, %v2082_v51  ;;  %v3863_v20 = vrot.slane %v9848_v62, 2 }
 0x2d3   : > { %v1935_v35 = vpop.f32.mrf.mxu1 }
 0x2d4   : > { %v2085_v56 = vadd.f32 %v9785_v34, %v1967_v50  ;;  %v1966_v45 = vadd.f32 %v1935_v35, %v1847_v30  ;;  %v9924_v37 = vpop.f32.mrf.mxu0  ;;  %5799 = vrot.lane.b32.xlu1 %v2106_v58, %s7814_s16  ;;  %v2105_v46 = vmax.f32 %v2097_v27, 0.0  ;;  %v1849_v34 = vadd.f32 %v9704_v54, %v1733_v63 }
 0x2d5   : > { %v9962_v53 = vsel %vm1230_vm3, %v3862_v48, %v3863_v20 }
 0x2d6   : > { %v2084_v40 = vadd.f32 %v9797_v17, %v1966_v45  ;;  %5797 = vrot.lane.b32.xlu0 %v2105_v46, %s7814_s16  ;;  %v2100_v41 = vadd.f32 %v9903_v43, %v2085_v56  ;;  %11637 = vst [vmem:[#allocation21_spill] sm:$0xff] %v9962_v53 }
 0x2d7   : > { %v7005_v49 = vpop.f32.mrf.mxu1 }
 0x2d8   : > { %v1969_v1 = vadd.f32 %v7005_v49, %v1850_v7  ;;  %v9935_v2 = vpop.f32.mrf.mxu0  ;;  %v2108_v15 = vmax.f32 %v2100_v41, 0.0  ;;  %v2099_v61 = vadd.f32 %v9903_v43, %v2084_v40 }
 0x2d9   : > { %v1945_v17 = vpop.f32.mrf.mxu1 }
 0x2da   : > { %v2087_v25 = vadd.f32 %v9818_v28, %v1969_v1  ;;  %v1968_v24 = vadd.f32 %v1945_v17, %v1849_v34  ;;  %v9940_v29 = vpop.f32.mrf.mxu0  ;;  %5803 = vrot.lane.b32.xlu1 %v2108_v15, %s7814_s16  ;;  %v2107_v39 = vmax.f32 %v2099_v61, 0.0  ;;  %v1851_v28 = vadd.f32 %v9721_v52, %v1735_v18 }
 0x2dc   : > { %v2086_v54 = vadd.f32 %v9831_v23, %v1968_v24  ;;  %5801 = vrot.lane.b32.xlu0 %v2107_v39, %s7814_s16  ;;  %v2102_v31 = vadd.f32 %v9903_v43, %v2087_v25 }
 0x2dd   : > { %v7008_v16 = vpop.f32.mrf.mxu1 }
 0x2de   : > { %v1971_v21 = vadd.f32 %v7008_v16, %v1852_v60  ;;  %v9947_v11 = vpop.f32.mrf.mxu0  ;;  %v2110_v19 = vmax.f32 %v2102_v31, 0.0  ;;  %v2101_v3 = vadd.f32 %v9903_v43, %v2086_v54 }
 0x2df   : > { %v1955_v8 = vpop.f32.mrf.mxu1 }
 0x2e0   : > { %v2089_v55 = vadd.f32 %v9865_v32, %v1971_v21  ;;  %v1970_v9 = vadd.f32 %v1955_v8, %v1851_v28  ;;  %v9952_v23 = vpop.f32.mrf.mxu0  ;;  %5807 = vrot.lane.b32.xlu1 %v2110_v19, %s7814_s16  ;;  %v2109_v22 = vmax.f32 %v2101_v3, 0.0 }
 0x2e2   : > { %v2088_v51 = vadd.f32 %v9880_v4, %v1970_v9  ;;  %5805 = vrot.lane.b32.xlu0 %v2109_v22, %s7814_s16  ;;  %v2104_v52 = vadd.f32 %v9903_v43, %v2089_v55 }
 0x2e3   : > { %v7055_v38 = vpop.f32.mrf.mxu1 }
 0x2e4   : > { %v7139_v12 = vpop.f32.mrf.mxu0  ;;  %v2112_v5 = vmax.f32 %v2104_v52, 0.0  ;;  %v2103_v32 = vadd.f32 %v9903_v43, %v2088_v51  ;;  %v2506_v19 = vadd.f32 %v9893_v59, %v7055_v38 }
 0x2e5   : > { %v2379_v57 = vpop.f32.mrf.mxu1 }
 0x2e6   : > { %5811 = vrot.lane.b32.xlu1 %v2112_v5, %s7814_s16  ;;  %v2111_v42 = vmax.f32 %v2103_v32, 0.0  ;;  %v2761_v30 = vpop.f32.mrf.mxu0  ;;  %v2501_v8 = vadd.f32 %v9906_v44, %v2379_v57 }
 0x2e8   : > { %5809 = vrot.lane.b32.xlu0 %v2111_v42, %s7814_s16 }
 0x2e9   : > { %v7058_v4 = vpop.f32.mrf.mxu1 }
 0x2ea   : > { %v7142_v36 = vpop.f32.mrf.mxu0  ;;  %v2516_v48 = vadd.f32 %v9918_v14, %v7058_v4 }
 0x2eb   : > { %v2389_v50 = vpop.f32.mrf.mxu1 }
 0x2ec   : > { %v2771_v58 = vpop.f32.mrf.mxu0  ;;  %v2511_v20 = vadd.f32 %v9924_v37, %v2389_v50 }
 0x2ef   : > { %v7061_v27 = vpop.f32.mrf.mxu1 }
 0x2f0   : > { %v7145_v10 = vpop.f32.mrf.mxu0  ;;  %v2526_v42 = vadd.f32 %v9935_v2, %v7061_v27 }
 0x2f1   : > { %v2399_v62 = vpop.f32.mrf.mxu1 }
 0x2f2   : > { %v9966_v35 = vpop.f32.mrf.mxu0  ;;  %v2521_v44 = vadd.f32 %v9940_v29, %v2399_v62 }
 0x2f5   : > { %v7064_v63 = vpop.f32.mrf.mxu1 }
 0x2f6   : > { %v9968_v56 = vpop.f32.mrf.mxu0  ;;  %v2536_v14 = vadd.f32 %v9947_v11, %v7064_v63 }
 0x2f7   : > { %v2409_v43 = vpop.f32.mrf.mxu1 }
 0x2f8   : > { %v9970_v6 = vpop.f32.mrf.mxu0  ;;  %v2531_v2 = vadd.f32 %v9952_v23, %v2409_v43 }
 0x2fb   : > { %v7111_v45 = vpop.f32.mrf.mxu1 }
 0x2fc   : > { %v7195_v7 = vpop.f32.mrf.mxu0  ;;  %v2685_v55 = vadd.f32 %v7111_v45, %v2506_v19 }
 0x2fd   : > { %v2645_v46 = vpop.f32.mrf.mxu1 }
 0x2fe   : > { %v2998_v47 = vpop.f32.mrf.mxu0  ;;  %v2684_v51 = vadd.f32 %v2645_v46, %v2501_v8  ;;  %v2801_v32 = vadd.f32 %v7139_v12, %v2685_v55 }
 0x300   : > { %v2800_v38 = vadd.f32 %v2761_v30, %v2684_v51 }
 0x301   : > { %v7114_v40 = vpop.f32.mrf.mxu1 }
 0x302   : > { %v7198_v26 = vpop.f32.mrf.mxu0  ;;  %v2687_v5 = vadd.f32 %v7114_v40, %v2516_v48 }
 0x303   : > { %v2655_v41 = vpop.f32.mrf.mxu1 }
 0x304   : > { %v3008_v15 = vpop.f32.mrf.mxu0  ;;  %v2686_v0 = vadd.f32 %v2655_v41, %v2511_v20  ;;  %v2803_v13 = vadd.f32 %v7142_v36, %v2687_v5 }
 0x306   : > { %v2802_v12 = vadd.f32 %v2771_v58, %v2686_v0 }
 0x307   : > { %v7117_v49 = vpop.f32.mrf.mxu1 }
 0x308   : > { %v9972_v17 = vpop.f32.mrf.mxu0  ;;  %v2689_v57 = vadd.f32 %v7117_v49, %v2526_v42 }
 0x309   : > { %v2665_v34 = vpop.f32.mrf.mxu1 }
 0x30a   : > { %v9974_v24 = vpop.f32.mrf.mxu0  ;;  %v2688_v4 = vadd.f32 %v2665_v34, %v2521_v44  ;;  %v2805_v41 = vadd.f32 %v7145_v10, %v2689_v57 }
 0x30c   : > { %v2804_v36 = vadd.f32 %v9966_v35, %v2688_v4  ;;  %v9995_v35 = vld [vmem:[%s11585_s6] ss:$0 sm:$0xff] }
 0x30d   : > { %v7120_v1 = vpop.f32.mrf.mxu1 }
 0x30e   : > { %v9976_v60 = vpop.f32.mrf.mxu0  ;;  %v2691_v27 = vadd.f32 %v7120_v1, %v2536_v14 }
 0x30f   : > { %v2675_v61 = vpop.f32.mrf.mxu1 }
 0x310   : > { %v9978_v21 = vpop.f32.mrf.mxu0  ;;  %v2690_v62 = vadd.f32 %v2675_v61, %v2531_v2  ;;  %v2807_v0 = vadd.f32 %v9968_v56, %v2691_v27 }
 0x312   : > { %v2806_v1 = vadd.f32 %v9970_v6, %v2690_v62 }
 0x313   : > { %v7167_v18 = vpop.f32.mrf.mxu1 }
 0x314   : > { %v7251_v9 = vpop.f32.mrf.mxu0  ;;  %v2920_v59 = vadd.f32 %v7167_v18, %v2801_v32 }
 0x315   : > { %v2880_v25 = vpop.f32.mrf.mxu1 }
 0x316   : > { %v3233_v53 = vpop.f32.mrf.mxu0  ;;  %v2919_v19 = vadd.f32 %v2880_v25, %v2800_v38  ;;  %v3038_v40 = vadd.f32 %v7195_v7, %v2920_v59 }
 0x317   : > { %v7170_v39 = vpop.f32.mrf.mxu1 }
 0x318   : > { %v7254_v46 = vpop.f32.mrf.mxu0  ;;  %v2922_v50 = vadd.f32 %v7170_v39, %v2803_v13  ;;  %v3037_v29 = vadd.f32 %v2998_v47, %v2919_v19 }
 0x319   : > { %v2890_v54 = vpop.f32.mrf.mxu1 }
 0x31a   : > { %v2921_v30 = vadd.f32 %v2890_v54, %v2802_v12  ;;  %v3243_v49 = vpop.f32.mrf.mxu0  ;;  %v3040_v34 = vadd.f32 %v7198_v26, %v2922_v50 }
 0x31b   : > { %v7173_v31 = vpop.f32.mrf.mxu1 }
 0x31c   : > { %v2924_v25 = vadd.f32 %v7173_v31, %v2805_v41  ;;  %v3039_v23 = vadd.f32 %v3008_v15, %v2921_v30  ;;  %v7257_v10 = vpop.f32.mrf.mxu0 }
 0x31d   : > { %v2900_v16 = vpop.f32.mrf.mxu1 }
 0x31e   : > { %v2923_v55 = vadd.f32 %v2900_v16, %v2804_v36  ;;  %v3042_v47 = vadd.f32 %v9972_v17, %v2924_v25 }
 0x31f   : > { %v7176_v28 = vpop.f32.mrf.mxu1 }
 0x320   : > { %v2926_v7 = vadd.f32 %v7176_v28, %v2807_v0 }
 0x321   : > { %v2910_v3 = vpop.f32.mrf.mxu1 }
 0x322   : > { %v2925_v56 = vadd.f32 %v2910_v3, %v2806_v1 }
 0x323   : > { %v7223_v22 = vpop.f32.mrf.mxu1 }
 0x324   : > { %v3154_v8 = vadd.f32 %v7223_v22, %v3038_v40  ;;  %v3044_v22 = vadd.f32 %v9976_v60, %v2926_v7  ;;  %v3517_v7 = vld [vmem:[%s11586_s7 + $0x168] sm:$0xff] }
 0x325   : > { %v3114_v52 = vpop.f32.mrf.mxu1 }
 0x326   : > { %v3153_v63 = vadd.f32 %v3114_v52, %v3037_v29  ;;  %v3273_v43 = vadd.f32 %v7251_v9, %v3154_v8  ;;  %v3253_v9 = vpop.f32.mrf.mxu0 }
 0x327   : > { %v7226_v33 = vpop.f32.mrf.mxu1 }
 0x328   : > { %v3156_v58 = vadd.f32 %v7226_v33, %v3040_v34  ;;  %v3272_v54 = vadd.f32 %v3233_v53, %v3153_v63  ;;  %v3041_v33 = vadd.f32 %v9974_v24, %v2923_v55  ;;  %v3043_v53 = vadd.f32 %v9978_v21, %v2925_v56  ;;  %v7260_v3 = vpop.f32.mrf.mxu0  ;;  %v3518_v63 = vld [vmem:[%s11586_s7 + $0x170] sm:$0xff] }
 0x329   : > { %v3124_v45 = vpop.f32.mrf.mxu1 }
 0x32a   : > { %v3155_v26 = vadd.f32 %v3124_v45, %v3039_v23  ;;  %v3275_v6 = vadd.f32 %v7254_v46, %v3156_v58  ;;  %v3263_v4 = vpop.f32.mrf.mxu0 }
 0x32b   : > { %v7229_v37 = vpop.f32.mrf.mxu1 }
 0x32c   : > { %v3158_v31 = vadd.f32 %v7229_v37, %v3042_v47  ;;  %v3274_v5 = vadd.f32 %v3243_v49, %v3155_v26  ;;  %v3506_v47 = vld [vmem:[%s11586_s7 + $0x110] sm:$0xff] }
 0x32d   : > { %v3134_v18 = vpop.f32.mrf.mxu1 }
 0x32e   : > { %v3157_v17 = vadd.f32 %v3134_v18, %v3041_v33  ;;  %v3277_v24 = vadd.f32 %v7257_v10, %v3158_v31  ;;  %v11640_v31 = vld [vmem:[#allocation12_spill] sm:$0xff] }
 0x32f   : > { %v7232_v11 = vpop.f32.mrf.mxu1  ;;  %v11641_v33 = vmax.f32 %v11640_v31, 0.0  ;;  %v3501_v31 = vld [vmem:[%s11586_s7 + $0xe8] sm:$0xff] }
 0x330   : > { %v3160_v42 = vadd.f32 %v7232_v11, %v3044_v22  ;;  %v3276_v57 = vadd.f32 %v3253_v9, %v3157_v17  ;;  %v11643_v17 = vld [vmem:[#allocation20_spill] sm:$0xff]  ;;  %v3516_v22 = vld [vmem:[%s11586_s7 + $0x160] sm:$0xff] }
 0x331   : > { %v3144_v13 = vpop.f32.mrf.mxu1 }
 0x332   : > { %v3159_v45 = vadd.f32 %v3144_v13, %v3043_v53  ;;  %v3279_v37 = vadd.f32 %v7260_v3, %v3160_v42 }
 0x333   : > { %v7279_v61 = vpop.f32.mrf.mxu1 }
 0x334   : > { %v3391_v39 = vadd.f32 %v7279_v61, %v3273_v43  ;;  %v3278_v27 = vadd.f32 %v3263_v4, %v3159_v45  ;;  %v11638_v43 = vld [vmem:[#allocation19_spill] sm:$0xff] }
 0x335   : > { %v3351_v15 = vpop.f32.mrf.mxu1 }
 0x336   : > { %v3406_v16 = vadd.f32 %v9995_v35, %v3391_v39  ;;  %v3390_v28 = vadd.f32 %v3351_v15, %v3272_v54 }
 0x337   : > { %v7282_v48 = vpop.f32.mrf.mxu1 }
 0x338   : > { %v3414_v51 = vmax.f32 %v3406_v16, 0.0  ;;  %v3405_v52 = vadd.f32 %v9995_v35, %v3390_v28  ;;  %v3393_v20 = vadd.f32 %v7282_v48, %v3275_v6  ;;  %v11644_v48 = vld [vmem:[#allocation11_spill] sm:$0xff] }
 0x339   : > { %v3361_v32 = vpop.f32.mrf.mxu1 }
 0x33a   : > { %3445 = vst.msk [vmem:[#allocation3 + $0x21] sm:$0xff] %vm3421_vm5, %v3414_v51  ;;  %v3413_v59 = vmax.f32 %v3405_v52, 0.0  ;;  %v3408_v38 = vadd.f32 %v9995_v35, %v3393_v20  ;;  %v3392_v44 = vadd.f32 %v3361_v32, %v3274_v5  ;;  %v11645_v51 = vmax.f32 %v11644_v48, 0.0  ;;  %v3505_v20 = vld [vmem:[%s11586_s7 + $0x108] sm:$0xff]  ;;  %v3515_v32 = vld [vmem:[%s11586_s7 + $0x158] sm:$0xff] }
 0x33b   : > { %v7285_v60 = vpop.f32.mrf.mxu1 }
 0x33c   : > { %3444 = vst.msk [vmem:[#allocation3 + $0x11] sm:$0xff] %vm3421_vm5, %v3413_v59  ;;  %v3416_v19 = vmax.f32 %v3408_v38, 0.0  ;;  %v3407_v14 = vadd.f32 %v9995_v35, %v3392_v44  ;;  %v3395_v21 = vadd.f32 %v7285_v60, %v3277_v24  ;;  %v3504_v38 = vld [vmem:[%s11586_s7 + $0x100] sm:$0xff] }
 0x33d   : > { %v3371_v46 = vpop.f32.mrf.mxu1 }
 0x33e   : > { %3447 = vst.msk [vmem:[#allocation3 + $0x41] sm:$0xff] %vm3421_vm5, %v3416_v19  ;;  %v3415_v50 = vmax.f32 %v3407_v14, 0.0  ;;  %v3410_v12 = vadd.f32 %v9995_v35, %v3395_v21  ;;  %v3394_v40 = vadd.f32 %v3371_v46, %v3276_v57  ;;  %v11647_v19 = vld [vmem:[#allocation14_spill] sm:$0xff] }
 0x33f   : > { %v7288_v2 = vpop.f32.mrf.mxu1  ;;  %v11648_v14 = vmax.f32 %v11647_v19, 0.0  ;;  %v3497_v19 = vld [vmem:[%s11586_s7 + $0xc8] sm:$0xff] }
 0x340   : > { %3446 = vst.msk [vmem:[#allocation3 + $0x31] sm:$0xff] %vm3421_vm5, %v3415_v50  ;;  %v3418_v41 = vmax.f32 %v3410_v12, 0.0  ;;  %v3409_v18 = vadd.f32 %v9995_v35, %v3394_v40  ;;  %v3397_v30 = vadd.f32 %v7288_v2, %v3279_v37  ;;  %v3514_v37 = vld [vmem:[%s11586_s7 + $0x150] sm:$0xff]  ;;  %v11650_v50 = vld [vmem:[#allocation13_spill] sm:$0xff] }
 0x341   : > { %v3381_v8 = vpop.f32.mrf.mxu1  ;;  %v10011_v29 = vld [vmem:[#allocation3 + $0x20] sm:$0xff]  ;;  %v10013_v62 = vld [vmem:[#allocation3 + $0x28] sm:$0x3]  ;;  %v11651_v12 = vmax.f32 %v11650_v50, 0.0  ;;  %v3503_v2 = vld [vmem:[%s11586_s7 + $0xf8] sm:$0xff] }
 0x342   : > { %3449 = vst.msk [vmem:[#allocation3 + $0x61] sm:$0xff] %vm3421_vm5, %v3418_v41  ;;  %v3417_v49 = vmax.f32 %v3409_v18, 0.0  ;;  %v3412_v25 = vadd.f32 %v9995_v35, %v3397_v30  ;;  %v3396_v36 = vadd.f32 %v3381_v8, %v3278_v27  ;;  %v3602_v55 = vrot.slane %v10011_v29, 1 }
 0x343   : > { %v10021_v11 = vld [vmem:[#allocation3 + $0x10] sm:$0xff]  ;;  %v10026_v34 = vld [vmem:[#allocation3 + $0x18] sm:$0x3]  ;;  %v3603_v23 = vrot.slane %v10013_v62, 1 }
 0x344   : > { %3448 = vst.msk [vmem:[#allocation3 + $0x51] sm:$0xff] %vm3421_vm5, %v3417_v49  ;;  %v3420_v0 = vmax.f32 %v3412_v25, 0.0  ;;  %v3411_v13 = vadd.f32 %v9995_v35, %v3396_v36  ;;  %v3599_v58 = vrot.slane %v10021_v11, 1  ;;  %7350 = vmatmul.mubr.msk.f32.vlgmr.msra.gmra.mxu1 %vm3421_vm5, %v10021_v11  ;;  %v3600_v10 = vrot.slane %v10026_v34, 1  ;;  %v3513_v49 = vld [vmem:[%s11586_s7 + $0x148] sm:$0xff]  ;;  %v3502_v36 = vld [vmem:[%s11586_s7 + $0xf0] sm:$0xff] }
 0x345   : > { %7398 = vmatpush3.msra.mxu1 %v11638_v43  ;;  %7352 = vmatprep.mubr.msk.f32.mxu1 %vm3421_vm5, %v10011_v29  ;;  %v10046_v61 = vld [vmem:[#allocation3 + $0x40] sm:$0xff]  ;;  %v10057_v56 = vld [vmem:[#allocation3 + $0x48] sm:$0x3]  ;;  %v10067_v16 = vsel %vm963_vm2, %v3602_v55, %v3603_v23  ;;  %v3866_v50 = vrot.slane %v10026_v34, 2  ;;  %v11664_v34 = vld [vmem:[#allocation21_spill] sm:$0xff] }
 0x346   : > { %3451 = vst.msk [vmem:[#allocation3 + $0x81] sm:$0xff] %vm3421_vm5, %v3420_v0  ;;  %v3419_v1 = vmax.f32 %v3411_v13, 0.0  ;;  %7399 = vmatprep.subr.mxu1 %v3518_v63  ;;  %v10048_v35 = vpop.permute.xlu1 %5799  ;;  %v10051_v26 = vsel %vm963_vm2, %v3599_v58, %v3600_v10  ;;  %v3608_v5 = vrot.slane %v10046_v61, 1  ;;  %v3609_v53 = vrot.slane %v10057_v56, 1  ;;  %v11653_v0 = vld [vmem:[#allocation16_spill] sm:$0xff]  ;;  %v3512_v10 = vld [vmem:[%s11586_s7 + $0x140] sm:$0xff] }
 0x347   : > { %11639 = vst [vmem:[#allocation19_spill] sm:$0xff] %v10048_v35  ;;  %7400 = vmatpush3.msra.mxu1 %v3518_v63  ;;  %v10053_v39 = vld [vmem:[#allocation3 + $0x30] sm:$0xff]  ;;  %v10055_v54 = vld [vmem:[#allocation3 + $0x38] sm:$0x3]  ;;  %v5886_v15 = vsel %vm3421_vm5, %v11641_v33, %v10048_v35  ;;  %7314 = vmatmul.mubr.msk.f32.vlgmr.msra.gmra.mxu0 %vm3421_vm5, %v10051_v26  ;;  %v11654_v13 = vmax.f32 %v11653_v0, 0.0  ;;  %v3874_v0 = vrot.slane %v10046_v61, 2 }
 0x348   : > { %3450 = vst.msk [vmem:[#allocation3 + $0x71] sm:$0xff] %vm3421_vm5, %v3419_v1  ;;  %7401 = vmatprep.subr.mxu1 %v3517_v7  ;;  %v3605_v28 = vrot.slane %v10053_v39, 1  ;;  %v3606_v6 = vrot.slane %v10055_v54, 1  ;;  %5912 = vst [vmem:[%s10072_s13 + $0x18] sm:$0xff] %v5886_v15  ;;  %v10075_v9 = vpop.permute.xlu0 %5797  ;;  %7362 = vmatpush3.msra.mxu0 %v11643_v17  ;;  %v10125_v4 = vsel %vm963_vm2, %v3608_v5, %v3609_v53  ;;  %v3511_v15 = vld [vmem:[%s11586_s7 + $0x138] sm:$0xff]  ;;  %v3510_v17 = vld [vmem:[%s11586_s7 + $0x130] sm:$0xff] }
 0x349   : > { %11642 = vst [vmem:[#allocation12_spill] sm:$0xff] %v10075_v9  ;;  %7316 = vmatprep.mubr.msk.f32.mxu0 %vm3421_vm5, %v10067_v16  ;;  %v5885_v52 = vsel %vm3421_vm5, %v11645_v51, %v10075_v9  ;;  %7353 = vmatmul.mubr.msk.f32.gmra.mxu1 %vm3421_vm5, %v10053_v39  ;;  %v10112_v44 = vld [vmem:[#allocation3 + $0x60] sm:$0xff]  ;;  %v10116_v45 = vld [vmem:[#allocation3 + $0x68] sm:$0x3]  ;;  %v11662_v53 = vld [vmem:[#allocation17_spill] sm:$0xff] }
 0x34a   : > { %7363 = vmatprep.subr.mxu0 %v3506_v47  ;;  %5909 = vst [vmem:[%s10072_s13] sm:$0xff] %v5885_v52  ;;  %7402 = vmatpush3.msra.mxu1 %v3517_v7  ;;  %v10098_v3 = vsel %vm963_vm2, %v3605_v28, %v3606_v6  ;;  %v3614_v27 = vrot.slane %v10112_v44, 1  ;;  %v3615_v41 = vrot.slane %v10116_v45, 1  ;;  %v11656_v7 = vld [vmem:[#allocation15_spill] sm:$0xff]  ;;  %v3500_v6 = vld [vmem:[%s11586_s7 + $0xe0] sm:$0xff] }
 0x34b   : > { %7355 = vmatprep.mubr.msk.f32.mxu1 %vm3421_vm5, %v10046_v61  ;;  %v10103_v24 = vld [vmem:[#allocation3 + $0x50] sm:$0xff]  ;;  %v10105_v42 = vld [vmem:[#allocation3 + $0x58] sm:$0x3]  ;;  %7364 = vmatpush3.msra.mxu0 %v3506_v47  ;;  %v11657_v1 = vmax.f32 %v11656_v7, 0.0  ;;  %v3509_v5 = vld [vmem:[%s11586_s7 + $0x128] sm:$0xff] }
 0x34c   : > { %7403 = vmatprep.subr.mxu1 %v3516_v22  ;;  %v10107_v59 = vpop.permute.xlu1 %5803  ;;  %7365 = vmatprep.subr.mxu0 %v3505_v20  ;;  %v3611_v60 = vrot.slane %v10103_v24, 1  ;;  %v3612_v57 = vrot.slane %v10105_v42, 1  ;;  %v10173_v23 = vsel %vm963_vm2, %v3614_v27, %v3615_v41  ;;  %v3541_v41 = vld [vmem:[%s11586_s7 + $0x228] sm:$0xff]  ;;  %v3877_v7 = vrot.slane %v10103_v24, 2 }
 0x34d   : > { %11646 = vst [vmem:[#allocation20_spill] sm:$0xff] %v10107_v59  ;;  %7404 = vmatpush3.msra.mxu1 %v3516_v22  ;;  %v5888_v21 = vsel %vm3421_vm5, %v11648_v14, %v10107_v59  ;;  %7317 = vmatmul.mubr.msk.f32.gmra.mxu0 %vm3421_vm5, %v10098_v3  ;;  %v11659_v22 = vld [vmem:[#allocation18_spill] sm:$0xff]  ;;  %v3543_v14 = vld [vmem:[%s11586_s7 + $0x238] sm:$0xff] }
 0x34e   : > { %7405 = vmatprep.subr.mxu1 %v3515_v32  ;;  %5918 = vst [vmem:[%s10072_s13 + $0x48] sm:$0xff] %v5888_v21  ;;  %v10128_v46 = vpop.permute.xlu0 %5801  ;;  %7366 = vmatpush3.msra.mxu0 %v3505_v20  ;;  %v10154_v8 = vsel %vm963_vm2, %v3611_v60, %v3612_v57  ;;  %v11660_v48 = vmax.f32 %v11659_v22, 0.0  ;;  %v3499_v20 = vld [vmem:[%s11586_s7 + $0xd8] sm:$0xff]  ;;  %v3498_v60 = vld [vmem:[%s11586_s7 + $0xd0] sm:$0xff]  ;;  %v3508_v57 = vld [vmem:[%s11586_s7 + $0x120] sm:$0xff] }
 0x34f   : > { %11649 = vst [vmem:[#allocation11_spill] sm:$0xff] %v10128_v46  ;;  %7319 = vmatprep.mubr.msk.f32.mxu0 %vm3421_vm5, %v10125_v4  ;;  %v5887_v40 = vsel %vm3421_vm5, %v11651_v12, %v10128_v46  ;;  %7356 = vmatmul.mubr.msk.f32.gmra.mxu1 %vm3421_vm5, %v10103_v24  ;;  %v10146_v18 = vld [vmem:[#allocation3 + $0x70] sm:$0xff]  ;;  %v10148_v30 = vld [vmem:[#allocation3 + $0x78] sm:$0x3]  ;;  %v3496_v21 = vld [vmem:[%s11586_s7 + $0xc0] sm:$0xff] }
 0x350   : > { %7367 = vmatprep.subr.mxu0 %v3504_v38  ;;  %5915 = vst [vmem:[%s10072_s13 + $0x30] sm:$0xff] %v5887_v40  ;;  %7406 = vmatpush3.msra.mxu1 %v3515_v32  ;;  %v3617_v63 = vrot.slane %v10146_v18, 1  ;;  %v3618_v55 = vrot.slane %v10148_v30, 1  ;;  %v11663_v32 = vmax.f32 %v11662_v53, 0.0  ;;  %v3542_v12 = vld [vmem:[%s11586_s7 + $0x230] sm:$0xff]  ;;  %v3868_v40 = vrot.slane %v10011_v29, 2 }
 0x351   : > { %7358 = vmatprep.mubr.msk.f32.mxu1 %vm3421_vm5, %v10112_v44  ;;  %7368 = vmatpush3.msra.mxu0 %v3504_v38  ;;  %v11665_v22 = vld [vmem:[#allocation10_spill] sm:$0xff] }
 0x352   : > { %7407 = vmatprep.subr.mxu1 %v3514_v37  ;;  %v10159_v25 = vpop.permute.xlu1 %5807  ;;  %7369 = vmatprep.subr.mxu0 %v3503_v2  ;;  %v10194_v33 = vsel %vm963_vm2, %v3617_v63, %v3618_v55  ;;  %v3872_v63 = vrot.slane %v10055_v54, 2  ;;  %v3540_v55 = vld [vmem:[%s11586_s7 + $0x220] sm:$0xff]  ;;  %v4929_v54 = vld [vmem:[#allocation4 + $0x50] sm:$0x3]  ;;  %vm5479_vm7 = vcmp.lt.s32.totalorder %v11665_v22, 1 }
 0x353   : > { %11652 = vst [vmem:[#allocation14_spill] sm:$0xff] %v10159_v25  ;;  %7408 = vmatpush3.msra.mxu1 %v3514_v37  ;;  %v5890_v58 = vsel %vm3421_vm5, %v11654_v13, %v10159_v25  ;;  %7320 = vmatmul.mubr.msk.f32.gmra.mxu0 %vm3421_vm5, %v10154_v8  ;;  %v3865_v37 = vrot.slane %v10021_v11, 2  ;;  %v3875_v13 = vrot.slane %v10057_v56, 2  ;;  %v3539_v56 = vld [vmem:[%s11586_s7 + $0x218] sm:$0xff]  ;;  %v5157_v53 = vrot.slane %v4929_v54, 2  ;;  %v10694_v25 = vld [vmem:[#allocation4 + $0xa8] sm:$0xff] }
 0x354   : > { %7409 = vmatprep.subr.mxu1 %v3513_v49  ;;  %5924 = vst [vmem:[%s10072_s13 + $0x78] sm:$0xff] %v5890_v58  ;;  %v10176_v43 = vpop.permute.xlu0 %5805  ;;  %7370 = vmatpush3.msra.mxu0 %v3503_v2  ;;  %v3869_v2 = vrot.slane %v10013_v62, 2 }
 0x355   : > { %11655 = vst [vmem:[#allocation13_spill] sm:$0xff] %v10176_v43  ;;  %7322 = vmatprep.mubr.msk.f32.mxu0 %vm3421_vm5, %v10173_v23  ;;  %v5889_v47 = vsel %vm3421_vm5, %v11657_v1, %v10176_v43  ;;  %7359 = vmatmul.mubr.msk.f32.gmra.mxu1 %vm3421_vm5, %v10146_v18  ;;  %v10261_v27 = vsel %vm1230_vm3, %v3865_v37, %v3866_v50  ;;  %v3878_v1 = vrot.slane %v10105_v42, 2  ;;  %v3527_v42 = vld [vmem:[%s11586_s7 + $0x1b8] sm:$0xff]  ;;  %v3536_v37 = vld [vmem:[%s11586_s7 + $0x200] sm:$0xff] }
 0x356   : > { %7371 = vmatprep.subr.mxu0 %v3502_v36  ;;  %5921 = vst [vmem:[%s10072_s13 + $0x60] sm:$0xff] %v5889_v47  ;;  %7410 = vmatpush3.msra.mxu1 %v3513_v49  ;;  %v10266_v62 = vsel %vm1230_vm3, %v3868_v40, %v3869_v2  ;;  %v3530_v49 = vld [vmem:[%s11586_s7 + $0x1d0] sm:$0xff] }
 0x357   : > { %7372 = vmatpush3.msra.mxu0 %v3502_v36  ;;  %7411 = vmatprep.subr.mxu1 %v3512_v10  ;;  %v3871_v36 = vrot.slane %v10053_v39, 2  ;;  %v10308_v47 = vld [vmem:[#allocation4 + $0xb0] sm:$0xff] }
 0x358   : > { %7421 = vmatprep.mubr.msk.f32.mxu1 %vm3421_vm5, %v10021_v11  ;;  %v10201_v28 = vpop.permute.xlu1 %5811  ;;  %7373 = vmatprep.subr.mxu0 %v3501_v31  ;;  %v3531_v11 = vld [vmem:[%s11586_s7 + $0x1d8] sm:$0xff] }
 0x359   : > { %11658 = vst [vmem:[#allocation16_spill] sm:$0xff] %v10201_v28  ;;  %7412 = vmatpush3.msra.mxu1 %v3512_v10  ;;  %v5892_v51 = vsel %vm3421_vm5, %v11660_v48, %v10201_v28  ;;  %7323 = vmatmul.mubr.msk.f32.gmra.mxu0 %vm3421_vm5, %v10194_v33  ;;  %v10291_v58 = vsel %vm1230_vm3, %v3871_v36, %v3872_v63  ;;  %v3528_v10 = vld [vmem:[%s11586_s7 + $0x1c0] sm:$0xff]  ;;  %v5482_v48 = vsub.s32 7, %v11665_v22 }
 0x35a   : > { %7413 = vmatprep.subr.mxu1 %v3511_v15  ;;  %5930 = vst [vmem:[%s10072_s13 + $0xa8] sm:$0xff] %v5892_v51  ;;  %v10216_v52 = vpop.permute.xlu0 %5809  ;;  %7374 = vmatpush3.msra.mxu0 %v3501_v31  ;;  %v10311_v31 = vrot.slane %v10308_v47, 1  ;;  %v4935_v51 = vld [vmem:[#allocation4 + $0x118] sm:$0x3] }
 0x35b   : > { %11661 = vst [vmem:[#allocation15_spill] sm:$0xff] %v10216_v52  ;;  %7414 = vmatpush3.msra.mxu1 %v3511_v15  ;;  %v5891_v38 = vsel %vm3421_vm5, %v11663_v32, %v10216_v52  ;;  %7375 = vmatprep.subr.mxu0 %v3500_v6  ;;  %v5037_v15 = vrot.slane %v4929_v54, 1  ;;  %vm5483_vm8 = vcmp.lt.s32.totalorder %v5482_v48, 1 }
 0x35c   : > { %7415 = vmatprep.subr.mxu1 %v3510_v17  ;;  %5927 = vst [vmem:[%s10072_s13 + $0x90] sm:$0xff] %v5891_v38  ;;  %7376 = vmatpush3.msra.mxu0 %v3500_v6  ;;  %v3538_v6 = vld [vmem:[%s11586_s7 + $0x210] sm:$0xff]  ;;  %v3537_v38 = vld [vmem:[%s11586_s7 + $0x208] sm:$0xff] }
 0x35d   : > { %7416 = vmatpush3.msra.mxu1 %v3510_v17  ;;  %7377 = vmatprep.subr.mxu0 %v3499_v20  ;;  %v3880_v17 = vrot.slane %v10112_v44, 2 }
 0x35e   : > { %7417 = vmatprep.subr.mxu1 %v3509_v5  ;;  %7378 = vmatpush3.msra.mxu0 %v3499_v20  ;;  %v5038_v20 = vsel %vm963_vm2, %v10311_v31, %v5037_v15 }
 0x35f   : > { %7418 = vmatpush3.msra.mxu1 %v3509_v5  ;;  %7379 = vmatprep.subr.mxu0 %v3498_v60  ;;  %v10333_v5 = vrot.slane %v10308_v47, 2  ;;  %v5130_v40 = vadd.f32 %v10308_v47, %v5038_v20  ;;  %v3567_v20 = vld [vmem:[%s11586_s7 + $0x2f8] sm:$0xff] }
 0x360   : > { %7419 = vmatprep.subr.mxu1 %v3508_v57  ;;  %7380 = vmatpush3.msra.mxu0 %v3498_v60  ;;  %v3526_v60 = vld [vmem:[%s11586_s7 + $0x1b0] sm:$0xff] }
 0x361   : > { %7420 = vmatpush3.msra.mxu1 %v3508_v57  ;;  %7381 = vmatprep.subr.mxu0 %v3497_v19  ;;  %v5480_v57 = vsel %vm5479_vm7, %v11665_v22, 1 }
 0x362   : > { %7422 = vmatmul.mubr.msk.f32.vlgmr.msra.gmra.mxu1 %vm3421_vm5, %v10011_v29  ;;  %7382 = vmatpush3.msra.mxu0 %v3497_v19  ;;  %v10351_v19 = vld [vmem:[#allocation3 + $0x80] sm:$0xff]  ;;  %v5481_v2 = vadd.s32 1, %v5480_v57 }
 0x363   : > { %7469 = vmatprep.subr.mxu1 %v3543_v14  ;;  %7383 = vmatprep.subr.mxu0 %v3496_v21 }
 0x364   : > { %7424 = vmatprep.mubr.msk.f32.mxu1 %vm3421_vm5, %v10053_v39  ;;  %7470 = vmatpush3.msra.mxu1 %v3543_v14  ;;  %v3529_v39 = vld [vmem:[%s11586_s7 + $0x1c8] sm:$0xff]  ;;  %v3883_v14 = vrot.slane %v10146_v18, 2 }
 0x365   : > { %7384 = vmatpush3.msra.mxu0 %v3496_v21  ;;  %7385 = vmatprep.mubr.msk.f32.mxu0 %vm3421_vm5, %v11664_v34  ;;  %v3884_v21 = vrot.slane %v10148_v30, 2  ;;  %v5158_v30 = vsel %vm1230_vm3, %v10333_v5, %v5157_v53  ;;  %v3520_v53 = vld [vmem:[%s11586_s7 + $0x180] sm:$0xff] }
 0x366   : > { %7471 = vmatprep.subr.mxu1 %v3542_v12  ;;  %7386 = vmatmul.mubr.msk.f32.vlgmr.msra.gmra.mxu0 %vm3421_vm5, %v10261_v27 }
 0x367   : > { %7433 = vmatprep.subr.mxu0 %v3531_v11  ;;  %7472 = vmatpush3.msra.mxu1 %v3542_v12  ;;  %v5046_v12 = vrot.slane %v4935_v51, 1  ;;  %v10369_v34 = vsel %vm1230_vm3, %v3883_v14, %v3884_v21  ;;  %v10418_v14 = vld [vmem:[#allocation4 + $0x130] sm:$0xff] }
 0x368   : > { %7388 = vmatprep.mubr.msk.f32.mxu0 %vm3421_vm5, %v10266_v62  ;;  %7425 = vmatmul.mubr.msk.f32.gmra.mxu1 %vm3421_vm5, %v10046_v61  ;;  %v10296_v61 = vsel %vm1230_vm3, %v3874_v0, %v3875_v13  ;;  %v5250_v0 = vadd.f32 %v5158_v30, %v5130_v40  ;;  %v3534_v13 = vld [vmem:[%s11586_s7 + $0x1f0] sm:$0xff]  ;;  %v10429_v40 = vld [vmem:[#allocation4 + $0x120] sm:$0xff] }
 0x369   : > { %7434 = vmatpush3.msra.mxu0 %v3531_v11  ;;  %7473 = vmatprep.subr.mxu1 %v3541_v41  ;;  %v5484_v11 = vsel %vm5483_vm8, %v5482_v48, 1  ;;  %v10420_v21 = vld [vmem:[#allocation4 + $0x110] sm:$0x3] }
 0x36a   : > { %7427 = vmatprep.mubr.msk.f32.mxu1 %vm3421_vm5, %v10103_v24  ;;  %7435 = vmatprep.subr.mxu0 %v3530_v49  ;;  %v3881_v24 = vrot.slane %v10116_v45, 2  ;;  %v4932_v45 = vld [vmem:[#allocation4 + $0x48] sm:$0xff] }
 0x36b   : > { %7474 = vmatpush3.msra.mxu1 %v3541_v41  ;;  %7436 = vmatpush3.msra.mxu0 %v3530_v49  ;;  %v5045_v50 = vrot.slane %v4932_v45, 1  ;;  %v3535_v41 = vld [vmem:[%s11586_s7 + $0x1f8] sm:$0xff]  ;;  %v5165_v63 = vrot.slane %v4932_v45, 2  ;;  %v5274_v15 = vadd.f32 %v5250_v0, %v4932_v45  ;;  %v5051_v0 = vrot.slane %v10429_v40, 1 }
 0x36c   : > { %7475 = vmatprep.subr.mxu1 %v3540_v55  ;;  %7389 = vmatmul.mubr.msk.f32.gmra.mxu0 %vm3421_vm5, %v10291_v58  ;;  %v10338_v32 = vsel %vm1230_vm3, %v3880_v17, %v3881_v24  ;;  %v4928_v49 = vld [vmem:[#allocation4 + $0x18] sm:$0x3]  ;;  %v10400_v17 = vld [vmem:[#allocation4 + $0x150] sm:$0xff]  ;;  %v10402_v24 = vld [vmem:[#allocation4 + $0xe0] sm:$0x3] }
 0x36d   : > { %7437 = vmatprep.subr.mxu0 %v3529_v39  ;;  %7476 = vmatpush3.msra.mxu1 %v3540_v55  ;;  %v5047_v36 = vsel %vm963_vm2, %v5045_v50, %v5046_v12  ;;  %v5166_v55 = vrot.slane %v4935_v51, 2  ;;  %v5034_v54 = vrot.slane %v4928_v49, 1  ;;  %v5154_v48 = vrot.slane %v4928_v49, 2  ;;  %v3566_v12 = vld [vmem:[%s11586_s7 + $0x2f0] sm:$0xff] }
 0x36e   : > { %7391 = vmatprep.mubr.msk.f32.mxu0 %vm3421_vm5, %v10296_v61  ;;  %7428 = vmatmul.mubr.msk.f32.gmra.mxu1 %vm3421_vm5, %v10112_v44  ;;  %v10328_v44 = vsel %vm1230_vm3, %v3877_v7, %v3878_v1  ;;  %v5133_v7 = vadd.f32 %v5047_v36, %v4932_v45  ;;  %v5316_v57 = vadd.f32 %v5274_v15, %v5047_v36  ;;  %v10461_v15 = vld [vmem:[#allocation4 + $0x1b8] sm:$0x3] }
 0x36f   : > { %7438 = vmatpush3.msra.mxu0 %v3529_v39  ;;  %7477 = vmatprep.subr.mxu1 %v3539_v56  ;;  %v3523_v39 = vld [vmem:[%s11586_s7 + $0x198] sm:$0xff]  ;;  %v5167_v1 = vsel %vm1230_vm3, %v5165_v63, %v5166_v55  ;;  %v5035_v22 = vsel %vm963_vm2, %v10311_v31, %v5034_v54  ;;  %v5155_v30 = vsel %vm1230_vm3, %v10333_v5, %v5154_v48  ;;  %v5042_v63 = vrot.slane %v10418_v14, 1  ;;  %v3565_v54 = vld [vmem:[%s11586_s7 + $0x2e8] sm:$0xff] }
 0x370   : > { %7430 = vmatprep.mubr.msk.f32.mxu1 %vm3421_vm5, %v10146_v18  ;;  %7439 = vmatprep.subr.mxu0 %v3528_v10  ;;  %v3525_v18 = vld [vmem:[%s11586_s7 + $0x1a8] sm:$0xff]  ;;  %v5253_v51 = vadd.f32 %v5167_v1, %v5133_v7  ;;  %v5352_v36 = vadd.f32 %v5316_v57, %v5167_v1  ;;  %v5043_v55 = vrot.slane %v10420_v21, 1  ;;  %v10458_v7 = vld [vmem:[#allocation4 + $0x140] sm:$0xff] }
 0x371   : > { %7478 = vmatpush3.msra.mxu1 %v3539_v56  ;;  %7440 = vmatpush3.msra.mxu0 %v3528_v10  ;;  %v10388_v56 = vadd.s32 %v5484_v11, %v5481_v2  ;;  %v3533_v10 = vld [vmem:[%s11586_s7 + $0x1e8] sm:$0xff]  ;;  %v5174_v11 = vrot.slane %v10400_v17, 2  ;;  %v5063_v57 = vrot.slane %v10458_v7, 1 }
 0x372   : > { %7479 = vmatprep.subr.mxu1 %v3538_v6  ;;  %7392 = vmatmul.mubr.msk.f32.gmra.mxu0 %vm3421_vm5, %v10328_v44  ;;  %v5277_v49 = vadd.f32 %v5253_v51, %v10400_v17  ;;  %v3553_v48 = vld [vmem:[%s11586_s7 + $0x288] sm:$0xff]  ;;  %v5162_v51 = vrot.slane %v10418_v14, 2 }
 0x373   : > { %7441 = vmatprep.subr.mxu0 %v3527_v42  ;;  %7480 = vmatpush3.msra.mxu1 %v3538_v6  ;;  %v3532_v6 = vld [vmem:[%s11586_s7 + $0x1e0] sm:$0xff]  ;;  %v5486_v45 = vmul.u32 2, %v10388_v56  ;;  %v5487_v50 = vmul.u32 3, %v10388_v56 }
 0x374   : > { %7394 = vmatprep.mubr.msk.f32.mxu0 %vm3421_vm5, %v10338_v32  ;;  %7431 = vmatmul.mubr.msk.f32.gmra.mxu1 %vm3421_vm5, %v10351_v19 }
 0x375   : > { %7442 = vmatpush3.msra.mxu0 %v3527_v42  ;;  %7481 = vmatprep.subr.mxu1 %v3537_v38  ;;  %v3521_v42 = vld [vmem:[%s11586_s7 + $0x188] sm:$0xff]  ;;  %v5488_v2 = vcvt.s32.f32 %v5486_v45  ;;  %v5489_v56 = vcvt.s32.f32 %v5487_v50 }
 0x376   : > { %7443 = vmatprep.subr.mxu0 %v3526_v60  ;;  %7482 = vmatpush3.msra.mxu1 %v3537_v38  ;;  %v5054_v38 = vrot.slane %v10400_v17, 1 }
 0x377   : > { %7493 = vmatprep.mubr.msk.f32.mxu1 %vm3421_vm5, %v10261_v27  ;;  %7444 = vmatpush3.msra.mxu0 %v3526_v60  ;;  %v3524_v27 = vld [vmem:[%s11586_s7 + $0x1a0] sm:$0xff]  ;;  %v5055_v60 = vrot.slane %v10402_v24, 1  ;;  %7737 = vrcp.f32 %v5488_v2  ;;  %v10498_v2 = vld [vmem:[#allocation4 + $0x138] sm:$0xff] }
 0x378   : > { %7483 = vmatprep.subr.mxu1 %v3536_v37  ;;  %7395 = vmatmul.mubr.msk.f32.gmra.mxu0 %vm3421_vm5, %v10369_v34  ;;  %7739 = vrcp.f32 %v5489_v56  ;;  %v5184_v56 = vrot.slane %v10461_v15, 2 }
 0x379   : > { %7445 = vmatprep.subr.mxu0 %v3525_v18  ;;  %7484 = vmatpush3.msra.mxu1 %v3536_v37  ;;  %v5129_v37 = vadd.f32 %v10308_v47, %v5035_v22  ;;  %v3555_v47 = vld [vmem:[%s11586_s7 + $0x298] sm:$0xff]  ;;  %v5044_v22 = vsel %vm963_vm2, %v5042_v63, %v5043_v55 }
 0x37a   : > { %7446 = vmatpush3.msra.mxu0 %v3525_v18  ;;  %7457 = vmatprep.mubr.msk.f32.mxu0 %vm3421_vm5, %v10051_v26  ;;  %v3522_v26 = vld [vmem:[%s11586_s7 + $0x190] sm:$0xff]  ;;  %v10431_v18 = vld [vmem:[#allocation4 + $0x60] sm:$0x3]  ;;  %v10511_v63 = vld [vmem:[#allocation3 + $0x98] sm:$0x3] }
 0x37b   : > { %7485 = vmatprep.subr.mxu1 %v3535_v41  ;;  %7447 = vmatprep.subr.mxu0 %v3524_v27 }
 0x37c   : > { %7486 = vmatpush3.msra.mxu1 %v3535_v41  ;;  %7448 = vmatpush3.msra.mxu0 %v3524_v27  ;;  %v5175_v41 = vrot.slane %v10402_v24, 2  ;;  %v5056_v27 = vsel %vm963_vm2, %v5054_v38, %v5055_v60  ;;  %v5171_v38 = vrot.slane %v10429_v40, 2  ;;  %v5172_v60 = vrot.slane %v10431_v18, 2 }
 0x37d   : > { %7487 = vmatprep.subr.mxu1 %v3534_v13  ;;  %7449 = vmatprep.subr.mxu0 %v3523_v39  ;;  %v5319_v1 = vadd.f32 %v5277_v49, %v5056_v27 }
 0x37e   : > { %7488 = vmatpush3.msra.mxu1 %v3534_v13  ;;  %7450 = vmatpush3.msra.mxu0 %v3523_v39  ;;  %v5052_v13 = vrot.slane %v10431_v18, 1  ;;  %v5249_v39 = vadd.f32 %v5155_v30, %v5129_v37  ;;  %v10469_v24 = vsel %vm1230_vm3, %v5174_v11, %v5175_v41  ;;  %v5064_v37 = vrot.slane %v10461_v15, 1  ;;  %v3552_v41 = vld [vmem:[%s11586_s7 + $0x280] sm:$0xff] }
 0x37f   : > { %7489 = vmatprep.subr.mxu1 %v3533_v10  ;;  %7451 = vmatprep.subr.mxu0 %v3522_v26  ;;  %v5355_v50 = vadd.f32 %v5319_v1, %v10469_v24  ;;  %v5132_v11 = vadd.f32 %v5044_v22, %v10418_v14  ;;  %v5060_v1 = vrot.slane %v10498_v2, 1  ;;  %v4486_v15 = vrot.slane %v10511_v63, 1 }
 0x380   : > { %7490 = vmatpush3.msra.mxu1 %v3533_v10  ;;  %7452 = vmatpush3.msra.mxu0 %v3522_v26  ;;  %v3554_v10 = vld [vmem:[%s11586_s7 + $0x290] sm:$0xff]  ;;  %v5136_v26 = vadd.f32 %v5056_v27, %v10400_v17  ;;  %v10479_v45 = vsel %vm963_vm2, %v5051_v0, %v5052_v13  ;;  %v10522_v13 = vsel %vm1230_vm3, %v5171_v38, %v5172_v60 }
 0x381   : > { %7491 = vmatprep.subr.mxu1 %v3532_v6  ;;  %7453 = vmatprep.subr.mxu0 %v3521_v42  ;;  %v3562_v0 = vld [vmem:[%s11586_s7 + $0x2d0] sm:$0xff] }
 0x382   : > { %7492 = vmatpush3.msra.mxu1 %v3532_v6  ;;  %7454 = vmatpush3.msra.mxu0 %v3521_v42  ;;  %v3564_v6 = vld [vmem:[%s11586_s7 + $0x2e0] sm:$0xff]  ;;  %v5376_v42 = vadd.f32 %v5352_v36, %v10400_v17  ;;  %v10484_v17 = vld [vmem:[#allocation3 + $0x88] sm:$0x3]  ;;  %v5256_v18 = vadd.f32 %v10469_v24, %v5136_v26  ;;  %v10509_v36 = vld [vmem:[#allocation3 + $0x90] sm:$0xff]  ;;  %v5379_v26 = vadd.f32 %v5355_v50, %v10458_v7 }
 0x383   : > { %7494 = vmatmul.mubr.msk.f32.vlgmr.msra.gmra.mxu1 %vm3421_vm5, %v10266_v62  ;;  %7541 = vmatprep.subr.mxu1 %v3567_v20  ;;  %v4251_v49 = vrot.slane %v10484_v17, 2  ;;  %v4133_v50 = vrot.slane %v10484_v17, 1 }
 0x384   : > { %7455 = vmatprep.subr.mxu0 %v3520_v53  ;;  %7496 = vmatprep.mubr.msk.f32.mxu1 %vm3421_vm5, %v10291_v58  ;;  %v5418_v30 = vadd.f32 %v5376_v42, %v5056_v27  ;;  %v4485_v42 = vrot.slane %v10509_v36, 1  ;;  %v10566_v17 = vpop.eup %7737 }
 0x385   : > { %7542 = vmatpush3.msra.mxu1 %v3567_v20  ;;  %7456 = vmatpush3.msra.mxu0 %v3520_v53  ;;  %v5163_v20 = vrot.slane %v10420_v21, 2  ;;  %v5273_v53 = vadd.f32 %v5249_v39, %v10418_v14  ;;  %v4250_v21 = vrot.slane %v10351_v19, 2  ;;  %v5135_v14 = vadd.f32 %v10479_v45, %v10429_v40  ;;  %11666 = vst [vmem:[#allocation18_spill] sm:$0xff] %v10566_v17 }
 0x386   : > { %7543 = vmatprep.subr.mxu1 %v3566_v12  ;;  %7458 = vmatmul.mubr.msk.f32.vlgmr.msra.gmra.mxu0 %vm3421_vm5, %v10067_v16  ;;  %v5065_v39 = vsel %vm963_vm2, %v5063_v57, %v5064_v37  ;;  %v3561_v57 = vld [vmem:[%s11586_s7 + $0x2c8] sm:$0xff]  ;;  %v3550_v37 = vld [vmem:[%s11586_s7 + $0x270] sm:$0xff] }
 0x387   : > { %7505 = vmatprep.subr.mxu0 %v3555_v47  ;;  %7544 = vmatpush3.msra.mxu1 %v3566_v12  ;;  %v3563_v12 = vld [vmem:[%s11586_s7 + $0x2d8] sm:$0xff]  ;;  %v5164_v27 = vsel %vm1230_vm3, %v5162_v51, %v5163_v20  ;;  %v5315_v55 = vadd.f32 %v5273_v53, %v5044_v22  ;;  %v5280_v22 = vadd.f32 %v5256_v18, %v10458_v7  ;;  %v4132_v51 = vrot.slane %v10351_v19, 1 }
 0x388   : > { %7460 = vmatprep.mubr.msk.f32.mxu0 %vm3421_vm5, %v10098_v3  ;;  %7497 = vmatmul.mubr.msk.f32.gmra.mxu1 %vm3421_vm5, %v10296_v61  ;;  %v5139_v53 = vadd.f32 %v5065_v39, %v10458_v7  ;;  %v5255_v38 = vadd.f32 %v10522_v13, %v5135_v14  ;;  %v10544_v60 = vsel %vm1230_vm3, %v4250_v21, %v4251_v49  ;;  %v10557_v21 = vld [vmem:[#allocation4 + $0x158] sm:$0xff] }
 0x389   : > { %7506 = vmatpush3.msra.mxu0 %v3555_v47  ;;  %7545 = vmatprep.subr.mxu1 %v3565_v54  ;;  %v10500_v47 = vld [vmem:[#allocation4 + $0x1a8] sm:$0x3]  ;;  %v5351_v20 = vadd.f32 %v5315_v55, %v5164_v27  ;;  %v5421_v18 = vadd.f32 %v5379_v26, %v5065_v39  ;;  %v5322_v55 = vadd.f32 %v5280_v22, %v5065_v39 }
 0x38a   : > { %7499 = vmatprep.mubr.msk.f32.mxu1 %vm3421_vm5, %v10328_v44  ;;  %7507 = vmatprep.subr.mxu0 %v3554_v10  ;;  %v5181_v49 = vrot.slane %v10500_v47, 2  ;;  %v5279_v26 = vadd.f32 %v5255_v38, %v10498_v2  ;;  %v10590_v39 = vsel %vm963_vm2, %v4132_v51, %v4133_v50  ;;  %v4604_v51 = vrot.slane %v10511_v63, 2  ;;  %v10618_v63 = vld [vmem:[#allocation4 + $0x100] sm:$0x3] }
 0x38b   : > { %7546 = vmatpush3.msra.mxu1 %v3565_v54  ;;  %7508 = vmatpush3.msra.mxu0 %v3554_v10  ;;  %v5183_v54 = vrot.slane %v10458_v7, 2  ;;  %v3551_v10 = vld [vmem:[%s11586_s7 + $0x278] sm:$0xff]  ;;  %v5454_v7 = vadd.f32 %v5418_v30, %v10469_v24  ;;  %v3560_v24 = vld [vmem:[%s11586_s7 + $0x2c0] sm:$0xff]  ;;  %v10574_v30 = vsel %vm963_vm2, %v4485_v42, %v4486_v15  ;;  %v5072_v42 = vrot.slane %v10557_v21, 1 }
 0x38c   : > { %7547 = vmatprep.subr.mxu1 %v3564_v6  ;;  %7461 = vmatmul.mubr.msk.f32.gmra.mxu0 %vm3421_vm5, %v10125_v4  ;;  %v3559_v15 = vld [vmem:[%s11586_s7 + $0x2b8] sm:$0xff]  ;;  %v5202_v43 = vrot.slane %v10618_v63, 2 }
 0x38d   : > { %7509 = vmatprep.subr.mxu0 %v3553_v48  ;;  %7548 = vmatpush3.msra.mxu1 %v3564_v6  ;;  %v5061_v6 = vrot.slane %v10500_v47, 1  ;;  %v3549_v47 = vld [vmem:[%s11586_s7 + $0x268] sm:$0xff]  ;;  %v10600_v22 = vmul.f32 %v10566_v17, %v5454_v7 }
 0x38e   : > { %7463 = vmatprep.mubr.msk.f32.mxu0 %vm3421_vm5, %v10154_v8  ;;  %7500 = vmatmul.mubr.msk.f32.gmra.mxu1 %vm3421_vm5, %v10338_v32 }
 0x38f   : > { %7510 = vmatpush3.msra.mxu0 %v3553_v48  ;;  %7549 = vmatprep.subr.mxu1 %v3563_v12  ;;  %v5252_v48 = vadd.f32 %v5164_v27, %v5132_v11  ;;  %v10560_v11 = vsel %vm963_vm2, %v5060_v1, %v5061_v6  ;;  %v10564_v27 = vld [vmem:[#allocation4 + $0x8] sm:$0x3]  ;;  %v10585_v1 = vld [vmem:[#allocation4 + $0x1d8] sm:$0x3] }
 0x390   : > { %7502 = vmatprep.mubr.msk.f32.mxu1 %vm3421_vm5, %v10369_v34  ;;  %7511 = vmatprep.subr.mxu0 %v3552_v41  ;;  %v5138_v6 = vadd.f32 %v10560_v11, %v10498_v2  ;;  %v5070_v7 = vrot.slane %v10585_v1, 1 }
 0x391   : > { %7550 = vmatpush3.msra.mxu1 %v3563_v12  ;;  %7512 = vmatpush3.msra.mxu0 %v3552_v41  ;;  %v5185_v12 = vsel %vm1230_vm3, %v5183_v54, %v5184_v56  ;;  %v5180_v41 = vrot.slane %v10498_v2, 2  ;;  %v5276_v14 = vadd.f32 %v5252_v48, %v10429_v40  ;;  %v5375_v54 = vadd.f32 %v5351_v20, %v10429_v40  ;;  %v10606_v20 = vpop.eup %7739 }
 0x392   : > { %7551 = vmatprep.subr.mxu1 %v3562_v0  ;;  %7464 = vmatmul.mubr.msk.f32.gmra.mxu0 %vm3421_vm5, %v10173_v23  ;;  %v5259_v56 = vadd.f32 %v5185_v12, %v5139_v53  ;;  %v5073_v40 = vrot.slane %v10564_v27, 1  ;;  %v3548_v53 = vld [vmem:[%s11586_s7 + $0x260] sm:$0xff]  ;;  %v5358_v38 = vadd.f32 %v5322_v55, %v5185_v12 }
 0x393   : > { %7513 = vmatprep.subr.mxu0 %v3551_v10  ;;  %7552 = vmatpush3.msra.mxu1 %v3562_v0  ;;  %v4603_v0 = vrot.slane %v10509_v36, 2  ;;  %v10603_v48 = vsel %vm1230_vm3, %v5180_v41, %v5181_v49  ;;  %v5417_v41 = vadd.f32 %v5375_v54, %v10479_v45  ;;  %v5321_v49 = vadd.f32 %v5279_v26, %v10560_v11  ;;  %v10648_v26 = vld [vmem:[#allocation4 + $0xc0] sm:$0xff] }
 0x394   : > { %7466 = vmatprep.mubr.msk.f32.mxu0 %vm3421_vm5, %v10194_v33  ;;  %7503 = vmatmul.mubr.msk.f32.gmra.mxu1 %vm3421_vm5, %v10544_v60  ;;  %v5258_v55 = vadd.f32 %v10603_v48, %v5138_v6 }
 0x395   : > { %7514 = vmatpush3.msra.mxu0 %v3551_v10  ;;  %7553 = vmatprep.subr.mxu1 %v3561_v57  ;;  %v10582_v10 = vld [vmem:[#allocation4 + $0xf0] sm:$0xff]  ;;  %v5453_v52 = vadd.f32 %v5417_v41, %v10522_v13  ;;  %v5357_v28 = vadd.f32 %v5321_v49, %v10603_v48 }
 0x396   : > { %7515 = vmatprep.subr.mxu0 %v3550_v37  ;;  %7554 = vmatpush3.msra.mxu1 %v3561_v57  ;;  %v5318_v57 = vadd.f32 %v5276_v14, %v10479_v45  ;;  %v5069_v50 = vrot.slane %v10582_v10, 1  ;;  %v10635_v14 = vsel %vm963_vm2, %v5072_v42, %v5073_v40  ;;  %v5192_v45 = vrot.slane %v10557_v21, 2  ;;  %v10652_v40 = vld [vmem:[#allocation4 + $0x1d0] sm:$0x3] }
 0x397   : > { %7565 = vmatprep.mubr.msk.f32.mxu1 %vm3421_vm5, %v10067_v16  ;;  %7516 = vmatpush3.msra.mxu0 %v3550_v37  ;;  %v5457_v16 = vadd.f32 %v5421_v18, %v5185_v12  ;;  %v10614_v37 = vld [vmem:[#allocation4 + $0xa0] sm:$0xff]  ;;  %v3558_v18 = vld [vmem:[%s11586_s7 + $0x2b0] sm:$0xff]  ;;  %v10625_v12 = vadd.f32 %v5259_v56, %v10557_v21  ;;  %v10646_v56 = vsel %vm1230_vm3, %v4603_v0, %v4604_v51  ;;  %v5082_v42 = vrot.slane %v10618_v63, 1  ;;  %v5547_v63 = vld [vmem:[%s11588_s9 + $0xf8] sm:$0xff] }
 0x398   : > { %7555 = vmatprep.subr.mxu1 %v3560_v24  ;;  %7467 = vmatmul.mubr.msk.f32.gmra.mxu0 %vm3421_vm5, %v10590_v39  ;;  %v5081_v6 = vrot.slane %v10614_v37, 1  ;;  %v5189_v0 = vrot.slane %v10582_v10, 2  ;;  %v5190_v51 = vrot.slane %v10585_v1, 2  ;;  %v5282_v1 = vadd.f32 %v5258_v55, %v10582_v10  ;;  %v3544_v55 = vld [vmem:[%s11586_s7 + $0x240] sm:$0xff] }
 0x399   : > { %7517 = vmatprep.subr.mxu0 %v3549_v47  ;;  %7556 = vmatpush3.msra.mxu1 %v3560_v24  ;;  %v3547_v24 = vld [vmem:[%s11586_s7 + $0x258] sm:$0xff]  ;;  %v10643_v54 = vmul.f32 %v10606_v20, %v5457_v16  ;;  %v10659_v16 = vsel %vm963_vm2, %v5069_v50, %v5070_v7  ;;  %v3545_v50 = vld [vmem:[%s11586_s7 + $0x248] sm:$0xff] }
 0x39a   : > { %7518 = vmatpush3.msra.mxu0 %v3549_v47  ;;  %7529 = vmatprep.mubr.msk.f32.mxu0 %vm3421_vm5, %v10011_v29  ;;  %v5193_v47 = vrot.slane %v10564_v27, 2  ;;  %v3557_v29 = vld [vmem:[%s11586_s7 + $0x2a8] sm:$0xff]  ;;  %v3546_v27 = vld [vmem:[%s11586_s7 + $0x250] sm:$0xff]  ;;  %v5141_v41 = vadd.f32 %v10659_v16, %v10582_v10  ;;  %v10682_v49 = vsel %vm963_vm2, %v5081_v6, %v5082_v42  ;;  %v10696_v6 = vld [vmem:[#allocation4 + $0xb8] sm:$0x3]  ;;  %v10702_v42 = vmul.f32 %v10566_v17, %v5453_v52 }
 0x39b   : > { %7557 = vmatprep.subr.mxu1 %v3559_v15  ;;  %7519 = vmatprep.subr.mxu0 %v3548_v53  ;;  %v5198_v52 = vrot.slane %v10648_v26, 2 }
 0x39c   : > { %7558 = vmatpush3.msra.mxu1 %v3559_v15  ;;  %7520 = vmatpush3.msra.mxu0 %v3548_v53  ;;  %v5354_v15 = vadd.f32 %v5318_v57, %v10522_v13  ;;  %v3556_v53 = vld [vmem:[%s11586_s7 + $0x2a0] sm:$0xff]  ;;  %v5142_v57 = vadd.f32 %v10635_v14, %v10557_v21  ;;  %v10675_v7 = vsel %vm1230_vm3, %v5192_v45, %v5193_v47  ;;  %v5079_v13 = vrot.slane %v10652_v40, 1 }
 0x39d   : > { %7559 = vmatprep.subr.mxu1 %v3558_v18  ;;  %7521 = vmatprep.subr.mxu0 %v3547_v24  ;;  %v5382_v47 = vadd.f32 %v5358_v38, %v10557_v21  ;;  %v5381_v21 = vadd.f32 %v5357_v28, %v10582_v10  ;;  %v5531_v38 = vld [vmem:[%s11588_s9 + $0x78] sm:$0xff]  ;;  %v5546_v28 = vld [vmem:[%s11588_s9 + $0xf0] sm:$0xff] }
 0x39e   : > { %7560 = vmatpush3.msra.mxu1 %v3558_v18  ;;  %7522 = vmatpush3.msra.mxu0 %v3547_v24  ;;  %v5078_v18 = vrot.slane %v10648_v26, 1  ;;  %v5201_v24 = vrot.slane %v10614_v37, 2  ;;  %v5378_v45 = vadd.f32 %v5354_v15, %v10498_v2  ;;  %v5262_v2 = vadd.f32 %v10675_v7, %v5142_v57 }
 0x39f   : > { %7561 = vmatprep.subr.mxu1 %v3557_v29  ;;  %7523 = vmatprep.subr.mxu0 %v3546_v27  ;;  %v5325_v57 = vadd.f32 %v10625_v12, %v10635_v14  ;;  %v3578_v12 = vld [vmem:[%s11586_s7 + $0x350] sm:$0xff] }
 0x3a0   : > { %7562 = vmatpush3.msra.mxu1 %v3557_v29  ;;  %7524 = vmatpush3.msra.mxu0 %v3546_v27  ;;  %v10692_v29 = vsel %vm1230_vm3, %v5189_v0, %v5190_v51  ;;  %v5145_v27 = vadd.f32 %v10682_v49, %v10614_v37  ;;  %v10714_v15 = vsel %vm963_vm2, %v5078_v18, %v5079_v13  ;;  %v5199_v0 = vrot.slane %v10652_v40, 2  ;;  %v7744_v18 = vld [vmem:[#allocation3 + $0x30] sm:$0xff] }
 0x3a1   : > { %7563 = vmatprep.subr.mxu1 %v3556_v53  ;;  %7525 = vmatprep.subr.mxu0 %v3545_v50  ;;  %v5261_v10 = vadd.f32 %v10692_v29, %v5141_v41  ;;  %v10728_v51 = vsel %vm1230_vm3, %v5201_v24, %v5202_v43  ;;  %v5091_v40 = vrot.slane %v10696_v6, 1  ;;  %v5530_v43 = vld [vmem:[%s11588_s9 + $0x70] sm:$0xff]  ;;  %v5286_v13 = vadd.f32 %v5262_v2, %v10614_v37 }
 0x3a2   : > { %7564 = vmatpush3.msra.mxu1 %v3556_v53  ;;  %7526 = vmatpush3.msra.mxu0 %v3545_v50  ;;  %v5090_v53 = vrot.slane %v10694_v25, 1  ;;  %v5424_v50 = vadd.f32 %v5382_v47, %v10635_v14  ;;  %v5324_v41 = vadd.f32 %v5282_v1, %v10659_v16  ;;  %v5423_v14 = vadd.f32 %v5381_v21, %v10659_v16  ;;  %v5545_v1 = vld [vmem:[%s11588_s9 + $0xe8] sm:$0xff] }
 0x3a3   : > { %7566 = vmatmul.mubr.msk.f32.vlgmr.msra.gmra.mxu1 %vm3421_vm5, %v10098_v3  ;;  %7527 = vmatprep.subr.mxu0 %v3544_v55  ;;  %v3579_v3 = vld [vmem:[%s11586_s7 + $0x358] sm:$0xff]  ;;  %v5265_v24 = vadd.f32 %v10728_v51, %v5145_v27  ;;  %v5285_v47 = vadd.f32 %v5261_v10, %v10648_v26  ;;  %v5210_v2 = vrot.slane %v10694_v25, 2  ;;  %v5211_v21 = vrot.slane %v10696_v6, 2  ;;  %v3577_v27 = vld [vmem:[%s11586_s7 + $0x348] sm:$0xff]  ;;  %v5544_v6 = vld [vmem:[%s11588_s9 + $0xe0] sm:$0xff] }
 0x3a4   : > { %7568 = vmatprep.mubr.msk.f32.mxu1 %vm3421_vm5, %v10125_v4  ;;  %6705 = vmatprep.subr.mxu1 %v5547_v63  ;;  %v5420_v4 = vadd.f32 %v5378_v45, %v10560_v11  ;;  %v5144_v11 = vadd.f32 %v10714_v15, %v10648_v26  ;;  %v7745_v45 = vld [vmem:[#allocation3 + $0x40] sm:$0xff]  ;;  %v10762_v16 = vsel %vm963_vm2, %v5090_v53, %v5091_v40 }
 0x3a5   : > { %7528 = vmatpush3.msra.mxu0 %v3544_v55  ;;  %6706 = vmatpush3.msra.mxu1 %v5531_v38  ;;  %v10750_v55 = vsel %vm1230_vm3, %v5198_v52, %v5199_v0  ;;  %v10759_v63 = vld [vmem:[#allocation4 + $0x40] sm:$0xff]  ;;  %v5361_v0 = vadd.f32 %v5325_v57, %v10675_v7  ;;  %v5328_v10 = vadd.f32 %v5286_v13, %v10682_v49 }
 0x3a6   : > { %7530 = vmatmul.mubr.msk.f32.vlgmr.msra.gmra.mxu0 %vm3421_vm5, %v7744_v18  ;;  %7577 = vmatprep.subr.mxu0 %v3579_v3  ;;  %v10766_v38 = vld [vmem:[#allocation4 + $0x1a0] sm:$0x3]  ;;  %v5456_v52 = vadd.f32 %v5420_v4, %v10603_v48  ;;  %v5264_v53 = vadd.f32 %v10750_v55, %v5144_v11  ;;  %v10787_v48 = vld [vmem:[#allocation4 + $0x88] sm:$0x3]  ;;  %v5087_v4 = vrot.slane %v10759_v63, 1  ;;  %v5327_v13 = vadd.f32 %v5285_v47, %v10714_v15 }
 0x3a7   : > { %6707 = vmatprep.subr.mxu1 %v5546_v28  ;;  %7532 = vmatprep.mubr.msk.f32.mxu0 %vm3421_vm5, %v7745_v45  ;;  %v5460_v28 = vadd.f32 %v5424_v50, %v10675_v7  ;;  %v10785_v40 = vld [vmem:[#allocation4 + $0x20] sm:$0xff]  ;;  %v5289_v7 = vadd.f32 %v5265_v24, %v10694_v25  ;;  %v5088_v57 = vrot.slane %v10766_v38, 1  ;;  %v7746_v50 = vld [vmem:[#allocation3 + $0x50] sm:$0xff]  ;;  %v5364_v47 = vadd.f32 %v5328_v10, %v10728_v51 }
 0x3a8   : > { %7569 = vmatmul.mubr.msk.f32.gmra.mxu1 %vm3421_vm5, %v10154_v8  ;;  %7578 = vmatpush3.msra.mxu0 %v3579_v3  ;;  %v5529_v8 = vld [vmem:[%s11588_s9 + $0x68] sm:$0xff]  ;;  %v5360_v3 = vadd.f32 %v5324_v41, %v10692_v29  ;;  %v5528_v18 = vld [vmem:[%s11588_s9 + $0x60] sm:$0xff]  ;;  %v10801_v41 = vsel %vm1230_vm3, %v5210_v2, %v5211_v21  ;;  %v5099_v45 = vrot.slane %v10785_v40, 1  ;;  %v5385_v2 = vadd.f32 %v5361_v0, %v10614_v37 }
 0x3a9   : > { %6708 = vmatpush3.msra.mxu1 %v5530_v43  ;;  %7571 = vmatprep.mubr.msk.f32.mxu1 %vm3421_vm5, %v10173_v23  ;;  %v5148_v23 = vadd.f32 %v10762_v16, %v10694_v25  ;;  %v5459_v43 = vadd.f32 %v5423_v14, %v10692_v29  ;;  %v3576_v11 = vld [vmem:[%s11586_s7 + $0x340] sm:$0xff]  ;;  %v10810_v24 = vmul.f32 %v10606_v20, %v5460_v28  ;;  %v5100_v29 = vrot.slane %v10787_v48, 1  ;;  %v10826_v28 = vld [vmem:[#allocation4 + $0x58] sm:$0x3] }
 0x3aa   : > { %7579 = vmatprep.subr.mxu0 %v3578_v12  ;;  %6709 = vmatprep.subr.mxu1 %v5545_v1  ;;  %v7747_v14 = vld [vmem:[#allocation3 + $0x60] sm:$0xff]  ;;  %v5543_v1 = vld [vmem:[%s11588_s9 + $0xd8] sm:$0xff]  ;;  %v5288_v21 = vadd.f32 %v5264_v53, %v10759_v63  ;;  %v5331_v10 = vadd.f32 %v5289_v7, %v10762_v16  ;;  %v5089_v37 = vsel %vm963_vm2, %v5087_v4, %v5088_v57  ;;  %v5208_v0 = vrot.slane %v10766_v38, 2  ;;  %v5542_v53 = vld [vmem:[%s11588_s9 + $0xd0] sm:$0xff] }
 0x3ab   : > { %7580 = vmatpush3.msra.mxu0 %v3578_v12  ;;  %6710 = vmatpush3.msra.mxu1 %v5529_v8  ;;  %v10807_v12 = vmul.f32 %v10606_v20, %v5456_v52  ;;  %v10823_v8 = vld [vmem:[#allocation4 + $0x38] sm:$0xff]  ;;  %v5207_v52 = vrot.slane %v10759_v63, 2  ;;  %v5363_v7 = vadd.f32 %v5327_v13, %v10750_v55  ;;  %v5384_v4 = vadd.f32 %v5360_v3, %v10648_v26  ;;  %v5526_v26 = vld [vmem:[%s11588_s9 + $0x50] sm:$0xff] }
 0x3ac   : > { %7533 = vmatmul.mubr.msk.f32.gmra.mxu0 %vm3421_vm5, %v7746_v50  ;;  %7581 = vmatprep.subr.mxu0 %v3577_v27  ;;  %v5219_v38 = vrot.slane %v10785_v40, 2  ;;  %v5220_v57 = vrot.slane %v10787_v48, 2  ;;  %v5096_v50 = vrot.slane %v10823_v8, 1  ;;  %v3574_v3 = vld [vmem:[%s11586_s7 + $0x330] sm:$0xff]  ;;  %v5388_v13 = vadd.f32 %v5364_v47, %v10694_v25  ;;  %v5525_v25 = vld [vmem:[%s11588_s9 + $0x48] sm:$0xff] }
 0x3ad   : > { %6711 = vmatprep.subr.mxu1 %v5544_v6  ;;  %7535 = vmatprep.mubr.msk.f32.mxu0 %vm3421_vm5, %v7747_v14  ;;  %v5268_v6 = vadd.f32 %v10801_v41, %v5148_v23  ;;  %v10844_v23 = vmul.f32 %v10606_v20, %v5459_v43  ;;  %v7748_v43 = vld [vmem:[#allocation3 + $0x70] sm:$0xff]  ;;  %v5147_v48 = vadd.f32 %v5089_v37, %v10759_v63 }
 0x3ae   : > { %7572 = vmatmul.mubr.msk.f32.gmra.mxu1 %vm3421_vm5, %v10194_v33  ;;  %7582 = vmatpush3.msra.mxu0 %v3577_v27  ;;  %v5527_v33 = vld [vmem:[%s11588_s9 + $0x58] sm:$0xff]  ;;  %v5367_v14 = vadd.f32 %v5331_v10, %v10801_v41  ;;  %v5427_v47 = vadd.f32 %v5385_v2, %v10682_v49  ;;  %v5217_v2 = vrot.slane %v10826_v28, 2  ;;  %v5426_v10 = vadd.f32 %v5384_v4, %v10714_v15 }
 0x3af   : > { %6712 = vmatpush3.msra.mxu1 %v5528_v18  ;;  %7574 = vmatprep.mubr.msk.f32.mxu1 %vm3421_vm5, %v10590_v39  ;;  %v3575_v27 = vld [vmem:[%s11586_s7 + $0x338] sm:$0xff]  ;;  %v10850_v39 = vsel %vm963_vm2, %v5099_v45, %v5100_v29  ;;  %v5097_v18 = vrot.slane %v10826_v28, 1  ;;  %v5541_v45 = vld [vmem:[%s11588_s9 + $0xc8] sm:$0xff]  ;;  %v5292_v29 = vadd.f32 %v5268_v6, %v10785_v40  ;;  %v10886_v6 = vsel %vm1230_vm3, %v5219_v38, %v5220_v57  ;;  %v5524_v38 = vld [vmem:[%s11588_s9 + $0x40] sm:$0xff] }
 0x3b0   : > { %7583 = vmatprep.subr.mxu0 %v3576_v11  ;;  %6713 = vmatprep.subr.mxu1 %v5543_v1  ;;  %v5209_v1 = vsel %vm1230_vm3, %v5207_v52, %v5208_v0  ;;  %v3573_v52 = vld [vmem:[%s11586_s7 + $0x328] sm:$0xff]  ;;  %v3572_v28 = vld [vmem:[%s11586_s7 + $0x320] sm:$0xff]  ;;  %v5430_v15 = vadd.f32 %v5388_v13, %v10762_v16  ;;  %v5391_v57 = vadd.f32 %v5367_v14, %v10785_v40  ;;  %v5523_v16 = vld [vmem:[%s11588_s9 + $0x38] sm:$0xff] }
 0x3b1   : > { %7584 = vmatpush3.msra.mxu0 %v3576_v11  ;;  %6714 = vmatpush3.msra.mxu1 %v5527_v33  ;;  %v5330_v11 = vadd.f32 %v5288_v21, %v5089_v37  ;;  %v5387_v21 = vadd.f32 %v5363_v7, %v10759_v63  ;;  %v5151_v33 = vadd.f32 %v10850_v39, %v10785_v40  ;;  %v5216_v63 = vrot.slane %v10823_v8, 2  ;;  %v10896_v7 = vld [vmem:[#allocation4 + $0x178] sm:$0x3]  ;;  %v5522_v14 = vld [vmem:[%s11588_s9 + $0x30] sm:$0xff] }
 0x3b2   : > { %7536 = vmatmul.mubr.msk.f32.gmra.mxu0 %vm3421_vm5, %v7748_v43  ;;  %7585 = vmatprep.subr.mxu0 %v3575_v27  ;;  %v10889_v49 = vsel %vm963_vm2, %v5096_v50, %v5097_v18  ;;  %v5267_v0 = vadd.f32 %v5209_v1, %v5147_v48  ;;  %v5334_v4 = vadd.f32 %v5292_v29, %v10850_v39  ;;  %v3571_v40 = vld [vmem:[%s11586_s7 + $0x318] sm:$0xff]  ;;  %v5307_v13 = vrot.slane %v10896_v7, 1  ;;  %v10937_v29 = vld [vmem:[#allocation4 + $0xe8] sm:$0x3] }
 0x3b3   : > { %6715 = vmatprep.subr.mxu1 %v5542_v53  ;;  %7538 = vmatprep.mubr.msk.f32.mxu0 %vm3421_vm5, %v10351_v19  ;;  %v5540_v19 = vld [vmem:[%s11588_s9 + $0xc0] sm:$0xff]  ;;  %v10894_v53 = vld [vmem:[#allocation4 + $0xc8] sm:$0xff]  ;;  %v5429_v50 = vadd.f32 %v5387_v21, %v5089_v37  ;;  %v5271_v18 = vadd.f32 %v10886_v6, %v5151_v33  ;;  %v5150_v43 = vadd.f32 %v10889_v49, %v10823_v8 }
 0x3b4   : > { %7586 = vmatpush3.msra.mxu0 %v3575_v27  ;;  %6716 = vmatpush3.msra.mxu1 %v5526_v26  ;;  %v5366_v27 = vadd.f32 %v5330_v11, %v5209_v1  ;;  %v5463_v26 = vadd.f32 %v5427_v47, %v10728_v51  ;;  %v10925_v37 = vsel %vm1230_vm3, %v5216_v63, %v5217_v2  ;;  %v10935_v51 = vld [vmem:[#allocation4 + $0x68] sm:$0xff]  ;;  %v5343_v63 = vrot.slane %v10896_v7, 2 }
 0x3b5   : > { %7587 = vmatprep.subr.mxu0 %v3574_v3  ;;  %6717 = vmatprep.subr.mxu1 %v5541_v45  ;;  %v5462_v48 = vadd.f32 %v5426_v10, %v10750_v55  ;;  %v5291_v11 = vadd.f32 %v5267_v0, %v10823_v8  ;;  %v5370_v55 = vadd.f32 %v5334_v4, %v10886_v6  ;;  %v5303_v2 = vrot.slane %v10935_v51, 1  ;;  %v3569_v10 = vld [vmem:[%s11586_s7 + $0x308] sm:$0xff]  ;;  %v5536_v0 = vld [vmem:[%s11588_s9 + $0xa0] sm:$0xff] }
 0x3b6   : > { %7588 = vmatpush3.msra.mxu0 %v3574_v3  ;;  %6718 = vmatpush3.msra.mxu1 %v5525_v25  ;;  %v5306_v3 = vrot.slane %v10894_v53, 1  ;;  %v5390_v45 = vadd.f32 %v5366_v27, %v10823_v8  ;;  %v5466_v25 = vadd.f32 %v5430_v15, %v10801_v41  ;;  %v5433_v47 = vadd.f32 %v5391_v57, %v10850_v39  ;;  %v3570_v8 = vld [vmem:[%s11586_s7 + $0x310] sm:$0xff]  ;;  %v5521_v39 = vld [vmem:[%s11588_s9 + $0x28] sm:$0xff]  ;;  %v5520_v15 = vld [vmem:[%s11588_s9 + $0x20] sm:$0xff] }
 0x3b7   : > { %7539 = vmatmul.mubr.msk.f32.gmra.mxu0 %vm3421_vm5, %v10509_v36  ;;  %7589 = vmatprep.subr.mxu0 %v3573_v52  ;;  %v5539_v36 = vld [vmem:[%s11588_s9 + $0xb8] sm:$0xff]  ;;  %v5465_v21 = vadd.f32 %v5429_v50, %v5209_v1  ;;  %v5270_v33 = vadd.f32 %v10925_v37, %v5150_v43  ;;  %v5342_v41 = vrot.slane %v10894_v53, 2  ;;  %v5304_v1 = vrot.slane %v10937_v29, 1  ;;  %v10984_v50 = vld [vmem:[#allocation4 + $0x180] sm:$0xff] }
 0x3b8   : > { %6719 = vmatprep.subr.mxu1 %v5540_v19  ;;  %7590 = vmatpush3.msra.mxu0 %v3573_v52  ;;  %v5295_v52 = vadd.f32 %v5271_v18, %v10894_v53  ;;  %v5308_v19 = vsel %vm963_vm2, %v5306_v3, %v5307_v13  ;;  %v10970_v27 = vmul.f32 %v10606_v20, %v5463_v26  ;;  %v10986_v18 = vld [vmem:[#allocation4 + $0x98] sm:$0x3] }
 0x3b9   : > { %7601 = vmatprep.mubr.msk.f32.mxu0 %vm3421_vm5, %v10266_v62  ;;  %6720 = vmatpush3.msra.mxu1 %v5524_v38  ;;  %v5538_v62 = vld [vmem:[%s11588_s9 + $0xb0] sm:$0xff]  ;;  %v5333_v38 = vadd.f32 %v5291_v11, %v10889_v49  ;;  %v5432_v7 = vadd.f32 %v5390_v45, %v10889_v49  ;;  %v10980_v4 = vmul.f32 %v10606_v20, %v5462_v48  ;;  %v3568_v49 = vld [vmem:[%s11586_s7 + $0x300] sm:$0xff]  ;;  %v5535_v43 = vld [vmem:[%s11588_s9 + $0x98] sm:$0xff] }
 0x3ba   : > { %7591 = vmatprep.subr.mxu0 %v3572_v28  ;;  %7575 = vmatmul.mubr.msk.f32.gmra.mxu1 %vm3421_vm5, %v10574_v30  ;;  %v5537_v30 = vld [vmem:[%s11588_s9 + $0xa8] sm:$0xff]  ;;  %v5469_v57 = vadd.f32 %v5433_v47, %v10886_v6  ;;  %v5337_v6 = vadd.f32 %v5308_v19, %v5295_v52  ;;  %v11002_v26 = vmul.f32 %v10606_v20, %v5465_v21  ;;  %v5534_v45 = vld [vmem:[%s11588_s9 + $0x90] sm:$0xff]  ;;  %v5049_v47 = vrot.slane %v10986_v18, 1 }
 0x3bb   : > { %6721 = vmatprep.subr.mxu1 %v5539_v36  ;;  %7592 = vmatpush3.msra.mxu0 %v3572_v28  ;;  %v10974_v28 = vld [vmem:[#allocation4 + $0x168] sm:$0x3]  ;;  %v5394_v36 = vadd.f32 %v5370_v55, %v10894_v53  ;;  %v5294_v53 = vadd.f32 %v5270_v33, %v10935_v51  ;;  %v5344_v3 = vsel %vm1230_vm3, %v5342_v41, %v5343_v63  ;;  %v5048_v55 = vrot.slane %v10984_v50, 1  ;;  %v11038_v63 = vld [vmem:[#allocation4 + $0x80] sm:$0xff] }
 0x3bc   : > { %6722 = vmatpush3.msra.mxu1 %v5523_v16  ;;  %7593 = vmatprep.subr.mxu0 %v3571_v40  ;;  %v10995_v16 = vmul.f32 %v10606_v20, %v5466_v25  ;;  %v11006_v13 = vsel %vm963_vm2, %v5303_v2, %v5304_v1  ;;  %v11010_v48 = vld [vmem:[#allocation4 + $0x188] sm:$0x3]  ;;  %v5040_v11 = vrot.slane %v10974_v28, 1  ;;  %v5468_v25 = vadd.f32 %v5432_v7, %v10925_v37 }
 0x3bd   : > { %6723 = vmatprep.subr.mxu1 %v5538_v62  ;;  %7594 = vmatpush3.msra.mxu0 %v3571_v40  ;;  %v5519_v40 = vld [vmem:[%s11588_s9 + $0x18] sm:$0xff]  ;;  %v11008_v62 = vld [vmem:[#allocation4 + $0x108] sm:$0xff]  ;;  %v5436_v21 = vadd.f32 %v5394_v36, %v5308_v19  ;;  %v5339_v33 = vrot.slane %v10935_v51, 2  ;;  %v5340_v52 = vrot.slane %v10937_v29, 2  ;;  %v11033_v41 = vadd.f32 %v5344_v3, %v5337_v6 }
 0x3be   : > { %6724 = vmatpush3.msra.mxu1 %v5522_v14  ;;  %7595 = vmatprep.subr.mxu0 %v3570_v8  ;;  %v5369_v14 = vadd.f32 %v5333_v38, %v10925_v37  ;;  %v5518_v37 = vld [vmem:[%s11588_s9 + $0x10] sm:$0xff]  ;;  %v11040_v2 = vld [vmem:[#allocation4 + $0x28] sm:$0x3]  ;;  %v5057_v19 = vrot.slane %v11008_v62, 1  ;;  %v5058_v1 = vrot.slane %v11010_v48, 1  ;;  %v5160_v38 = vrot.slane %v10974_v28, 2 }
 0x3bf   : > { %6725 = vmatprep.subr.mxu1 %v5537_v30  ;;  %7596 = vmatpush3.msra.mxu0 %v3570_v8  ;;  %v11023_v8 = vld [vmem:[%s11588_s9 + $0x178] sm:$0xff]  ;;  %v11026_v30 = vmul.f32 %v10606_v20, %v5469_v57  ;;  %v5533_v29 = vld [vmem:[%s11588_s9 + $0x88] sm:$0xff]  ;;  %v5168_v7 = vrot.slane %v10984_v50, 2  ;;  %v5532_v57 = vld [vmem:[%s11588_s9 + $0x80] sm:$0xff]  ;;  %v11069_v36 = vmul.f32 %v10606_v20, %v5468_v25  ;;  %v5066_v6 = vrot.slane %v11038_v63, 1 }
 0x3c0   : > { %6726 = vmatpush3.msra.mxu1 %v5521_v39  ;;  %7597 = vmatprep.subr.mxu0 %v3569_v10  ;;  %v11036_v39 = vadd.f32 %v11006_v13, %v5294_v53  ;;  %v11072_v28 = vadd.f32 %v5369_v14, %v10935_v51  ;;  %v5067_v53 = vrot.slane %v11040_v2, 1  ;;  %v11089_v51 = vld [vmem:[#allocation4 + $0x170] sm:$0x3]  ;;  %v5186_v9 = vrot.slane %v11038_v63, 2 }
 0x3c1   : > { %6727 = vmatprep.subr.mxu1 %v5536_v0  ;;  %7598 = vmatpush3.msra.mxu0 %v3569_v10  ;;  %v11052_v10 = vld [vmem:[%s11588_s9 + $0x170] sm:$0xff]  ;;  %v5041_v0 = vsel %vm963_vm2, %v10311_v31, %v5040_v11  ;;  %11667 = vst [vmem:[#allocation17_spill] sm:$0xff] %v11069_v36  ;;  %v5187_v35 = vrot.slane %v11040_v2, 2  ;;  %v11164_v2 = vld [vmem:[%s11588_s9 + $0x158] sm:$0xff] }
 0x3c2   : > { %6728 = vmatpush3.msra.mxu1 %v5520_v15  ;;  %7599 = vmatprep.subr.mxu0 %v3568_v49  ;;  %v5169_v15 = vrot.slane %v10986_v18, 2  ;;  %v11075_v18 = vsel %vm963_vm2, %v5048_v55, %v5049_v47  ;;  %v11091_v11 = vld [vmem:[#allocation4 + $0x190] sm:$0xff]  ;;  %v5177_v55 = vrot.slane %v11008_v62, 2  ;;  %v5178_v47 = vrot.slane %v11010_v48, 2  ;;  %v11122_v48 = vld [vmem:[#allocation4 + $0x148] sm:$0xff] }
 0x3c3   : > { %6729 = vmatprep.subr.mxu1 %v5535_v43  ;;  %7600 = vmatpush3.msra.mxu0 %v3568_v49  ;;  %v11077_v49 = vld [vmem:[#allocation4] sm:$0x3]  ;;  %v11083_v43 = vsel %vm1230_vm3, %v5339_v33, %v5340_v52  ;;  %v11102_v14 = vld [vmem:[#allocation4 + $0xb0] sm:$0xff]  ;;  %v5093_v46 = vrot.slane %v11091_v11, 1 }
 0x3c4   : > { %6730 = vmatpush3.msra.mxu1 %v5519_v40  ;;  %7602 = vmatmul.mubr.msk.f32.vlgmr.msra.gmra.mxu0 %vm3421_vm5, %v10291_v58  ;;  %v5517_v58 = vld [vmem:[%s11588_s9 + $0x8] sm:$0xff]  ;;  %v5131_v25 = vadd.f32 %v11102_v14, %v5041_v0  ;;  %v11109_v33 = vld [vmem:[#allocation4 + $0xd0] sm:$0x3]  ;;  %v5516_v52 = vld [vmem:[%s11588_s9] sm:$0xff]  ;;  %v5076_v0 = vrot.slane %v11089_v51, 1  ;;  %v5094_v59 = vrot.slane %v11077_v49, 1 }
 0x3c5   : > { %6731 = vmatprep.subr.mxu1 %v5534_v45  ;;  %7613 = vmatprep.subr.mxu0 %v11023_v8  ;;  %v11087_v40 = vld [vmem:[#allocation4 + $0x128] sm:$0xff]  ;;  %v11100_v45 = vsel %vm963_vm2, %v5057_v19, %v5058_v1  ;;  %v5161_v19 = vsel %vm1230_vm3, %v10333_v5, %v5160_v38  ;;  %v11120_v1 = vsel %vm1230_vm3, %v5168_v7, %v5169_v15 }
 0x3c6   : > { %7604 = vmatprep.mubr.msk.f32.mxu0 %vm3421_vm5, %v10296_v61  ;;  %6732 = vmatpush3.msra.mxu1 %v5518_v37  ;;  %v11080_v61 = vadd.f32 %v5436_v21, %v5344_v3  ;;  %v11097_v3 = vld [vmem:[%s11588_s9 + $0x168] sm:$0xff]  ;;  %v11107_v21 = vld [vmem:[#allocation4 + $0x10] sm:$0xff]  ;;  %v5134_v37 = vadd.f32 %v11075_v18, %v10984_v50  ;;  %v11141_v38 = vsel %vm963_vm2, %v5066_v6, %v5067_v53  ;;  %v5195_v53 = vrot.slane %v11087_v40, 2 }
 0x3c7   : > { %7614 = vmatpush3.msra.mxu0 %v11023_v8  ;;  %6733 = vmatprep.subr.mxu1 %v5533_v29  ;;  %v5075_v29 = vrot.slane %v11087_v40, 1  ;;  %v5137_v7 = vadd.f32 %v11100_v45, %v11008_v62  ;;  %v5102_v15 = vrot.slane %v11107_v21, 1  ;;  %v5251_v17 = vadd.f32 %v5161_v19, %v5131_v25 }
 0x3c8   : > { %7615 = vmatprep.subr.mxu0 %v11052_v10  ;;  %6734 = vmatpush3.msra.mxu1 %v5517_v58  ;;  %v11128_v58 = vld [vmem:[#allocation4 + $0xf8] sm:$0x3]  ;;  %v5254_v6 = vadd.f32 %v11120_v1, %v5134_v37  ;;  %v5196_v37 = vrot.slane %v11089_v51, 2  ;;  %v5222_v36 = vrot.slane %v11107_v21, 2 }
 0x3c9   : > { %7616 = vmatpush3.msra.mxu0 %v11052_v10  ;;  %6735 = vmatprep.subr.mxu1 %v5532_v57  ;;  %v5103_v57 = vrot.slane %v11109_v33, 1  ;;  %v11167_v25 = vsel %vm963_vm2, %v5075_v29, %v5076_v0  ;;  %v5223_v29 = vrot.slane %v11109_v33, 2 }
 0x3ca   : > { %7605 = vmatmul.mubr.msk.f32.gmra.mxu0 %vm3421_vm5, %v10328_v44  ;;  %7617 = vmatprep.subr.mxu0 %v11097_v3  ;;  %v11138_v44 = vld [vmem:[%s11588_s9 + $0x160] sm:$0xff]  ;;  %v11219_v0 = vsel %vm1230_vm3, %v5195_v53, %v5196_v37 }
 0x3cb   : > { %7607 = vmatprep.mubr.msk.f32.mxu0 %vm3421_vm5, %v10338_v32  ;;  %6736 = vmatpush3.msra.mxu1 %v5516_v52  ;;  %v11149_v32 = vsel %vm1230_vm3, %v5177_v55, %v5178_v47  ;;  %v5084_v52 = vrot.slane %v11122_v48, 1  ;;  %v5213_v55 = vrot.slane %v11091_v11, 2  ;;  %v5214_v47 = vrot.slane %v11077_v49, 2  ;;  %v11197_v49 = vld [vmem:[%s11588_s9 + $0x150] sm:$0xff] }
 0x3cc   : > { %5635 = vmatprep.mubr.f32.mxu1 %v10600_v22  ;;  %7618 = vmatpush3.msra.mxu0 %v11097_v3  ;;  %v5085_v22 = vrot.slane %v11128_v58, 1  ;;  %v11178_v19 = vsel %vm963_vm2, %v5102_v15, %v5103_v57  ;;  %v5257_v33 = vadd.f32 %v11149_v32, %v5137_v7  ;;  %v11235_v15 = vld [vmem:[#allocation4 + $0x198] sm:$0xff]  ;;  %v5435_v57 = vadd.f32 %v11072_v28, %v11006_v13  ;;  %v11258_v13 = vld [vmem:[%s11588_s9 + $0x140] sm:$0xff] }
 0x3cd   : > { %5636 = vmatmul.mubr.f32.vlgmr.msra.gmra.mxu1 %v10702_v42  ;;  %7657 = vmatprep.subr.mxu1 %v11023_v8  ;;  %v11170_v42 = vsel %vm963_vm2, %v5093_v46, %v5094_v59  ;;  %v11186_v59 = vsel %vm1230_vm3, %v5186_v9, %v5187_v35  ;;  %v5275_v46 = vadd.f32 %v5251_v17, %v10984_v50  ;;  %v5204_v35 = vrot.slane %v11122_v48, 2 }
 0x3ce   : > { %7619 = vmatprep.subr.mxu0 %v11138_v44  ;;  %7673 = vmatpush3.msra.mxu1 %v11023_v8  ;;  %v5140_v8 = vadd.f32 %v11141_v38, %v11038_v63  ;;  %v5205_v9 = vrot.slane %v11128_v58, 2  ;;  %v5149_v17 = vadd.f32 %v11170_v42, %v11091_v11  ;;  %v5152_v50 = vadd.f32 %v11178_v19, %v11107_v21 }
 0x3cf   : > { %7620 = vmatpush3.msra.mxu0 %v11138_v44  ;;  %7658 = vmatprep.subr.mxu1 %v11052_v10  ;;  %v11213_v51 = vsel %vm1230_vm3, %v5213_v55, %v5214_v47  ;;  %v5278_v58 = vadd.f32 %v5254_v6, %v11008_v62  ;;  %v5281_v28 = vadd.f32 %v5257_v33, %v11038_v63  ;;  %v5554_v33 = vld [vmem:[%s11588_s9 + $0x130] sm:$0xff] }
 0x3d0   : > { %7608 = vmatmul.mubr.msk.f32.gmra.mxu0 %vm3421_vm5, %v10369_v34  ;;  %7621 = vmatprep.subr.mxu0 %v11164_v2  ;;  %v11200_v34 = vsel %vm963_vm2, %v5084_v52, %v5085_v22  ;;  %v11244_v53 = vsel %vm1230_vm3, %v5204_v35, %v5205_v9  ;;  %v5269_v6 = vadd.f32 %v11213_v51, %v5149_v17  ;;  %v4983_v22 = vld [vmem:[#allocation4 + $0x78] sm:$0x3]  ;;  %v11288_v17 = vld [vmem:[#allocation4 + $0x30] sm:$0x3] }
 0x3d1   : > { %7610 = vmatprep.mubr.msk.f32.mxu0 %vm3421_vm5, %v10544_v60  ;;  %5640 = vmatprep.mubr.f32.mxu1 %v10643_v54  ;;  %v5143_v60 = vadd.f32 %v11167_v25, %v11087_v40  ;;  %v11222_v54 = vsel %vm1230_vm3, %v5222_v36, %v5223_v29  ;;  %v5146_v7 = vadd.f32 %v11200_v34, %v11122_v48  ;;  %v11237_v36 = vld [vmem:[#allocation4 + $0x70] sm:$0x3]  ;;  %v5445_v9 = vrot.slane %v4983_v22, 2 }
 0x3d2   : > { %7674 = vmatpush3.msra.mxu1 %v11052_v10  ;;  %7622 = vmatpush3.msra.mxu0 %v11164_v2  ;;  %v11229_v10 = vld [vmem:[%s11588_s9 + $0x148] sm:$0xff]  ;;  %v5317_v52 = vadd.f32 %v5275_v46, %v11075_v18  ;;  %v5272_v55 = vadd.f32 %v11222_v54, %v5152_v50  ;;  %v5309_v18 = vrot.slane %v11235_v15, 1  ;;  %v5310_v47 = vrot.slane %v11237_v36, 1 }
 0x3d3   : > { %5641 = vmatmul.mubr.f32.gmra.mxu1 %v10807_v12  ;;  %7659 = vmatprep.subr.mxu1 %v11097_v3  ;;  %v5260_v12 = vadd.f32 %v11186_v59, %v5140_v8  ;;  %v5266_v29 = vadd.f32 %v11244_v53, %v5146_v7  ;;  %v11282_v46 = vadd.f32 %v5435_v57, %v11083_v43  ;;  %v5409_v8 = vrot.slane %v4983_v22, 1 }
 0x3d4   : > { %7623 = vmatprep.subr.mxu0 %v11197_v49  ;;  %7675 = vmatpush3.msra.mxu1 %v11097_v3  ;;  %v5263_v3 = vadd.f32 %v11219_v0, %v5143_v60  ;;  %v5293_v35 = vadd.f32 %v5269_v6, %v11107_v21  ;;  %v11296_v50 = vsel %vm963_vm2, %v5309_v18, %v5310_v47  ;;  %v5406_v57 = vrot.slane %v11288_v17, 1  ;;  %v11334_v18 = vld [vmem:[#allocation4 + $0x1c0] sm:$0x3] }
 0x3d5   : > { %7624 = vmatpush3.msra.mxu0 %v11197_v49  ;;  %7660 = vmatprep.subr.mxu1 %v11138_v44  ;;  %v5284_v37 = vadd.f32 %v5260_v12, %v11087_v40  ;;  %v5290_v7 = vadd.f32 %v5266_v29, %v11091_v11 }
 0x3d6   : > { %7611 = vmatmul.mubr.msk.f32.gmra.mxu0 %vm3421_vm5, %v10646_v56  ;;  %7625 = vmatprep.subr.mxu0 %v11229_v10  ;;  %v5372_v56 = vadd.f32 %v11083_v43, %v11036_v39  ;;  %v11275_v39 = vld [vmem:[%s11588_s9 + $0x138] sm:$0xff]  ;;  %v5287_v60 = vadd.f32 %v5263_v3, %v11122_v48  ;;  %v5323_v43 = vadd.f32 %v5281_v28, %v11141_v38 }
 0x3d7   : > { %5645 = vmatprep.mubr.f32.mxu1 %v10810_v24  ;;  %7676 = vmatpush3.msra.mxu1 %v11138_v44  ;;  %v5320_v24 = vadd.f32 %v5278_v58, %v11100_v45  ;;  %v11279_v44 = vmul.f32 %v10606_v20, %v11080_v61  ;;  %v5296_v61 = vadd.f32 %v5272_v55, %v11235_v15 }
 0x3d8   : > { %7626 = vmatpush3.msra.mxu0 %v11229_v10  ;;  %5646 = vmatmul.mubr.f32.gmra.mxu1 %v10844_v23  ;;  %v5353_v23 = vadd.f32 %v5317_v52, %v11120_v1  ;;  %v5346_v1 = vrot.slane %v11237_v36, 2  ;;  %v5326_v12 = vadd.f32 %v5284_v37, %v11167_v25  ;;  %v5397_v36 = vadd.f32 %v11102_v14, %v11033_v41 }
 0x3d9   : > { %7661 = vmatprep.subr.mxu1 %v11164_v2  ;;  %7627 = vmatprep.subr.mxu0 %v11258_v13  ;;  %v5356_v58 = vadd.f32 %v5320_v24, %v11149_v32  ;;  %v5335_v6 = vadd.f32 %v5293_v35, %v11178_v19  ;;  %v5338_v22 = vadd.f32 %v11296_v50, %v5296_v61 }
 0x3da   : > { %7677 = vmatpush3.msra.mxu1 %v11164_v2  ;;  %7628 = vmatpush3.msra.mxu0 %v11258_v13  ;;  %v5345_v2 = vrot.slane %v11235_v15, 2  ;;  %v5377_v52 = vadd.f32 %v5353_v23, %v11008_v62  ;;  %v5329_v41 = vadd.f32 %v5287_v60, %v11200_v34  ;;  %v5446_v3 = vsel %vm1230_vm3, %v10333_v5, %v5445_v9 }
 0x3db   : > { %7662 = vmatprep.subr.mxu1 %v11197_v49  ;;  %7629 = vmatprep.subr.mxu0 %v11275_v39  ;;  %v5380_v62 = vadd.f32 %v5356_v58, %v11038_v63  ;;  %v5362_v28 = vadd.f32 %v5326_v12, %v11219_v0  ;;  %v5332_v47 = vadd.f32 %v5290_v7, %v11170_v42  ;;  %v5442_v63 = vrot.slane %v11288_v17, 2 }
 0x3dc   : > { %5650 = vmatprep.mubr.f32.mxu1 %v10970_v27  ;;  %7678 = vmatpush3.msra.mxu1 %v11197_v49  ;;  %v5410_v27 = vsel %vm963_vm2, %v10311_v31, %v5409_v8  ;;  %v5553_v49 = vld [vmem:[%s11588_s9 + $0x128] sm:$0xff]  ;;  %v11329_v55 = vsel %vm1230_vm3, %v5345_v2, %v5346_v1  ;;  %v5396_v24 = vadd.f32 %v11102_v14, %v5372_v56  ;;  %v5412_v9 = vrot.slane %v11334_v18, 1  ;;  %v11668_v1 = vld [vmem:[#allocation17_spill] sm:$0xff] }
 0x3dd   : > { %7630 = vmatpush3.msra.mxu0 %v11275_v39  ;;  %5651 = vmatmul.mubr.f32.gmra.mxu1 %v10980_v4  ;;  %v5359_v4 = vadd.f32 %v5323_v43, %v11186_v59  ;;  %v5407_v37 = vsel %vm963_vm2, %v10311_v31, %v5406_v57  ;;  %v5371_v29 = vadd.f32 %v5335_v6, %v11222_v54  ;;  %v5551_v31 = vld [vmem:[%s11588_s9 + $0x118] sm:$0xff] }
 0x3de   : > { %7663 = vmatprep.subr.mxu1 %v11229_v10  ;;  %7631 = vmatprep.subr.mxu0 %v5554_v33  ;;  %v5419_v8 = vadd.f32 %v5377_v52, %v11100_v45  ;;  %v5365_v35 = vadd.f32 %v5329_v41, %v11244_v53  ;;  %v5439_v56 = vadd.f32 %v5410_v27, %v5397_v36 }
 0x3df   : > { %7679 = vmatpush3.msra.mxu1 %v11229_v10  ;;  %7632 = vmatpush3.msra.mxu0 %v5554_v33  ;;  %v5552_v10 = vld [vmem:[%s11588_s9 + $0x120] sm:$0xff]  ;;  %v5383_v23 = vadd.f32 %v5359_v4, %v11087_v40  ;;  %v5422_v45 = vadd.f32 %v5380_v62, %v11141_v38  ;;  %v5368_v17 = vadd.f32 %v5332_v47, %v11213_v51 }
 0x3e0   : > { %7664 = vmatprep.subr.mxu1 %v11258_v13  ;;  %7633 = vmatprep.subr.mxu0 %v5553_v49  ;;  %v5438_v60 = vadd.f32 %v5407_v37, %v5396_v24  ;;  %v5443_v61 = vsel %vm1230_vm3, %v10333_v5, %v5442_v63  ;;  %v5395_v40 = vadd.f32 %v5371_v29, %v11235_v15  ;;  %v5447_v15 = vrot.slane %v11102_v14, 2 }
 0x3e1   : > { %5655 = vmatprep.mubr.f32.mxu1 %v10995_v16  ;;  %7680 = vmatpush3.msra.mxu1 %v11258_v13  ;;  %v5374_v16 = vadd.f32 %v11329_v55, %v5338_v22  ;;  %v5411_v13 = vrot.slane %v11102_v14, 1  ;;  %v5455_v38 = vadd.f32 %v5419_v8, %v11149_v32  ;;  %v5389_v43 = vadd.f32 %v5365_v35, %v11091_v11  ;;  %v5549_v32 = vld [vmem:[%s11588_s9 + $0x108] sm:$0xff] }
 0x3e2   : > { %7634 = vmatpush3.msra.mxu0 %v5553_v49  ;;  %5656 = vmatmul.mubr.f32.gmra.mxu1 %v11002_v26  ;;  %v5386_v26 = vadd.f32 %v5362_v28, %v11122_v48  ;;  %v5425_v2 = vadd.f32 %v5383_v23, %v11167_v25  ;;  %v5458_v58 = vadd.f32 %v5422_v45, %v11186_v59  ;;  %v11669_v59 = vld [vmem:[#allocation18_spill] sm:$0xff] }
 0x3e3   : > { %7665 = vmatprep.subr.mxu1 %v11275_v39  ;;  %7635 = vmatprep.subr.mxu0 %v5552_v10  ;;  %v5398_v48 = vadd.f32 %v11102_v14, %v5374_v16  ;;  %v5413_v5 = vsel %vm963_vm2, %v5411_v13, %v5412_v9  ;;  %v5510_v14 = vmul.f32 %v10606_v20, %v11282_v46 }
 0x3e4   : > { %7681 = vmatpush3.msra.mxu1 %v11275_v39  ;;  %7636 = vmatpush3.msra.mxu0 %v5552_v10  ;;  %v5550_v39 = vld [vmem:[%s11588_s9 + $0x110] sm:$0xff]  ;;  %v5428_v11 = vadd.f32 %v5386_v26, %v11200_v34  ;;  %v5475_v25 = vadd.f32 %v5446_v3, %v5439_v56  ;;  %v5437_v12 = vadd.f32 %v5395_v40, %v11296_v50 }
 0x3e5   : > { %7666 = vmatprep.subr.mxu1 %v5554_v33  ;;  %7637 = vmatprep.subr.mxu0 %v5551_v31  ;;  %v5474_v7 = vadd.f32 %v5443_v61, %v5438_v60  ;;  %v5440_v36 = vadd.f32 %v5413_v5, %v5398_v48  ;;  %v5431_v27 = vadd.f32 %v5389_v43, %v11170_v42 }
 0x3e6   : > { %5660 = vmatprep.mubr.f32.mxu1 %v11026_v30  ;;  %7682 = vmatpush3.msra.mxu1 %v5554_v33  ;;  %v5448_v30 = vrot.slane %v11334_v18, 2  ;;  %v5392_v33 = vadd.f32 %v5368_v17, %v11107_v21  ;;  %v5548_v21 = vld [vmem:[%s11588_s9 + $0x100] sm:$0xff]  ;;  %v5493_v34 = vmul.f32 %v11669_v59, %v5455_v38  ;;  %v5461_v46 = vadd.f32 %v5425_v2, %v11219_v0 }
 0x3e7   : > { %7638 = vmatpush3.msra.mxu0 %v5551_v31  ;;  %5661 = vmatmul.mubr.f32.gmra.mxu1 %v11668_v1  ;;  %v5497_v50 = vmul.f32 %v10606_v20, %v5458_v58  ;;  %v5464_v6 = vadd.f32 %v5428_v11, %v11244_v53  ;;  %v5513_v0 = vmul.f32 %v11669_v59, %v5474_v7 }
 0x3e8   : > { %7667 = vmatprep.subr.mxu1 %v5553_v49  ;;  %7639 = vmatprep.subr.mxu0 %v5550_v39  ;;  %v5449_v57 = vsel %vm1230_vm3, %v5447_v15, %v5448_v30  ;;  %v5434_v42 = vadd.f32 %v5392_v33, %v11178_v19  ;;  %v5467_v22 = vadd.f32 %v5431_v27, %v11213_v51 }
 0x3e9   : > { %7683 = vmatpush3.msra.mxu1 %v5553_v49  ;;  %7640 = vmatpush3.msra.mxu0 %v5550_v39  ;;  %v5473_v49 = vadd.f32 %v5437_v12, %v11329_v55  ;;  %v5476_v52 = vadd.f32 %v5449_v57, %v5440_v36  ;;  %v5500_v41 = vmul.f32 %v10606_v20, %v5461_v46 }
 0x3ea   : > { %7668 = vmatprep.subr.mxu1 %v5552_v10  ;;  %7641 = vmatprep.subr.mxu0 %v5549_v32  ;;  %v5503_v19 = vmul.f32 %v10606_v20, %v5464_v6  ;;  %v5470_v53 = vadd.f32 %v5434_v42, %v11222_v54  ;;  %v5506_v51 = vmul.f32 %v10606_v20, %v5467_v22 }
 0x3eb   : > { %5665 = vmatprep.mubr.f32.mxu1 %v11279_v44  ;;  %7684 = vmatpush3.msra.mxu1 %v5552_v10  ;;  %v5514_v44 = vmul.f32 %v11669_v59, %v5475_v25  ;;  %v5512_v3 = vmul.f32 %v10606_v20, %v5473_v49  ;;  %v5515_v4 = vmul.f32 %v11669_v59, %v5476_v52 }
 0x3ec   : > { %7642 = vmatpush3.msra.mxu0 %v5549_v32  ;;  %5666 = vmatmul.mubr.f32.gmra.mxu1 %v5510_v14  ;;  %v5509_v55 = vmul.f32 %v10606_v20, %v5470_v53 }
 0x3ed   : > { %7669 = vmatprep.subr.mxu1 %v5551_v31  ;;  %7643 = vmatprep.subr.mxu0 %v5548_v21 }
 0x3ee   : > { %7685 = vmatpush3.msra.mxu1 %v5551_v31  ;;  %7644 = vmatpush3.msra.mxu0 %v5548_v21 }
 0x3ef   : > { %7645 = vmatprep.mubr.f32.mxu0 %v5493_v34  ;;  %7670 = vmatprep.subr.mxu1 %v5550_v39 }
 0x3f0   : > { %7646 = vmatmul.mubr.f32.vlgmr.msra.gmra.mxu0 %v5497_v50  ;;  %5670 = vmatprep.mubr.f32.mxu1 %v5514_v44 }
 0x3f1   : > { %7686 = vmatpush3.msra.mxu1 %v5550_v39  ;;  %7648 = vmatprep.mubr.f32.mxu0 %v5500_v41 }
 0x3f2   : > { %5671 = vmatmul.mubr.f32.gmra.mxu1 %v5513_v0  ;;  %7671 = vmatprep.subr.mxu1 %v5549_v32 }
 0x3f3   : > { %7687 = vmatpush3.msra.mxu1 %v5549_v32  ;;  %7654 = vmatprep.mubr.f32.mxu1 %v5512_v3 }
 0x3f4   : > { %7672 = vmatprep.subr.mxu1 %v5548_v21  ;;  %7649 = vmatmul.mubr.f32.gmra.mxu0 %v5503_v19 }
 0x3f5   : > { %7688 = vmatpush3.msra.mxu1 %v5548_v21  ;;  %7651 = vmatprep.mubr.f32.mxu0 %v5506_v51 }
 0x3f6   : > { %7655 = vmatmul.mubr.f32.vlgmr.msra.gmra.mxu1 %v5515_v4 }
 0x3f8   : > { %7652 = vmatmul.mubr.f32.gmra.mxu0 %v5509_v55 }
 0x404   : > { %v7351_v18 = vpop.f32.mrf.mxu1 }
 0x406   : > { %v3823_v10 = vpop.f32.mrf.mxu1 }
 0x407   : > { %v7315_v54 = vpop.f32.mrf.mxu0 }
 0x408   : > { %v3829_v44 = vadd.f32 %v7351_v18, %v7315_v54 }
 0x409   : > { %v3702_v62 = vpop.f32.mrf.mxu0  ;;  %v7354_v37 = vpop.f32.mrf.mxu1 }
 0x40a   : > { %v3824_v0 = vadd.f32 %v3823_v10, %v3702_v62 }
 0x40b   : > { %v3833_v29 = vpop.f32.mrf.mxu1 }
 0x40d   : > { %v7318_v28 = vpop.f32.mrf.mxu0 }
 0x40e   : > { %v3839_v19 = vadd.f32 %v7354_v37, %v7318_v28 }
 0x40f   : > { %v3712_v47 = vpop.f32.mrf.mxu0  ;;  %v7357_v20 = vpop.f32.mrf.mxu1 }
 0x410   : > { %v3834_v4 = vadd.f32 %v3833_v29, %v3712_v47 }
 0x411   : > { %v3843_v35 = vpop.f32.mrf.mxu1 }
 0x413   : > { %v11408_v24 = vpop.f32.mrf.mxu0 }
 0x415   : > { %v11410_v63 = vpop.f32.mrf.mxu0  ;;  %v11416_v56 = vpop.f32.mrf.mxu1 }
 0x416   : > { %v3844_v62 = vadd.f32 %v3843_v35, %v11410_v63 }
 0x417   : > { %v11418_v13 = vpop.f32.mrf.mxu1 }
 0x419   : > { %v11412_v8 = vpop.f32.mrf.mxu0 }
 0x41b   : > { %v11414_v16 = vpop.f32.mrf.mxu0 }
 0x41c   : > { %v3854_v63 = vadd.f32 %v11418_v13, %v11414_v16 }
 0x422   : > { %v7423_v45 = vpop.f32.mrf.mxu1 }
 0x424   : > { %v4084_v17 = vpop.f32.mrf.mxu1 }
 0x426   : > { %v7387_v31 = vpop.f32.mrf.mxu0 }
 0x427   : > { %v4008_v52 = vadd.f32 %v7387_v31, %v3829_v44 }
 0x428   : > { %v3968_v23 = vpop.f32.mrf.mxu0  ;;  %v7426_v61 = vpop.f32.mrf.mxu1 }
 0x429   : > { %v4007_v41 = vadd.f32 %v3968_v23, %v3824_v0  ;;  %v4124_v3 = vadd.f32 %v7423_v45, %v4008_v52 }
 0x42a   : > { %v4094_v39 = vpop.f32.mrf.mxu1 }
 0x42c   : > { %v7390_v9 = vpop.f32.mrf.mxu0 }
 0x42d   : > { %v4010_v51 = vadd.f32 %v7390_v9, %v3839_v19 }
 0x42e   : > { %v3978_v26 = vpop.f32.mrf.mxu0  ;;  %v7429_v48 = vpop.f32.mrf.mxu1 }
 0x430   : > { %v4104_v2 = vpop.f32.mrf.mxu1 }
 0x432   : > { %v7393_v60 = vpop.f32.mrf.mxu0 }
 0x434   : > { %v3988_v40 = vpop.f32.mrf.mxu0  ;;  %v11424_v15 = vpop.f32.mrf.mxu1 }
 0x435   : > { %v4011_v23 = vadd.f32 %v3988_v40, %v3844_v62 }
 0x436   : > { %v11426_v1 = vpop.f32.mrf.mxu1 }
 0x437   : > { %11670 = vst [vmem:[#allocation21_spill] sm:$0xff] %v11426_v1  ;;  %v4127_v35 = vadd.f32 %v4104_v2, %v4011_v23 }
 0x438   : > { %v11420_v38 = vpop.f32.mrf.mxu0 }
 0x43a   : > { %v11422_v43 = vpop.f32.mrf.mxu0 }
 0x443   : > { %v7495_v58 = vpop.f32.mrf.mxu1 }
 0x445   : > { %v4321_v33 = vpop.f32.mrf.mxu1 }
 0x446   : > { %v7459_v5 = vpop.f32.mrf.mxu0 }
 0x448   : > { %v4203_v30 = vpop.f32.mrf.mxu0  ;;  %v7498_v25 = vpop.f32.mrf.mxu1 }
 0x44a   : > { %v4331_v7 = vpop.f32.mrf.mxu1 }
 0x44c   : > { %v7462_v32 = vpop.f32.mrf.mxu0 }
 0x44e   : > { %v4213_v11 = vpop.f32.mrf.mxu0  ;;  %v11430_v27 = vpop.f32.mrf.mxu1 }
 0x44f   : > { %11672 = vst [vmem:[#allocation17_spill] sm:$0xff] %v11430_v27  ;;  %v4126_v27 = vadd.f32 %v7426_v61, %v4010_v51 }
 0x450   : > { %v11434_v59 = vpop.f32.mrf.mxu1 }
 0x451   : > { %11674 = vst [vmem:[#allocation22_spill] sm:$0xff] %v11434_v59  ;;  %v4245_v31 = vadd.f32 %v7462_v32, %v4126_v27  ;;  %v11678_v27 = vld [vmem:[#allocation21_spill] sm:$0xff] }
 0x452   : > { %v7465_v14 = vpop.f32.mrf.mxu0 }
 0x454   : > { %v4223_v12 = vpop.f32.mrf.mxu0  ;;  %v11436_v46 = vpop.f32.mrf.mxu1 }
 0x455   : > { %11675 = vst [vmem:[#allocation23_spill] sm:$0xff] %v11436_v46  ;;  %v4009_v46 = vadd.f32 %v3978_v26, %v3834_v4  ;;  %v3859_v26 = vadd.f32 %v11416_v56, %v11412_v8  ;;  %v4013_v8 = vadd.f32 %v11422_v43, %v3854_v63  ;;  %v4246_v56 = vadd.f32 %v4223_v12, %v4127_v35 }
 0x456   : > { %v11438_v50 = vpop.f32.mrf.mxu1 }
 0x457   : > { %11676 = vst [vmem:[#allocation24_spill] sm:$0xff] %v11438_v50  ;;  %v3849_v50 = vadd.f32 %v7357_v20, %v11408_v24  ;;  %v4125_v28 = vadd.f32 %v4094_v39, %v4009_v46  ;;  %v4363_v24 = vadd.f32 %v7498_v25, %v4245_v31  ;;  %v4014_v61 = vadd.f32 %v11420_v38, %v3859_v26  ;;  %v11677_v25 = vld [vmem:[#allocation17_spill] sm:$0xff] }
 0x458   : > { %v11428_v36 = vpop.f32.mrf.mxu0 }
 0x459   : > { %11671 = vst [vmem:[#allocation10_spill] sm:$0xff] %v11428_v36  ;;  %v4123_v36 = vadd.f32 %v4084_v17, %v4007_v41  ;;  %v4012_v10 = vadd.f32 %v7393_v60, %v3849_v50  ;;  %v4244_v9 = vadd.f32 %v4213_v11, %v4125_v28 }
 0x45a   : > { %v11432_v21 = vpop.f32.mrf.mxu0 }
 0x45b   : > { %11673 = vst [vmem:[#allocation18_spill] sm:$0xff] %v11432_v21  ;;  %v4243_v21 = vadd.f32 %v7459_v5, %v4124_v3  ;;  %v4242_v1 = vadd.f32 %v4203_v30, %v4123_v36  ;;  %v4128_v5 = vadd.f32 %v7429_v48, %v4012_v10  ;;  %v4362_v30 = vadd.f32 %v4331_v7, %v4244_v9 }
 0x45d   : > { %v4361_v18 = vadd.f32 %v7495_v58, %v4243_v21  ;;  %v4360_v29 = vadd.f32 %v4321_v33, %v4242_v1  ;;  %v4247_v39 = vadd.f32 %v7465_v14, %v4128_v5  ;;  %v11450_v58 = vld [vmem:[%s11587_s8] ss:$0 sm:$0xff]  ;;  %v4130_v14 = vadd.f32 %v11424_v15, %v4014_v61 }
 0x45e   : > { %v4129_v21 = vadd.f32 %v11678_v27, %v4013_v8  ;;  %v11683_v31 = vld [vmem:[#allocation24_spill] sm:$0xff] }
 0x45f   : > { %v4365_v7 = vadd.f32 %v11677_v25, %v4247_v39 }
 0x460   : > { %v11680_v50 = vld [vmem:[#allocation10_spill] sm:$0xff] }
 0x462   : > { %v11681_v52 = vld [vmem:[#allocation18_spill] sm:$0xff] }
 0x463   : > { %v7567_v42 = vpop.f32.mrf.mxu1 }
 0x465   : > { %v4556_v22 = vpop.f32.mrf.mxu1 }
 0x466   : > { %v7531_v34 = vpop.f32.mrf.mxu0 }
 0x467   : > { %v4477_v47 = vadd.f32 %v7531_v34, %v4361_v18  ;;  %v11679_v34 = vld [vmem:[#allocation22_spill] sm:$0xff] }
 0x468   : > { %v4437_v57 = vpop.f32.mrf.mxu0  ;;  %v7570_v55 = vpop.f32.mrf.mxu1  ;;  %v4364_v46 = vadd.f32 %v11679_v34, %v4246_v56 }
 0x469   : > { %v4476_v17 = vadd.f32 %v4437_v57, %v4360_v29  ;;  %v4596_v60 = vadd.f32 %v7567_v42, %v4477_v47 }
 0x46a   : > { %v4566_v54 = vpop.f32.mrf.mxu1 }
 0x46b   : > { %v4595_v11 = vadd.f32 %v4556_v22, %v4476_v17  ;;  %v4248_v22 = vadd.f32 %v11681_v52, %v4129_v21  ;;  %v6233_v21 = vld [vmem:[%s11589_s10] ss:$0 sm:$0xff] }
 0x46c   : > { %v7534_v6 = vpop.f32.mrf.mxu0 }
 0x46d   : > { %v4479_v40 = vadd.f32 %v7534_v6, %v4363_v24  ;;  %v4249_v6 = vadd.f32 %v11680_v50, %v4130_v14  ;;  %v4366_v28 = vadd.f32 %v11683_v31, %v4248_v22 }
 0x46e   : > { %v4447_v49 = vpop.f32.mrf.mxu0  ;;  %v7573_v45 = vpop.f32.mrf.mxu1 }
 0x46f   : > { %v4478_v16 = vadd.f32 %v4447_v49, %v4362_v30  ;;  %v4598_v36 = vadd.f32 %v7570_v55, %v4479_v40  ;;  %v11682_v55 = vld [vmem:[#allocation23_spill] sm:$0xff] }
 0x470   : > { %v4576_v1 = vpop.f32.mrf.mxu1  ;;  %v4367_v62 = vadd.f32 %v11682_v55, %v4249_v6 }
 0x471   : > { %v4597_v0 = vadd.f32 %v4566_v54, %v4478_v16 }
 0x472   : > { %v7537_v53 = vpop.f32.mrf.mxu0 }
 0x473   : > { %v4481_v42 = vadd.f32 %v7537_v53, %v4365_v7 }
 0x474   : > { %v4457_v59 = vpop.f32.mrf.mxu0 }
 0x475   : > { %v4480_v19 = vadd.f32 %v4457_v59, %v4364_v46  ;;  %v4600_v54 = vadd.f32 %v7573_v45, %v4481_v42 }
 0x477   : > { %v7540_v37 = vpop.f32.mrf.mxu0  ;;  %v4599_v59 = vadd.f32 %v4576_v1, %v4480_v19 }
 0x478   : > { %v4483_v47 = vadd.f32 %v7540_v37, %v4367_v62 }
 0x479   : > { %v4467_v20 = vpop.f32.mrf.mxu0 }
 0x47a   : > { %v7576_v13 = vpop.f32.mrf.mxu1  ;;  %v4482_v26 = vadd.f32 %v4467_v20, %v4366_v28 }
 0x47b   : > { %v4602_v35 = vadd.f32 %v7576_v13, %v4483_v47 }
 0x47c   : > { %v4586_v44 = vpop.f32.mrf.mxu1 }
 0x47d   : > { %v4601_v37 = vadd.f32 %v4586_v44, %v4482_v26 }
 0x484   : > { %v7603_v32 = vpop.f32.mrf.mxu0 }
 0x485   : > { %v4714_v48 = vadd.f32 %v7603_v32, %v4596_v60 }
 0x486   : > { %v4674_v2 = vpop.f32.mrf.mxu0 }
 0x487   : > { %v4729_v38 = vadd.f32 %v11450_v58, %v4714_v48  ;;  %v4713_v33 = vadd.f32 %v4674_v2, %v4595_v11 }
 0x489   : > { %v4737_v57 = vmax.f32 %v4729_v38, 0.0  ;;  %v4728_v43 = vadd.f32 %v11450_v58, %v4713_v33 }
 0x48a   : > { %v7606_v12 = vpop.f32.mrf.mxu0 }
 0x48b   : > { %v4716_v49 = vadd.f32 %v7606_v12, %v4598_v36  ;;  %v4736_v15 = vmax.f32 %v4728_v43, 0.0  ;;  %5831 = vrot.lane.b32.xlu1 %v4737_v57, %s7815_s19 }
 0x48c   : > { %v4684_v41 = vpop.f32.mrf.mxu0 }
 0x48d   : > { %v4731_v3 = vadd.f32 %v11450_v58, %v4716_v49  ;;  %v4715_v4 = vadd.f32 %v4684_v41, %v4597_v0  ;;  %v6737_v51 = vpop.f32.mrf.mxu1  ;;  %5829 = vrot.lane.b32.xlu0 %v4736_v15, %s7815_s19 }
 0x48f   : > { %v4739_v53 = vmax.f32 %v4731_v3, 0.0  ;;  %v4730_v18 = vadd.f32 %v11450_v58, %v4715_v4  ;;  %v6738_v10 = vpop.f32.mrf.mxu1 }
 0x490   : > { %v7609_v23 = vpop.f32.mrf.mxu0  ;;  %v6739_v36 = vadd.f32 %v6738_v10, %v6737_v51 }
 0x491   : > { %v4738_v29 = vmax.f32 %v4730_v18, 0.0  ;;  %v4718_v9 = vadd.f32 %v7609_v23, %v4600_v54  ;;  %5835 = vrot.lane.b32.xlu1 %v4739_v53, %s7815_s19 }
 0x492   : > { %v4694_v17 = vpop.f32.mrf.mxu0  ;;  %v5638_v50 = vadd.f32 %v6739_v36, %v6233_v21 }
 0x493   : > { %v4733_v5 = vadd.f32 %v11450_v58, %v4718_v9  ;;  %v4717_v24 = vadd.f32 %v4694_v17, %v4599_v59  ;;  %v6740_v63 = vpop.f32.mrf.mxu1  ;;  %5833 = vrot.lane.b32.xlu0 %v4738_v29, %s7815_s19 }
 0x495   : > { %v4741_v45 = vmax.f32 %v4733_v5, 0.0  ;;  %v4732_v60 = vadd.f32 %v11450_v58, %v4717_v24  ;;  %v6741_v61 = vpop.f32.mrf.mxu1 }
 0x496   : > { %v7612_v39 = vpop.f32.mrf.mxu0  ;;  %v6742_v7 = vadd.f32 %v6741_v61, %v6740_v63 }
 0x497   : > { %v4740_v40 = vmax.f32 %v4732_v60, 0.0  ;;  %v4720_v30 = vadd.f32 %v7612_v39, %v4602_v35  ;;  %5839 = vrot.lane.b32.xlu1 %v4741_v45, %s7815_s19  ;;  %v11684_v39 = vld [vmem:[#allocation19_spill] sm:$0xff] }
 0x498   : > { %v4704_v1 = vpop.f32.mrf.mxu0  ;;  %v6743_v8 = vpop.f32.mrf.mxu1  ;;  %v5643_v46 = vadd.f32 %v6742_v7, %v6233_v21  ;;  %v11690_v7 = vld [vmem:[#allocation16_spill] sm:$0xff] }
 0x499   : > { %v4735_v20 = vadd.f32 %v11450_v58, %v4720_v30  ;;  %v4719_v32 = vadd.f32 %v4704_v1, %v4601_v37  ;;  %5837 = vrot.lane.b32.xlu0 %v4740_v40, %s7815_s19  ;;  %v11685_v30 = vld [vmem:[#allocation12_spill] sm:$0xff] }
 0x49a   : > { %v6744_v11 = vpop.f32.mrf.mxu1 }
 0x49b   : > { %v4743_v56 = vmax.f32 %v4735_v20, 0.0  ;;  %v4734_v48 = vadd.f32 %v11450_v58, %v4719_v32  ;;  %v6745_v57 = vadd.f32 %v6744_v11, %v6743_v8  ;;  %v11686_v32 = vld [vmem:[#allocation20_spill] sm:$0xff] }
 0x49d   : > { %v4742_v16 = vmax.f32 %v4734_v48, 0.0  ;;  %5843 = vrot.lane.b32.xlu1 %v4743_v56, %s7815_s19  ;;  %v6746_v13 = vpop.f32.mrf.mxu1  ;;  %v5648_v19 = vadd.f32 %v6745_v57, %v6233_v21  ;;  %v11687_v48 = vld [vmem:[#allocation11_spill] sm:$0xff] }
 0x49f   : > { %5841 = vrot.lane.b32.xlu0 %v4742_v16, %s7815_s19  ;;  %v6747_v2 = vpop.f32.mrf.mxu1  ;;  %s7754_s19 = sshll.u32 %s7816_s29, 4  ;;  %s7755_s19 = int_to_ptr.vmem [resolvable:$false] %s7754_s19 }
 0x4a0   : > { %v6748_v58 = vadd.f32 %v6747_v2, %v6746_v13  ;;  %v11688_v13 = vld [vmem:[#allocation14_spill] sm:$0xff]  ;;  %s7756_s24 = scalar_lea.vmem %s7755_s19, 6144  ;;  %p7757_p0 = scmp.lt.s32.totalorder %s11532_s26, %s7755_s19 }
 0x4a1   : > { %p7758_p1 = scmp.lt.s32.totalorder %s7756_s24, %s7750_s22 }
 0x4a2   : > { %v6749_v38 = vpop.f32.mrf.mxu1  ;;  %v5653_v52 = vadd.f32 %v6748_v58, %v6233_v21 }
 0x4a3   : > { %p7759_p2 = por %p7758_p1, %p7757_p0 }
 0x4a4   : > { %v6750_v33 = vpop.f32.mrf.mxu1 }
 0x4a5   : > { %v6751_v22 = vadd.f32 %v6750_v33, %v6749_v38  ;;  %v11689_v33 = vld [vmem:[#allocation13_spill] sm:$0xff]  ;;  %p7760_p3 = pnand %p7759_p2, %p7753_p13 }
 0x4a7   : > { %v6752_v14 = vpop.f32.mrf.mxu1  ;;  %v5658_v23 = vadd.f32 %v6751_v22, %v6233_v21 }
 0x4a9   : > { %v6753_v25 = vpop.f32.mrf.mxu1 }
 0x4aa   : > { %v6754_v44 = vadd.f32 %v6753_v25, %v6752_v14 }
 0x4ac   : > { %v6755_v27 = vpop.f32.mrf.mxu1  ;;  %v5663_v31 = vadd.f32 %v6754_v44, %v6233_v21 }
 0x4ae   : > { %v6756_v34 = vpop.f32.mrf.mxu1 }
 0x4af   : > { %v6757_v3 = vadd.f32 %v6756_v34, %v6755_v27 }
 0x4b0   : > { %v7647_v43 = vpop.f32.mrf.mxu0 }
 0x4b1   : > { %v5748_v12 = vadd.f32 %v7647_v43, %v5643_v46  ;;  %v5668_v59 = vadd.f32 %v6757_v3, %v6233_v21 }
 0x4b2   : > { %v6758_v6 = vpop.f32.mrf.mxu1  ;;  %v5742_v42 = vpop.f32.mrf.mxu0 }
 0x4b3   : > { %v5782_v49 = vmax.f32 %v5748_v12, 0.0  ;;  %v5743_v0 = vadd.f32 %v5742_v42, %v5638_v50 }
 0x4b4   : > { %v6759_v15 = vpop.f32.mrf.mxu1  ;;  %v7650_v41 = vpop.f32.mrf.mxu0 }
 0x4b5   : > { %v5781_v4 = vmax.f32 %v5743_v0, 0.0  ;;  %v6760_v51 = vadd.f32 %v6759_v15, %v6758_v6  ;;  %v5758_v55 = vadd.f32 %v7650_v41, %v5653_v52  ;;  %5863 = vrot.lane.b32.xlu1 %v5782_v49, %s7813_s25 }
 0x4b6   : > { %v5752_v62 = vpop.f32.mrf.mxu0  ;;  %v7656_v53 = vpop.f32.mrf.mxu1 }
 0x4b7   : > { %v5784_v18 = vmax.f32 %v5758_v55, 0.0  ;;  %v5753_v54 = vadd.f32 %v5752_v62, %v5648_v19  ;;  %v5673_v10 = vadd.f32 %v6760_v51, %v6233_v21  ;;  %5861 = vrot.lane.b32.xlu0 %v5781_v4, %s7813_s25  ;;  %v11691_v21 = vld [vmem:[#allocation15_spill] sm:$0xff] }
 0x4b8   : > { %v7653_v28 = vpop.f32.mrf.mxu0  ;;  %v5772_v17 = vpop.f32.mrf.mxu1 }
 0x4b9   : > { %v5783_v47 = vmax.f32 %v5753_v54, 0.0  ;;  %v5778_v29 = vadd.f32 %v7656_v53, %v5673_v10  ;;  %v5768_v9 = vadd.f32 %v7653_v28, %v5663_v31  ;;  %5867 = vrot.lane.b32.xlu1 %v5784_v18, %s7813_s25  ;;  %v5773_v35 = vadd.f32 %v5772_v17, %v5668_v59 }
 0x4ba   : > { %v5762_v26 = vpop.f32.mrf.mxu0 }
 0x4bb   : > { %v5786_v5 = vmax.f32 %v5768_v9, 0.0  ;;  %v5763_v24 = vadd.f32 %v5762_v26, %v5658_v23  ;;  %5865 = vrot.lane.b32.xlu0 %v5783_v47, %s7813_s25  ;;  %v5788_v63 = vmax.f32 %v5778_v29, 0.0  ;;  %v5787_v60 = vmax.f32 %v5773_v35, 0.0 }
 0x4bd   : > { %v5785_v45 = vmax.f32 %v5763_v24, 0.0  ;;  %5871 = vrot.lane.b32.xlu1 %v5786_v5, %s7813_s25 }
 0x4bf   : > { %5869 = vrot.lane.b32.xlu0 %v5785_v45, %s7813_s25 }
 0x4c1   : > { %5875 = vrot.lane.b32.xlu1 %v5788_v63, %s7813_s25 }
 0x4c3   : > { %5873 = vrot.lane.b32.xlu0 %v5787_v60, %s7813_s25  ;;  %s7691_s25 = smul.u32 3072, %s7900_s21  ;;  %s11539_s21 = scalar_lea.sflag [#allocation6], %s377_s15 }
 0x4c5   : > { %s11530_s14 = scalar_lea.hbm %s11590_s11, %s7691_s25 }
 0x4fd   : > { %v5832_v61 = vpop.permute.xlu1 %5831 }
 0x4fe   : > { %v5894_v37 = vsel %vm759_vm0, %v11684_v39, %v5832_v61 }
 0x4ff   : > { %5913 = vst [vmem:[%s10072_s13 + $0x20] sm:$0xff] %v5894_v37  ;;  %v5830_v40 = vpop.permute.xlu0 %5829 }
 0x500   : > { %v5893_v1 = vsel %vm759_vm0, %v11685_v30, %v5830_v40 }
 0x501   : > { %5910 = vst [vmem:[%s10072_s13 + $0x8] sm:$0xff] %v5893_v1 }
 0x503   : > { %v5836_v20 = vpop.permute.xlu1 %5835 }
 0x504   : > { %v5896_v8 = vsel %vm759_vm0, %v11686_v32, %v5836_v20 }
 0x505   : > { %5919 = vst [vmem:[%s10072_s13 + $0x50] sm:$0xff] %v5896_v8  ;;  %v5834_v56 = vpop.permute.xlu0 %5833 }
 0x506   : > { %v5895_v11 = vsel %vm759_vm0, %v11687_v48, %v5834_v56 }
 0x507   : > { %5916 = vst [vmem:[%s10072_s13 + $0x38] sm:$0xff] %v5895_v11 }
 0x509   : > { %v5840_v16 = vpop.permute.xlu1 %5839 }
 0x50a   : > { %v5898_v2 = vsel %vm759_vm0, %v11688_v13, %v5840_v16 }
 0x50b   : > { %5925 = vst [vmem:[%s10072_s13 + $0x80] sm:$0xff] %v5898_v2  ;;  %v5838_v38 = vpop.permute.xlu0 %5837 }
 0x50c   : > { %v5897_v14 = vsel %vm759_vm0, %v11689_v33, %v5838_v38 }
 0x50d   : > { %5922 = vst [vmem:[%s10072_s13 + $0x68] sm:$0xff] %v5897_v14 }
 0x50f   : > { %v5844_v25 = vpop.permute.xlu1 %5843 }
 0x510   : > { %v5900_v36 = vsel %vm759_vm0, %v11690_v7, %v5844_v25 }
 0x511   : > { %5931 = vst [vmem:[%s10072_s13 + $0xb0] sm:$0xff] %v5900_v36  ;;  %v5842_v27 = vpop.permute.xlu0 %5841 }
 0x512   : > { %v5899_v58 = vsel %vm759_vm0, %v11691_v21, %v5842_v27 }
 0x513   : > { %5928 = vst [vmem:[%s10072_s13 + $0x98] sm:$0xff] %v5899_v58 }
 0x527   : > { %v5864_v34 = vpop.permute.xlu1 %5863 }
 0x528   : > { %v5902_v46 = vsel %vm829_vm4, %v5832_v61, %v5864_v34 }
 0x529   : > { %5914 = vst [vmem:[%s10072_s13 + $0x28] sm:$0xff] %v5902_v46  ;;  %v5862_v57 = vpop.permute.xlu0 %5861 }
 0x52a   : > { %v5901_v43 = vsel %vm829_vm4, %v5830_v40, %v5862_v57 }
 0x52b   : > { %5911 = vst [vmem:[%s10072_s13 + $0x10] sm:$0xff] %v5901_v43  ;;  %v5868_v12 = vpop.permute.xlu1 %5867 }
 0x52c   : > { %v5904_v50 = vsel %vm829_vm4, %v5836_v20, %v5868_v12 }
 0x52d   : > { %5920 = vst [vmem:[%s10072_s13 + $0x58] sm:$0xff] %v5904_v50  ;;  %v5866_v6 = vpop.permute.xlu0 %5865 }
 0x52e   : > { %v5903_v42 = vsel %vm829_vm4, %v5834_v56, %v5866_v6 }
 0x52f   : > { %5917 = vst [vmem:[%s10072_s13 + $0x40] sm:$0xff] %v5903_v42  ;;  %v5872_v44 = vpop.permute.xlu1 %5871 }
 0x530   : > { %v5906_v49 = vsel %vm829_vm4, %v5840_v16, %v5872_v44 }
 0x531   : > { %5926 = vst [vmem:[%s10072_s13 + $0x88] sm:$0xff] %v5906_v49  ;;  %v5870_v0 = vpop.permute.xlu0 %5869 }
 0x532   : > { %v5905_v52 = vsel %vm829_vm4, %v5838_v38, %v5870_v0 }
 0x533   : > { %5923 = vst [vmem:[%s10072_s13 + $0x70] sm:$0xff] %v5905_v52  ;;  %v5876_v22 = vpop.permute.xlu1 %5875 }
 0x534   : > { %v5908_v15 = vsel %vm829_vm4, %v5844_v25, %v5876_v22 }
 0x535   : > { %5932 = vst [vmem:[%s10072_s13 + $0xb8] sm:$0xff] %v5908_v15  ;;  %v5874_v41 = vpop.permute.xlu0 %5873 }
 0x536   : > { %v5907_v19 = vsel %vm829_vm4, %v5842_v27, %v5874_v41 }
 0x537   : > { %5929 = vst [vmem:[%s10072_s13 + $0xa0] sm:$0xff] %v5907_v19 }
 0x538   : > { %7763 = shalt.err (!%p7760_p3)
}
 0x539   : > { %s7764_s15 = scalar_lea.hbm %s11530_s14, 3072  ;;  %s7768_s25 = scalar_lea.hbm %s11590_s11, 6144 }
 0x53a   : > { %p7765_p4 = scmp.ne.s32.totalorder %s11530_s14, %s7764_s15  ;;  %p7769_p9 = scmp.lt.s32.totalorder %s11530_s14, %s11590_s11 }
 0x53b   : > { %p7770_p10 = scmp.lt.s32.totalorder %s7768_s25, %s7764_s15 }
 0x53c   : > { %p7766_p7 = pnand %p7765_p4, %p7917_p5 }
 0x53d   : > { %p7771_p11 = por %p7770_p10, %p7769_p9 }
 0x53e   : > { %p7767_p8 = pneg %p7766_p7 }
 0x540   : > { %p7772_p12 = pnand %p7771_p11, %p7767_p8 }
 0x542   : > { %7775 = shalt.err (!%p7772_p12)
}
 0x543   : > { %s7817_s22 = smov 384   ;;  %s7818_s29 = smov 24  }
 0x544   : > { %7692 = dma.vmem_to_hbm [thread:$0]  (%p7917_p5), %s11532_s26, 3072, %s11530_s14, %s11539_s21, %s7817_s22, %s7817_s22, %s7818_s29  }
 0x545 PF: > { %p7698_p13 = scmp.ge.s32.totalorder %s7810_s20, 2  ;;  %s5962_s19 = sand.u32 1, %s7798_s17  }
 0x546   : > { %s5963_s24 = scalar_lea.sflag [#allocation6], %s5962_s19 }
 0x547   : > { %p7695_p0 = pnand %p7698_p13, %p7921_p6 }
 0x549   : > { %p7696_p1 = pneg %p7695_p0 }
 0x54b   : > { %7793 = dma.done.wait (%p7696_p1), %s5963_s24, 3072  }
 0x54c   : > { %7795 = vsyncadd (%p7696_p1), %s5963_s24, 4294964224  ;;  %s11692_s15 = sld [smem:[#allocation8_spill]]  ;;  %p21_p2 = scmp.ge.s32.totalorder %s7904_s23, 4  }
 0x54d   : > { %s11693_s19 = sld [smem:[#allocation9_spill]]  ;;  %s11694_s17 = smov %s7802_s18 }
 0x54e   : > { %s11696_s20 = smov %s7904_s23  ;;  %23 = sbr.rel (!%p21_p2) target bundleno = 3 (0x3), region = 102 }
 0x552   : > { %s11695_s18 = smov %s11692_s15 }
 0x553   :  { %5968 = vsyncpa [#allocation6], 1 }
 0x554   :  { %5970 = vsyncpa [#allocation6 + $0x1], 1 }

</bundles_post_ra>
